<compile_context>
chip_gen: v5e
topology: v5e:2x2
jax: 0.10.0
libtpu: 0.0.40
codegen_flags: <defaults>
</compile_context>

<pallas_src>
import math

import jax
import jax.numpy as jnp
from jax.experimental import pallas as pl
from jax.experimental.pallas import tpu as pltpu


# ------------------------------ small helpers ------------------------------

def _silu(x):
    # Exact SiLU in f32 (bf16 storage, f32 math — v5e has no bf16 VPU/EUP).
    return x / (1.0 + jnp.exp(-x))


def _nbytes(shape, dtype):
    return math.prod(shape) * jnp.dtype(dtype).itemsize


def _vmem_limit(blocks, scratch_bytes=0):
    """Scoped-VMEM limit from the actual double-buffered block + scratch sizes."""
    need = scratch_bytes + 2 * 1024 * 1024          # margin for internal scratch
    for shape, dtype in blocks:
        need += 2 * _nbytes(shape, dtype)           # BlockSpec double-buffering
    return int(min(max(need, 16 * 1024 * 1024), 64 * 1024 * 1024))


def _row_tile(m, target):
    """Row-tile for flattened-pixel matmuls: multiple of 16 (bf16-safe) and at
    most m//2 when m is big enough, so the parallel grid has >= 2 steps."""
    t = min(target, m)
    if m >= 64 and t > m // 2:
        t = m // 2
    if t < m:
        t = max(16, (t // 16) * 16)
    return min(t, m)


def _pick_th(h, w, c, n, *, target_steps=4, max_block_bytes=2 << 20):
    """Row-block height for the bottleneck kernels: a divisor of h, >= 8 when
    possible, capped by a per-block VMEM budget and by n*(h/th) >= target_steps."""
    rows_cap = max(8, max_block_bytes // max(1, (w + 2) * c * 4) - 2)
    want_splits = max(1, -(-target_steps // max(n, 1)))       # ceil
    rows_cap = min(rows_cap, max(8, h // want_splits))
    divs = [t for t in range(8, h + 1) if h % t == 0 and t <= rows_cap]
    if divs:
        return max(divs)
    # Awkward / tiny H (e.g. prime): fall back to the whole height (correct).
    # TODO(synk): masked-tail row grid for very large prime H.
    return h


# --------------------------- conv1 + conv2 kernel ---------------------------

def _conv12_kernel(x_ref, w1_ref, b1_ref, w2_ref, b2_ref, o1_ref, o2_ref):
    """Fused CSP conv1/conv2: one read of the x tile, two 1x1-conv+SiLU outs."""
    # TODO(synk): a single (Cin, 2*hid) matmul + lane split would halve MXU
    # weight pushes; kept as two dots from the same x tile for robustness.
    x = x_ref[...]
    y1 = jnp.dot(x, w1_ref[...], preferred_element_type=jnp.float32) + b1_ref[...]
    y2 = jnp.dot(x, w2_ref[...], preferred_element_type=jnp.float32) + b2_ref[...]
    o1_ref[...] = _silu(y1).astype(o1_ref.dtype)
    o2_ref[...] = _silu(y2).astype(o2_ref.dtype)


def conv12_silu(x2d, w1, b1, w2, b2, *, tm=1024):
    """x2d: (M, Cin) flattened pixels; w1/w2: (Cin, hid); b1/b2: (1, hid) f32."""
    m, cin = x2d.shape
    hid = w1.shape[1]
    act = x2d.dtype
    tm = _row_tile(m, tm)
    grid = (pl.cdiv(m, tm),)
    vlim = _vmem_limit([((tm, cin), act), ((cin, hid), w1.dtype),
                        ((1, hid), b1.dtype), ((cin, hid), w2.dtype),
                        ((1, hid), b2.dtype), ((tm, hid), act), ((tm, hid), act)])
    return pl.pallas_call(
        _conv12_kernel,
        out_shape=(jax.ShapeDtypeStruct((m, hid), act),
                   jax.ShapeDtypeStruct((m, hid), act)),
        grid=grid,
        in_specs=[
            pl.BlockSpec((tm, cin), lambda i: (i, 0)),
            pl.BlockSpec((cin, hid), lambda i: (0, 0)),
            pl.BlockSpec((1, hid), lambda i: (0, 0)),
            pl.BlockSpec((cin, hid), lambda i: (0, 0)),
            pl.BlockSpec((1, hid), lambda i: (0, 0)),
        ],
        out_specs=(pl.BlockSpec((tm, hid), lambda i: (i, 0)),
                   pl.BlockSpec((tm, hid), lambda i: (i, 0))),
        compiler_params=pltpu.CompilerParams(
            dimension_semantics=("parallel",), vmem_limit_bytes=vlim),
    )(x2d, w1, b1, w2, b2)


# ----------------------------- bottleneck tile ------------------------------

def _bneck_tile(xc_ref, xt_ref, xb_ref, wc1_ref, bc1_ref, wc2_ref, bc2_ref,
                ypad_ref):
    """One row-tile of a Bottleneck: 1x1 conv+SiLU -> zero-padded 3x3 conv+SiLU
    -> residual add.  Returns the (th, W, C) f32 result."""
    th, w, c = xc_ref.shape
    ri = pl.program_id(1)
    is_top = ri == 0
    is_bot = ri == pl.num_programs(1) - 1

    def pw(rows2d):  # fused 1x1 conv + folded-BN bias + SiLU (f32 accumulate)
        y = jnp.dot(rows2d, wc1_ref[...], preferred_element_type=jnp.float32)
        return _silu(y + bc1_ref[...])

    x_ctr = xc_ref[...]                                         # (th, w, c)
    y_ctr = pw(x_ctr.reshape(th * w, c)).reshape(th, w, c)

    # Only the two 1-wide zero-padding columns need explicit zeroing; every
    # other ypad element is overwritten below (no full-scratch zero fill).
    zcol = jnp.zeros((th + 2, 1, c), jnp.float32)
    ypad_ref[:, 0:1, :] = zcol
    ypad_ref[:, w + 1:w + 2, :] = zcol
    ypad_ref[1:th + 1, 1:w + 1, :] = y_ctr

    zrow = jnp.zeros((1, w, c), jnp.float32)

    # Halo rows: compute the cheap 1x1 conv only when the row is inside the
    # image; write zeros (the 3x3 conv's zero padding) otherwise.
    @pl.when(jnp.logical_not(is_top))
    def _():
        ypad_ref[0:1, 1:w + 1, :] = pw(xt_ref[...].reshape(w, c)).reshape(1, w, c)

    @pl.when(is_top)
    def _():
        ypad_ref[0:1, 1:w + 1, :] = zrow

    @pl.when(jnp.logical_not(is_bot))
    def _():
        ypad_ref[th + 1:th + 2, 1:w + 1, :] = (
            pw(xb_ref[...].reshape(w, c)).reshape(1, w, c))

    @pl.when(is_bot)
    def _():
        ypad_ref[th + 1:th + 2, 1:w + 1, :] = zrow

    # 3x3 conv as 3 MXU matmuls with K = 3*C: per dy, concat the three dx
    # shifts along channels and contract against wc2[dy] of shape (3C, C).
    acc = jnp.zeros((th * w, c), jnp.float32)
    for dy in range(3):
        slab = ypad_ref[dy:dy + th]                              # (th, w+2, c)
        patch = jnp.concatenate(
            [slab[:, 0:w, :], slab[:, 1:w + 1, :], slab[:, 2:w + 2, :]],
            axis=-1).reshape(th * w, 3 * c)
        acc = acc + jnp.dot(patch.astype(wc2_ref.dtype), wc2_ref[dy],
                            preferred_element_type=jnp.float32)
    z = _silu(acc + bc2_ref[...]).reshape(th, w, c)
    return z + x_ctr.astype(jnp.float32)                         # shortcut add


def _bottleneck_kernel(xc_ref, xt_ref, xb_ref, wc1_ref, bc1_ref, wc2_ref,
                       bc2_ref, o_ref, ypad_ref):
    out = _bneck_tile(xc_ref, xt_ref, xb_ref, wc1_ref, bc1_ref, wc2_ref,
                      bc2_ref, ypad_ref)
    o_ref[...] = out.astype(o_ref.dtype)


def _bneck_cat_conv3_kernel(xc_ref, xt_ref, xb_ref, x2_ref, wc1_ref, bc1_ref,
                            wc2_ref, bc2_ref, w3a_ref, w3b_ref, b3_ref,
                            o_ref, ypad_ref):
    """Last Bottleneck fused with concat + conv3 + SiLU (x1 never hits HBM)."""
    th, w, c = xc_ref.shape
    cout = o_ref.shape[-1]
    x1n = _bneck_tile(xc_ref, xt_ref, xb_ref, wc1_ref, bc1_ref, wc2_ref,
                      bc2_ref, ypad_ref)                          # (th,w,c) f32
    y = jnp.dot(x1n.reshape(th * w, c).astype(w3a_ref.dtype), w3a_ref[...],
                preferred_element_type=jnp.float32)
    y = y + jnp.dot(x2_ref[...].reshape(th * w, c), w3b_ref[...],
                    preferred_element_type=jnp.float32)
    y = _silu(y + b3_ref[...])
    o_ref[...] = y.reshape(th, w, cout).astype(o_ref.dtype)


def _bneck_specs(th, w, c, h):
    def top_map(ni, ri): return (ni, jnp.maximum(ri * th - 1, 0), 0, 0)
    def bot_map(ni, ri): return (ni, jnp.minimum(ri * th + th, h - 1), 0, 0)
    return [
        pl.BlockSpec((None, th, w, c), lambda ni, ri: (ni, ri, 0, 0)),  # centre
        pl.BlockSpec((None, 1, w, c), top_map),                         # top halo
        pl.BlockSpec((None, 1, w, c), bot_map),                         # bottom halo
    ]


def bottleneck_fused(x1, wc1, bc1, wc2r, bc2, *, th=None):
    """x1: (N,H,W,C) bf16; wc1: (C,C); wc2r: (3,3C,C); bc1/bc2: (1,C) f32."""
    n, h, w, c = x1.shape
    act = x1.dtype
    if th is None:
        th = _pick_th(h, w, c, n)
    grid = (n, h // th)
    vlim = _vmem_limit(
        [((th, w, c), act), ((1, w, c), act), ((1, w, c), act),
         ((c, c), wc1.dtype), ((1, c), bc1.dtype),
         (wc2r.shape, wc2r.dtype), ((1, c), bc2.dtype), ((th, w, c), act)],
        scratch_bytes=_nbytes((th + 2, w + 2, c), jnp.float32))
    return pl.pallas_call(
        _bottleneck_kernel,
        out_shape=jax.ShapeDtypeStruct((n, h, w, c), act),
        grid=grid,
        in_specs=_bneck_specs(th, w, c, h) + [
            pl.BlockSpec((c, c), lambda ni, ri: (0, 0)),
            pl.BlockSpec((1, c), lambda ni, ri: (0, 0)),
            pl.BlockSpec((3, 3 * c, c), lambda ni, ri: (0, 0, 0)),
            pl.BlockSpec((1, c), lambda ni, ri: (0, 0)),
        ],
        out_specs=pl.BlockSpec((None, th, w, c), lambda ni, ri: (ni, ri, 0, 0)),
        scratch_shapes=[pltpu.VMEM((th + 2, w + 2, c), jnp.float32)],
        compiler_params=pltpu.CompilerParams(
            dimension_semantics=("parallel", "parallel"), vmem_limit_bytes=vlim),
    )(x1, x1, x1, wc1, bc1, wc2r, bc2)


def bottleneck_cat_conv3(x1, x2, wc1, bc1, wc2r, bc2, w3a, w3b, b3, *, th=None):
    """Last bottleneck + concat + conv3 fused.  Output is f32 NHWC."""
    n, h, w, c = x1.shape
    act = x1.dtype
    cout = w3a.shape[1]
    if th is None:
        th = _pick_th(h, w, c, n)
    grid = (n, h // th)
    vlim = _vmem_limit(
        [((th, w, c), act), ((1, w, c), act), ((1, w, c), act),
         ((th, w, c), act), ((c, c), wc1.dtype), ((1, c), bc1.dtype),
         (wc2r.shape, wc2r.dtype), ((1, c), bc2.dtype),
         ((c, cout), w3a.dtype), ((c, cout), w3b.dtype), ((1, cout), b3.dtype),
         ((th, w, cout), jnp.float32)],
        scratch_bytes=_nbytes((th + 2, w + 2, c), jnp.float32))
    return pl.pallas_call(
        _bneck_cat_conv3_kernel,
        out_shape=jax.ShapeDtypeStruct((n, h, w, cout), jnp.float32),
        grid=grid,
        in_specs=_bneck_specs(th, w, c, h) + [
            pl.BlockSpec((None, th, w, c), lambda ni, ri: (ni, ri, 0, 0)),  # x2
            pl.BlockSpec((c, c), lambda ni, ri: (0, 0)),
            pl.BlockSpec((1, c), lambda ni, ri: (0, 0)),
            pl.BlockSpec((3, 3 * c, c), lambda ni, ri: (0, 0, 0)),
            pl.BlockSpec((1, c), lambda ni, ri: (0, 0)),
            pl.BlockSpec((c, cout), lambda ni, ri: (0, 0)),
            pl.BlockSpec((c, cout), lambda ni, ri: (0, 0)),
            pl.BlockSpec((1, cout), lambda ni, ri: (0, 0)),
        ],
        out_specs=pl.BlockSpec((None, th, w, cout), lambda ni, ri: (ni, ri, 0, 0)),
        scratch_shapes=[pltpu.VMEM((th + 2, w + 2, c), jnp.float32)],
        compiler_params=pltpu.CompilerParams(
            dimension_semantics=("parallel", "parallel"), vmem_limit_bytes=vlim),
    )(x1, x1, x1, x2, wc1, bc1, wc2r, bc2, w3a, w3b, b3)


# ----------------- standalone concat+conv3 (n == 0 fallback) ----------------

def _cat_conv3_kernel(x1_ref, x2_ref, w3a_ref, w3b_ref, b_ref, o_ref):
    y = jnp.dot(x1_ref[...], w3a_ref[...], preferred_element_type=jnp.float32)
    y = y + jnp.dot(x2_ref[...], w3b_ref[...], preferred_element_type=jnp.float32)
    o_ref[...] = _silu(y + b_ref[...]).astype(o_ref.dtype)


def cat_conv3_silu(x1_2d, x2_2d, w3a, w3b, b3, *, tm=1024):
    m, hid = x1_2d.shape
    cout = w3a.shape[1]
    act = x1_2d.dtype
    tm = _row_tile(m, tm)
    grid = (pl.cdiv(m, tm),)
    vlim = _vmem_limit([((tm, hid), act), ((tm, hid), act),
                        ((hid, cout), w3a.dtype), ((hid, cout), w3b.dtype),
                        ((1, cout), b3.dtype), ((tm, cout), jnp.float32)])
    return pl.pallas_call(
        _cat_conv3_kernel,
        out_shape=jax.ShapeDtypeStruct((m, cout), jnp.float32),
        grid=grid,
        in_specs=[pl.BlockSpec((tm, hid), lambda i: (i, 0)),
                  pl.BlockSpec((tm, hid), lambda i: (i, 0)),
                  pl.BlockSpec((hid, cout), lambda i: (0, 0)),
                  pl.BlockSpec((hid, cout), lambda i: (0, 0)),
                  pl.BlockSpec((1, cout), lambda i: (0, 0))],
        out_specs=pl.BlockSpec((tm, cout), lambda i: (i, 0)),
        compiler_params=pltpu.CompilerParams(
            dimension_semantics=("parallel",), vmem_limit_bytes=vlim),
    )(x1_2d, x2_2d, w3a, w3b, b3)


# ----------------------- parameter setup (plain JAX) -----------------------

def _fold_bn(w, gamma, beta, mean, var, eps=1e-5):
    scale = gamma / jnp.sqrt(var + eps)
    return (w * scale).astype(jnp.float32), (beta - mean * scale).astype(jnp.float32)


def _init_baseconv(key, cin, cout, ksize):
    kw, kg, kb, km, kv = jax.random.split(key, 5)
    fan_in = cin * ksize * ksize
    bound = 1.0 / math.sqrt(fan_in)
    shape = (cin, cout) if ksize == 1 else (ksize, ksize, cin, cout)
    w = jax.random.uniform(kw, shape, jnp.float32, -bound, bound)
    gamma = 1.0 + 0.1 * jax.random.normal(kg, (cout,), jnp.float32)
    beta = 0.1 * jax.random.normal(kb, (cout,), jnp.float32)
    mean = 0.1 * jax.random.normal(km, (cout,), jnp.float32)
    var = 1.0 + 0.1 * jax.random.uniform(kv, (cout,), jnp.float32)
    return _fold_bn(w, gamma, beta, mean, var)


def init_csp_params(key, in_channels, out_channels, n=1, expansion=0.5):
    hidden = int(out_channels * expansion)
    keys = jax.random.split(key, 3 + 2 * n)
    params = {
        "conv1": _init_baseconv(keys[0], in_channels, hidden, 1),
        "conv2": _init_baseconv(keys[1], in_channels, hidden, 1),
        "conv3": _init_baseconv(keys[2], 2 * hidden, out_channels, 1),
        "bottlenecks": [],
    }
    for i in range(n):
        c1 = _init_baseconv(keys[3 + 2 * i], hidden, hidden, 1)   # 1x1
        c2 = _init_baseconv(keys[4 + 2 * i], hidden, hidden, 3)   # 3x3
        params["bottlenecks"].append((c1, c2))
    return params


# ------------------------------ CSPLayer fwd -------------------------------

def csp_layer_forward(x_nchw, params, *, act_dtype=jnp.bfloat16):
    x = jnp.transpose(x_nchw, (0, 2, 3, 1)).astype(act_dtype)   # NCHW -> NHWC
    n, h, w, cin = x.shape
    w1, b1 = params["conv1"]
    w2, b2 = params["conv2"]
    w3, b3 = params["conv3"]
    hid = w1.shape[1]
    cout = w3.shape[1]
    m = n * h * w

    # conv1 + conv2: one HBM read of x, two SiLU'd 1x1-conv outputs (bf16).
    x1_2d, x2_2d = conv12_silu(
        x.reshape(m, cin),
        w1.astype(act_dtype), b1.reshape(1, hid),
        w2.astype(act_dtype), b2.reshape(1, hid))
    x1 = x1_2d.reshape(n, h, w, hid)
    x2 = x2_2d.reshape(n, h, w, hid)

    w3a = w3[:hid].astype(act_dtype)
    w3b = w3[hid:].astype(act_dtype)
    b3r = b3.reshape(1, cout)

    prepped = [(wc1.astype(act_dtype), bc1.reshape(1, hid),
                wc2.reshape(3, 3 * hid, hid).astype(act_dtype),
                bc2.reshape(1, hid))
               for (wc1, bc1), (wc2, bc2) in params["bottlenecks"]]

    if not prepped:
        out = cat_conv3_silu(x1_2d, x2_2d, w3a, w3b, b3r).reshape(n, h, w, cout)
    else:
        for wc1, bc1, wc2r, bc2 in prepped[:-1]:
            x1 = bottleneck_fused(x1, wc1, bc1, wc2r, bc2)
        wc1, bc1, wc2r, bc2 = prepped[-1]
        # last Bottleneck + concat + conv3 in one kernel (x1 stays on-chip).
        out = bottleneck_cat_conv3(x1, x2, wc1, bc1, wc2r, bc2, w3a, w3b, b3r)

    return jnp.transpose(out, (0, 3, 1, 2)).astype(jnp.float32)  # -> NCHW


# -------------------------- pure-JAX reference -----------------------------

def _ref_baseconv(x_nhwc, w, b, ksize):
    if ksize == 1:
        cin, cout = w.shape
        wk = w.reshape(1, 1, cin, cout)
    else:
        wk = w
    y = jax.lax.conv_general_dilated(
        x_nhwc, wk, window_strides=(1, 1), padding="SAME",
        dimension_numbers=("NHWC", "HWIO", "NHWC"))
    return jax.nn.silu(y + b)


def csp_layer_ref(x_nchw, params):
    x = jnp.transpose(x_nchw, (0, 2, 3, 1))
    w1, b1 = params["conv1"]
    w2, b2 = params["conv2"]
    x1 = _ref_baseconv(x, w1, b1, 1)
    x2 = _ref_baseconv(x, w2, b2, 1)
    for (wc1, bc1), (wc2, bc2) in params["bottlenecks"]:
        y = _ref_baseconv(x1, wc1, bc1, 1)
        y = _ref_baseconv(y, wc2, bc2, 3)
        x1 = y + x1
    cat = jnp.concatenate([x1, x2], axis=-1)
    w3, b3 = params["conv3"]
    out = _ref_baseconv(cat, w3, b3, 1)
    return jnp.transpose(out, (0, 3, 1, 2))


# ---------------------------------- main ------------------------------------

if __name__ == "__main__":
    key = jax.random.PRNGKey(0)
    k_x, k_p = jax.random.split(key)

    N, C_IN, H, W = 2, 16, 16, 16
    C_OUT, N_BOTTLENECK = 16, 1

    x = jax.random.normal(k_x, (N, C_IN, H, W), jnp.float32)   # NCHW like PyTorch
    params = init_csp_params(k_p, C_IN, C_OUT, n=N_BOTTLENECK, expansion=0.5)

    fwd = jax.jit(csp_layer_forward)
    out = jax.block_until_ready(fwd(x, params))
    assert out.shape == (N, C_OUT, H, W), out.shape

    ref = jax.block_until_ready(csp_layer_ref(x, params))
    max_err = float(jnp.max(jnp.abs(out - ref)))
    assert max_err < 5e-2, f"max abs err too large: {max_err}"

    print("KERNEL_OK")
</pallas_src>

<mosaic_0001>
module attributes {stable_mosaic.version = 11 : i64} {
  func.func @_bneck_cat_conv3_kernel(%arg0: i32, %arg1: i32, %arg2: memref<1x8x16x8xbf16, #tpu.memory_space<vmem>>, %arg3: memref<1x1x16x8xbf16, #tpu.memory_space<vmem>>, %arg4: memref<1x1x16x8xbf16, #tpu.memory_space<vmem>>, %arg5: memref<1x8x16x8xbf16, #tpu.memory_space<vmem>>, %arg6: memref<8x8xbf16, #tpu.memory_space<vmem>>, %arg7: memref<1x8xf32, #tpu.memory_space<vmem>>, %arg8: memref<3x24x8xbf16, #tpu.memory_space<vmem>>, %arg9: memref<1x8xf32, #tpu.memory_space<vmem>>, %arg10: memref<8x16xbf16, #tpu.memory_space<vmem>>, %arg11: memref<8x16xbf16, #tpu.memory_space<vmem>>, %arg12: memref<1x16xf32, #tpu.memory_space<vmem>>, %arg13: memref<1x8x16x16xf32, #tpu.memory_space<vmem>>, %arg14: memref<10x18x8xf32, #tpu.memory_space<vmem>>) attributes {dimension_semantics = [#tpu.dimension_semantics<parallel>, #tpu.dimension_semantics<parallel>], iteration_bounds = array<i64: 2, 2>, scalar_prefetch = 0 : i64, scratch_operands = 1 : i64, tpu.core_type = #tpu.core_type<tc>, window_params = [{transform_indices = @transform_0, window_bounds = array<i64: 1, 8, 16, 8>}, {transform_indices = @transform_1, window_bounds = array<i64: 1, 1, 16, 8>}, {transform_indices = @transform_2, window_bounds = array<i64: 1, 1, 16, 8>}, {transform_indices = @transform_3, window_bounds = array<i64: 1, 8, 16, 8>}, {pipeline_mode = #tpu.pipeline_mode<synchronous>, transform_indices = @transform_4, window_bounds = array<i64: 8, 8>}, {pipeline_mode = #tpu.pipeline_mode<synchronous>, transform_indices = @transform_5, window_bounds = array<i64: 1, 8>}, {pipeline_mode = #tpu.pipeline_mode<synchronous>, transform_indices = @transform_6, window_bounds = array<i64: 3, 24, 8>}, {pipeline_mode = #tpu.pipeline_mode<synchronous>, transform_indices = @transform_7, window_bounds = array<i64: 1, 8>}, {pipeline_mode = #tpu.pipeline_mode<synchronous>, transform_indices = @transform_8, window_bounds = array<i64: 8, 16>}, {pipeline_mode = #tpu.pipeline_mode<synchronous>, transform_indices = @transform_9, window_bounds = array<i64: 8, 16>}, {pipeline_mode = #tpu.pipeline_mode<synchronous>, transform_indices = @transform_10, window_bounds = array<i64: 1, 16>}, {transform_indices = @transform_11, window_bounds = array<i64: 1, 8, 16, 16>}]} {
    %c0_i32 = arith.constant 0 : i32
    %0 = arith.cmpi eq, %arg1, %c0_i32 : i32
    %c1_i32 = arith.constant 1 : i32
    %1 = arith.cmpi eq, %arg1, %c1_i32 : i32
    %c0 = arith.constant 0 : index
    %c0_0 = arith.constant 0 : index
    %c0_1 = arith.constant 0 : index
    %c0_2 = arith.constant 0 : index
    %2 = vector.load %arg2[%c0, %c0_0, %c0_1, %c0_2] : memref<1x8x16x8xbf16, #tpu.memory_space<vmem>>, vector<1x8x16x8xbf16>
    %3 = vector.shape_cast %2 : vector<1x8x16x8xbf16> to vector<8x16x8xbf16>
    %4 = vector.shape_cast %3 : vector<8x16x8xbf16> to vector<128x8xbf16>
    %c0_3 = arith.constant 0 : index
    %c0_4 = arith.constant 0 : index
    %5 = vector.load %arg6[%c0_3, %c0_4] : memref<8x8xbf16, #tpu.memory_space<vmem>>, vector<8x8xbf16>
    %cst = arith.constant dense<0.000000e+00> : vector<128x8xf32>
    %6 = tpu.matmul %4, %5, %cst {dimension_numbers = #tpu.dot_dimension_numbers<[1], [0], [0], [1], [0, 0, 1, 1], [], []>} : vector<128x8xbf16>, vector<8x8xbf16>, vector<128x8xf32> -> vector<128x8xf32>
    %c0_5 = arith.constant 0 : index
    %c0_6 = arith.constant 0 : index
    %7 = vector.load %arg7[%c0_5, %c0_6] : memref<1x8xf32, #tpu.memory_space<vmem>>, vector<1x8xf32>
    %8 = vector.broadcast %7 : vector<1x8xf32> to vector<128x8xf32>
    %9 = arith.addf %6, %8 : vector<128x8xf32>
    %cst_7 = arith.constant 0.000000e+00 : f32
    %10 = vector.broadcast %cst_7 : f32 to vector<128x8xf32>
    %11 = arith.subf %10, %9 : vector<128x8xf32>
    %12 = math.exp %11 : vector<128x8xf32>
    %cst_8 = arith.constant 1.000000e+00 : f32
    %13 = vector.broadcast %cst_8 : f32 to vector<128x8xf32>
    %14 = arith.addf %13, %12 : vector<128x8xf32>
    %15 = arith.divf %9, %14 : vector<128x8xf32>
    %16 = vector.shape_cast %15 : vector<128x8xf32> to vector<8x16x8xf32>
    %cst_9 = arith.constant 0.000000e+00 : f32
    %17 = vector.broadcast %cst_9 : f32 to vector<10x1x8xf32>
    %c0_10 = arith.constant 0 : index
    %c0_11 = arith.constant 0 : index
    %c0_12 = arith.constant 0 : index
    %18 = vector.load %arg14[%c0_10, %c0_11, %c0_12] : memref<10x18x8xf32, #tpu.memory_space<vmem>>, vector<10x1x8xf32>
    tpu.vector_store %arg14[%c0_10, %c0_11, %c0_12], %17 {strides = array<i32>} : memref<10x18x8xf32, #tpu.memory_space<vmem>>, vector<10x1x8xf32>,
    %c0_13 = arith.constant 0 : index
    %c17 = arith.constant 17 : index
    %c0_14 = arith.constant 0 : index
    %19 = vector.load %arg14[%c0_13, %c17, %c0_14] : memref<10x18x8xf32, #tpu.memory_space<vmem>>, vector<10x1x8xf32>
    tpu.vector_store %arg14[%c0_13, %c17, %c0_14], %17 {strides = array<i32>} : memref<10x18x8xf32, #tpu.memory_space<vmem>>, vector<10x1x8xf32>,
    %c1 = arith.constant 1 : index
    %c1_15 = arith.constant 1 : index
    %c0_16 = arith.constant 0 : index
    %20 = vector.load %arg14[%c1, %c1_15, %c0_16] : memref<10x18x8xf32, #tpu.memory_space<vmem>>, vector<8x16x8xf32>
    tpu.vector_store %arg14[%c1, %c1_15, %c0_16], %16 {strides = array<i32>} : memref<10x18x8xf32, #tpu.memory_space<vmem>>, vector<8x16x8xf32>,
    %cst_17 = arith.constant 0.000000e+00 : f32
    %21 = vector.broadcast %cst_17 : f32 to vector<1x16x8xf32>
    %true = arith.constant true
    %22 = arith.xori %0, %true : i1
    %23 = arith.extui %22 : i1 to i32
    %c0_i32_18 = arith.constant 0 : i32
    %24 = arith.cmpi ne, %23, %c0_i32_18 : i32
    scf.if %24 {
      %c0_66 = arith.constant 0 : index
      %c0_67 = arith.constant 0 : index
      %c0_68 = arith.constant 0 : index
      %c0_69 = arith.constant 0 : index
      %101 = vector.load %arg3[%c0_66, %c0_67, %c0_68, %c0_69] : memref<1x1x16x8xbf16, #tpu.memory_space<vmem>>, vector<1x1x16x8xbf16>
      %102 = vector.shape_cast %101 : vector<1x1x16x8xbf16> to vector<1x16x8xbf16>
      %103 = vector.shape_cast %102 : vector<1x16x8xbf16> to vector<16x8xbf16>
      %c0_70 = arith.constant 0 : index
      %c0_71 = arith.constant 0 : index
      %104 = vector.load %arg6[%c0_70, %c0_71] : memref<8x8xbf16, #tpu.memory_space<vmem>>, vector<8x8xbf16>
      %cst_72 = arith.constant dense<0.000000e+00> : vector<16x8xf32>
      %105 = tpu.matmul %103, %104, %cst_72 {dimension_numbers = #tpu.dot_dimension_numbers<[1], [0], [0], [1], [0, 0, 1, 1], [], []>} : vector<16x8xbf16>, vector<8x8xbf16>, vector<16x8xf32> -> vector<16x8xf32>
      %c0_73 = arith.constant 0 : index
      %c0_74 = arith.constant 0 : index
      %106 = vector.load %arg7[%c0_73, %c0_74] : memref<1x8xf32, #tpu.memory_space<vmem>>, vector<1x8xf32>
      %107 = vector.broadcast %106 : vector<1x8xf32> to vector<16x8xf32>
      %108 = arith.addf %105, %107 : vector<16x8xf32>
      %cst_75 = arith.constant 0.000000e+00 : f32
      %109 = vector.broadcast %cst_75 : f32 to vector<16x8xf32>
      %110 = arith.subf %109, %108 : vector<16x8xf32>
      %111 = math.exp %110 : vector<16x8xf32>
      %cst_76 = arith.constant 1.000000e+00 : f32
      %112 = vector.broadcast %cst_76 : f32 to vector<16x8xf32>
      %113 = arith.addf %112, %111 : vector<16x8xf32>
      %114 = arith.divf %108, %113 : vector<16x8xf32>
      %115 = vector.shape_cast %114 : vector<16x8xf32> to vector<1x16x8xf32>
      %c0_77 = arith.constant 0 : index
      %c1_78 = arith.constant 1 : index
      %c0_79 = arith.constant 0 : index
      %116 = vector.load %arg14[%c0_77, %c1_78, %c0_79] : memref<10x18x8xf32, #tpu.memory_space<vmem>>, vector<1x16x8xf32>
      tpu.vector_store %arg14[%c0_77, %c1_78, %c0_79], %115 {strides = array<i32>} : memref<10x18x8xf32, #tpu.memory_space<vmem>>, vector<1x16x8xf32>,
    } else {
    }
    %25 = arith.extui %0 : i1 to i32
    %c0_i32_19 = arith.constant 0 : i32
    %26 = arith.cmpi ne, %25, %c0_i32_19 : i32
    scf.if %26 {
      %c0_66 = arith.constant 0 : index
      %c1_67 = arith.constant 1 : index
      %c0_68 = arith.constant 0 : index
      %101 = vector.load %arg14[%c0_66, %c1_67, %c0_68] : memref<10x18x8xf32, #tpu.memory_space<vmem>>, vector<1x16x8xf32>
      tpu.vector_store %arg14[%c0_66, %c1_67, %c0_68], %21 {strides = array<i32>} : memref<10x18x8xf32, #tpu.memory_space<vmem>>, vector<1x16x8xf32>,
    } else {
    }
    %true_20 = arith.constant true
    %27 = arith.xori %1, %true_20 : i1
    %28 = arith.extui %27 : i1 to i32
    %c0_i32_21 = arith.constant 0 : i32
    %29 = arith.cmpi ne, %28, %c0_i32_21 : i32
    scf.if %29 {
      %c0_66 = arith.constant 0 : index
      %c0_67 = arith.constant 0 : index
      %c0_68 = arith.constant 0 : index
      %c0_69 = arith.constant 0 : index
      %101 = vector.load %arg4[%c0_66, %c0_67, %c0_68, %c0_69] : memref<1x1x16x8xbf16, #tpu.memory_space<vmem>>, vector<1x1x16x8xbf16>
      %102 = vector.shape_cast %101 : vector<1x1x16x8xbf16> to vector<1x16x8xbf16>
      %103 = vector.shape_cast %102 : vector<1x16x8xbf16> to vector<16x8xbf16>
      %c0_70 = arith.constant 0 : index
      %c0_71 = arith.constant 0 : index
      %104 = vector.load %arg6[%c0_70, %c0_71] : memref<8x8xbf16, #tpu.memory_space<vmem>>, vector<8x8xbf16>
      %cst_72 = arith.constant dense<0.000000e+00> : vector<16x8xf32>
      %105 = tpu.matmul %103, %104, %cst_72 {dimension_numbers = #tpu.dot_dimension_numbers<[1], [0], [0], [1], [0, 0, 1, 1], [], []>} : vector<16x8xbf16>, vector<8x8xbf16>, vector<16x8xf32> -> vector<16x8xf32>
      %c0_73 = arith.constant 0 : index
      %c0_74 = arith.constant 0 : index
      %106 = vector.load %arg7[%c0_73, %c0_74] : memref<1x8xf32, #tpu.memory_space<vmem>>, vector<1x8xf32>
      %107 = vector.broadcast %106 : vector<1x8xf32> to vector<16x8xf32>
      %108 = arith.addf %105, %107 : vector<16x8xf32>
      %cst_75 = arith.constant 0.000000e+00 : f32
      %109 = vector.broadcast %cst_75 : f32 to vector<16x8xf32>
      %110 = arith.subf %109, %108 : vector<16x8xf32>
      %111 = math.exp %110 : vector<16x8xf32>
      %cst_76 = arith.constant 1.000000e+00 : f32
      %112 = vector.broadcast %cst_76 : f32 to vector<16x8xf32>
      %113 = arith.addf %112, %111 : vector<16x8xf32>
      %114 = arith.divf %108, %113 : vector<16x8xf32>
      %115 = vector.shape_cast %114 : vector<16x8xf32> to vector<1x16x8xf32>
      %c9 = arith.constant 9 : index
      %c1_77 = arith.constant 1 : index
      %c0_78 = arith.constant 0 : index
      %116 = vector.load %arg14[%c9, %c1_77, %c0_78] : memref<10x18x8xf32, #tpu.memory_space<vmem>>, vector<1x16x8xf32>
      tpu.vector_store %arg14[%c9, %c1_77, %c0_78], %115 {strides = array<i32>} : memref<10x18x8xf32, #tpu.memory_space<vmem>>, vector<1x16x8xf32>,
    } else {
    }
    %30 = arith.extui %1 : i1 to i32
    %c0_i32_22 = arith.constant 0 : i32
    %31 = arith.cmpi ne, %30, %c0_i32_22 : i32
    scf.if %31 {
      %c9 = arith.constant 9 : index
      %c1_66 = arith.constant 1 : index
      %c0_67 = arith.constant 0 : index
      %101 = vector.load %arg14[%c9, %c1_66, %c0_67] : memref<10x18x8xf32, #tpu.memory_space<vmem>>, vector<1x16x8xf32>
      tpu.vector_store %arg14[%c9, %c1_66, %c0_67], %21 {strides = array<i32>} : memref<10x18x8xf32, #tpu.memory_space<vmem>>, vector<1x16x8xf32>,
    } else {
    }
    %cst_23 = arith.constant 0.000000e+00 : f32
    %32 = vector.broadcast %cst_23 : f32 to vector<128x8xf32>
    %c0_24 = arith.constant 0 : index
    %c0_25 = arith.constant 0 : index
    %c0_26 = arith.constant 0 : index
    %33 = vector.load %arg14[%c0_24, %c0_25, %c0_26] : memref<10x18x8xf32, #tpu.memory_space<vmem>>, vector<8x18x8xf32>
    %34 = vector.extract_strided_slice %33 {offsets = [0, 0, 0], sizes = [8, 16, 8], strides = [1, 1, 1]} : vector<8x18x8xf32> to vector<8x16x8xf32>
    %35 = vector.extract_strided_slice %33 {offsets = [0, 1, 0], sizes = [8, 16, 8], strides = [1, 1, 1]} : vector<8x18x8xf32> to vector<8x16x8xf32>
    %36 = vector.extract_strided_slice %33 {offsets = [0, 2, 0], sizes = [8, 16, 8], strides = [1, 1, 1]} : vector<8x18x8xf32> to vector<8x16x8xf32>
    %37 = tpu.concatenate %34, %35, %36 in 2 : vector<8x16x8xf32>, vector<8x16x8xf32>, vector<8x16x8xf32> -> vector<8x16x24xf32>
    %38 = vector.shape_cast %37 : vector<8x16x24xf32> to vector<128x24xf32>
    %39 = arith.truncf %38 : vector<128x24xf32> to vector<128x24xbf16>
    %c0_27 = arith.constant 0 : index
    %c0_28 = arith.constant 0 : index
    %c0_29 = arith.constant 0 : index
    %40 = vector.load %arg8[%c0_27, %c0_28, %c0_29] : memref<3x24x8xbf16, #tpu.memory_space<vmem>>, vector<1x24x8xbf16>
    %41 = vector.shape_cast %40 : vector<1x24x8xbf16> to vector<24x8xbf16>
    %cst_30 = arith.constant dense<0.000000e+00> : vector<128x8xf32>
    %42 = tpu.matmul %39, %41, %cst_30 {dimension_numbers = #tpu.dot_dimension_numbers<[1], [0], [0], [1], [0, 0, 1, 1], [], []>} : vector<128x24xbf16>, vector<24x8xbf16>, vector<128x8xf32> -> vector<128x8xf32>
    %43 = arith.addf %32, %42 : vector<128x8xf32>
    %c1_31 = arith.constant 1 : index
    %c0_32 = arith.constant 0 : index
    %c0_33 = arith.constant 0 : index
    %44 = vector.load %arg14[%c1_31, %c0_32, %c0_33] : memref<10x18x8xf32, #tpu.memory_space<vmem>>, vector<8x18x8xf32>
    %45 = vector.extract_strided_slice %44 {offsets = [0, 0, 0], sizes = [8, 16, 8], strides = [1, 1, 1]} : vector<8x18x8xf32> to vector<8x16x8xf32>
    %46 = vector.extract_strided_slice %44 {offsets = [0, 1, 0], sizes = [8, 16, 8], strides = [1, 1, 1]} : vector<8x18x8xf32> to vector<8x16x8xf32>
    %47 = vector.extract_strided_slice %44 {offsets = [0, 2, 0], sizes = [8, 16, 8], strides = [1, 1, 1]} : vector<8x18x8xf32> to vector<8x16x8xf32>
    %48 = tpu.concatenate %45, %46, %47 in 2 : vector<8x16x8xf32>, vector<8x16x8xf32>, vector<8x16x8xf32> -> vector<8x16x24xf32>
    %49 = vector.shape_cast %48 : vector<8x16x24xf32> to vector<128x24xf32>
    %50 = arith.truncf %49 : vector<128x24xf32> to vector<128x24xbf16>
    %c1_34 = arith.constant 1 : index
    %c0_35 = arith.constant 0 : index
    %c0_36 = arith.constant 0 : index
    %51 = vector.load %arg8[%c1_34, %c0_35, %c0_36] : memref<3x24x8xbf16, #tpu.memory_space<vmem>>, vector<1x24x8xbf16>
    %52 = vector.shape_cast %51 : vector<1x24x8xbf16> to vector<24x8xbf16>
    %cst_37 = arith.constant dense<0.000000e+00> : vector<128x8xf32>
    %53 = tpu.matmul %50, %52, %cst_37 {dimension_numbers = #tpu.dot_dimension_numbers<[1], [0], [0], [1], [0, 0, 1, 1], [], []>} : vector<128x24xbf16>, vector<24x8xbf16>, vector<128x8xf32> -> vector<128x8xf32>
    %54 = arith.addf %43, %53 : vector<128x8xf32>
    %c2 = arith.constant 2 : index
    %c0_38 = arith.constant 0 : index
    %c0_39 = arith.constant 0 : index
    %55 = vector.load %arg14[%c2, %c0_38, %c0_39] : memref<10x18x8xf32, #tpu.memory_space<vmem>>, vector<8x18x8xf32>
    %56 = vector.extract_strided_slice %55 {offsets = [0, 0, 0], sizes = [8, 16, 8], strides = [1, 1, 1]} : vector<8x18x8xf32> to vector<8x16x8xf32>
    %57 = vector.extract_strided_slice %55 {offsets = [0, 1, 0], sizes = [8, 16, 8], strides = [1, 1, 1]} : vector<8x18x8xf32> to vector<8x16x8xf32>
    %58 = vector.extract_strided_slice %55 {offsets = [0, 2, 0], sizes = [8, 16, 8], strides = [1, 1, 1]} : vector<8x18x8xf32> to vector<8x16x8xf32>
    %59 = tpu.concatenate %56, %57, %58 in 2 : vector<8x16x8xf32>, vector<8x16x8xf32>, vector<8x16x8xf32> -> vector<8x16x24xf32>
    %60 = vector.shape_cast %59 : vector<8x16x24xf32> to vector<128x24xf32>
    %61 = arith.truncf %60 : vector<128x24xf32> to vector<128x24xbf16>
    %c2_40 = arith.constant 2 : index
    %c0_41 = arith.constant 0 : index
    %c0_42 = arith.constant 0 : index
    %62 = vector.load %arg8[%c2_40, %c0_41, %c0_42] : memref<3x24x8xbf16, #tpu.memory_space<vmem>>, vector<1x24x8xbf16>
    %63 = vector.shape_cast %62 : vector<1x24x8xbf16> to vector<24x8xbf16>
    %cst_43 = arith.constant dense<0.000000e+00> : vector<128x8xf32>
    %64 = tpu.matmul %61, %63, %cst_43 {dimension_numbers = #tpu.dot_dimension_numbers<[1], [0], [0], [1], [0, 0, 1, 1], [], []>} : vector<128x24xbf16>, vector<24x8xbf16>, vector<128x8xf32> -> vector<128x8xf32>
    %65 = arith.addf %54, %64 : vector<128x8xf32>
    %c0_44 = arith.constant 0 : index
    %c0_45 = arith.constant 0 : index
    %66 = vector.load %arg9[%c0_44, %c0_45] : memref<1x8xf32, #tpu.memory_space<vmem>>, vector<1x8xf32>
    %67 = vector.broadcast %66 : vector<1x8xf32> to vector<128x8xf32>
    %68 = arith.addf %65, %67 : vector<128x8xf32>
    %cst_46 = arith.constant 0.000000e+00 : f32
    %69 = vector.broadcast %cst_46 : f32 to vector<128x8xf32>
    %70 = arith.subf %69, %68 : vector<128x8xf32>
    %71 = math.exp %70 : vector<128x8xf32>
    %cst_47 = arith.constant 1.000000e+00 : f32
    %72 = vector.broadcast %cst_47 : f32 to vector<128x8xf32>
    %73 = arith.addf %72, %71 : vector<128x8xf32>
    %74 = arith.divf %68, %73 : vector<128x8xf32>
    %75 = vector.shape_cast %74 : vector<128x8xf32> to vector<8x16x8xf32>
    %76 = arith.extf %3 : vector<8x16x8xbf16> to vector<8x16x8xf32>
    %77 = arith.addf %75, %76 : vector<8x16x8xf32>
    %78 = vector.shape_cast %77 : vector<8x16x8xf32> to vector<128x8xf32>
    %79 = arith.truncf %78 : vector<128x8xf32> to vector<128x8xbf16>
    %c0_48 = arith.constant 0 : index
    %c0_49 = arith.constant 0 : index
    %80 = vector.load %arg10[%c0_48, %c0_49] : memref<8x16xbf16, #tpu.memory_space<vmem>>, vector<8x16xbf16>
    %cst_50 = arith.constant dense<0.000000e+00> : vector<128x16xf32>
    %81 = tpu.matmul %79, %80, %cst_50 {dimension_numbers = #tpu.dot_dimension_numbers<[1], [0], [0], [1], [0, 0, 1, 1], [], []>} : vector<128x8xbf16>, vector<8x16xbf16>, vector<128x16xf32> -> vector<128x16xf32>
    %c0_51 = arith.constant 0 : index
    %c0_52 = arith.constant 0 : index
    %c0_53 = arith.constant 0 : index
    %c0_54 = arith.constant 0 : index
    %82 = vector.load %arg5[%c0_51, %c0_52, %c0_53, %c0_54] : memref<1x8x16x8xbf16, #tpu.memory_space<vmem>>, vector<1x8x16x8xbf16>
    %83 = vector.shape_cast %82 : vector<1x8x16x8xbf16> to vector<8x16x8xbf16>
    %84 = vector.shape_cast %83 : vector<8x16x8xbf16> to vector<128x8xbf16>
    %c0_55 = arith.constant 0 : index
    %c0_56 = arith.constant 0 : index
    %85 = vector.load %arg11[%c0_55, %c0_56] : memref<8x16xbf16, #tpu.memory_space<vmem>>, vector<8x16xbf16>
    %cst_57 = arith.constant dense<0.000000e+00> : vector<128x16xf32>
    %86 = tpu.matmul %84, %85, %cst_57 {dimension_numbers = #tpu.dot_dimension_numbers<[1], [0], [0], [1], [0, 0, 1, 1], [], []>} : vector<128x8xbf16>, vector<8x16xbf16>, vector<128x16xf32> -> vector<128x16xf32>
    %87 = arith.addf %81, %86 : vector<128x16xf32>
    %c0_58 = arith.constant 0 : index
    %c0_59 = arith.constant 0 : index
    %88 = vector.load %arg12[%c0_58, %c0_59] : memref<1x16xf32, #tpu.memory_space<vmem>>, vector<1x16xf32>
    %89 = vector.broadcast %88 : vector<1x16xf32> to vector<128x16xf32>
    %90 = arith.addf %87, %89 : vector<128x16xf32>
    %cst_60 = arith.constant 0.000000e+00 : f32
    %91 = vector.broadcast %cst_60 : f32 to vector<128x16xf32>
    %92 = arith.subf %91, %90 : vector<128x16xf32>
    %93 = math.exp %92 : vector<128x16xf32>
    %cst_61 = arith.constant 1.000000e+00 : f32
    %94 = vector.broadcast %cst_61 : f32 to vector<128x16xf32>
    %95 = arith.addf %94, %93 : vector<128x16xf32>
    %96 = arith.divf %90, %95 : vector<128x16xf32>
    %97 = vector.shape_cast %96 : vector<128x16xf32> to vector<8x16x16xf32>
    %c0_62 = arith.constant 0 : index
    %c0_63 = arith.constant 0 : index
    %c0_64 = arith.constant 0 : index
    %c0_65 = arith.constant 0 : index
    %98 = vector.load %arg13[%c0_62, %c0_63, %c0_64, %c0_65] : memref<1x8x16x16xf32, #tpu.memory_space<vmem>>, vector<1x8x16x16xf32>
    %99 = vector.shape_cast %98 : vector<1x8x16x16xf32> to vector<8x16x16xf32>
    %100 = vector.shape_cast %97 : vector<8x16x16xf32> to vector<1x8x16x16xf32>
    tpu.vector_store %arg13[%c0_62, %c0_63, %c0_64, %c0_65], %100 {strides = array<i32>} : memref<1x8x16x16xf32, #tpu.memory_space<vmem>>, vector<1x8x16x16xf32>,
    return
  }
  func.func @transform_0(%arg0: i32, %arg1: i32) -> (i32, i32, i32, i32) {
    %c0_i32 = arith.constant 0 : i32
    %c0_i32_0 = arith.constant 0 : i32
    %c0_i32_1 = arith.constant 0 : i32
    return %arg0, %arg1, %c0_i32, %c0_i32_0 : i32, i32, i32, i32
  }
  func.func @transform_1(%arg0: i32, %arg1: i32) -> (i32, i32, i32, i32) {
    %c8_i32 = arith.constant 8 : i32
    %0 = arith.muli %arg1, %c8_i32 : i32
    %c1_i32 = arith.constant 1 : i32
    %1 = arith.subi %0, %c1_i32 : i32
    %c0_i32 = arith.constant 0 : i32
    %2 = arith.maxsi %1, %c0_i32 : i32
    %c0_i32_0 = arith.constant 0 : i32
    %c0_i32_1 = arith.constant 0 : i32
    %c0_i32_2 = arith.constant 0 : i32
    return %arg0, %2, %c0_i32_0, %c0_i32_1 : i32, i32, i32, i32
  }
  func.func @transform_2(%arg0: i32, %arg1: i32) -> (i32, i32, i32, i32) {
    %c8_i32 = arith.constant 8 : i32
    %0 = arith.muli %arg1, %c8_i32 : i32
    %c8_i32_0 = arith.constant 8 : i32
    %1 = arith.addi %0, %c8_i32_0 : i32
    %c15_i32 = arith.constant 15 : i32
    %2 = arith.minsi %1, %c15_i32 : i32
    %c0_i32 = arith.constant 0 : i32
    %c0_i32_1 = arith.constant 0 : i32
    %c0_i32_2 = arith.constant 0 : i32
    return %arg0, %2, %c0_i32, %c0_i32_1 : i32, i32, i32, i32
  }
  func.func @transform_3(%arg0: i32, %arg1: i32) -> (i32, i32, i32, i32) {
    %c0_i32 = arith.constant 0 : i32
    %c0_i32_0 = arith.constant 0 : i32
    %c0_i32_1 = arith.constant 0 : i32
    return %arg0, %arg1, %c0_i32, %c0_i32_0 : i32, i32, i32, i32
  }
  func.func @transform_4(%arg0: i32, %arg1: i32) -> (i32, i32) {
    %c0_i32 = arith.constant 0 : i32
    %c0_i32_0 = arith.constant 0 : i32
    %c0_i32_1 = arith.constant 0 : i32
    return %c0_i32, %c0_i32_0 : i32, i32
  }
  func.func @transform_5(%arg0: i32, %arg1: i32) -> (i32, i32) {
    %c0_i32 = arith.constant 0 : i32
    %c0_i32_0 = arith.constant 0 : i32
    %c0_i32_1 = arith.constant 0 : i32
    return %c0_i32, %c0_i32_0 : i32, i32
  }
  func.func @transform_6(%arg0: i32, %arg1: i32) -> (i32, i32, i32) {
    %c0_i32 = arith.constant 0 : i32
    %c0_i32_0 = arith.constant 0 : i32
    %c0_i32_1 = arith.constant 0 : i32
    %c0_i32_2 = arith.constant 0 : i32
    return %c0_i32, %c0_i32_0, %c0_i32_1 : i32, i32, i32
  }
  func.func @transform_7(%arg0: i32, %arg1: i32) -> (i32, i32) {
    %c0_i32 = arith.constant 0 : i32
    %c0_i32_0 = arith.constant 0 : i32
    %c0_i32_1 = arith.constant 0 : i32
    return %c0_i32, %c0_i32_0 : i32, i32
  }
  func.func @transform_8(%arg0: i32, %arg1: i32) -> (i32, i32) {
    %c0_i32 = arith.constant 0 : i32
    %c0_i32_0 = arith.constant 0 : i32
    %c0_i32_1 = arith.constant 0 : i32
    return %c0_i32, %c0_i32_0 : i32, i32
  }
  func.func @transform_9(%arg0: i32, %arg1: i32) -> (i32, i32) {
    %c0_i32 = arith.constant 0 : i32
    %c0_i32_0 = arith.constant 0 : i32
    %c0_i32_1 = arith.constant 0 : i32
    return %c0_i32, %c0_i32_0 : i32, i32
  }
  func.func @transform_10(%arg0: i32, %arg1: i32) -> (i32, i32) {
    %c0_i32 = arith.constant 0 : i32
    %c0_i32_0 = arith.constant 0 : i32
    %c0_i32_1 = arith.constant 0 : i32
    return %c0_i32, %c0_i32_0 : i32, i32
  }
  func.func @transform_11(%arg0: i32, %arg1: i32) -> (i32, i32, i32, i32) {
    %c0_i32 = arith.constant 0 : i32
    %c0_i32_0 = arith.constant 0 : i32
    %c0_i32_1 = arith.constant 0 : i32
    return %arg0, %arg1, %c0_i32, %c0_i32_0 : i32, i32, i32, i32
  }
}

module attributes {stable_mosaic.version = 11 : i64} {
  func.func @_conv12_kernel(%arg0: i32, %arg1: memref<256x16xbf16, #tpu.memory_space<vmem>>, %arg2: memref<16x8xbf16, #tpu.memory_space<vmem>>, %arg3: memref<1x8xf32, #tpu.memory_space<vmem>>, %arg4: memref<16x8xbf16, #tpu.memory_space<vmem>>, %arg5: memref<1x8xf32, #tpu.memory_space<vmem>>, %arg6: memref<256x8xbf16, #tpu.memory_space<vmem>>, %arg7: memref<256x8xbf16, #tpu.memory_space<vmem>>) attributes {dimension_semantics = [#tpu.dimension_semantics<parallel>], iteration_bounds = array<i64: 2>, scalar_prefetch = 0 : i64, scratch_operands = 0 : i64, tpu.core_type = #tpu.core_type<tc>, window_params = [{transform_indices = @transform_0, window_bounds = array<i64: 256, 16>}, {pipeline_mode = #tpu.pipeline_mode<synchronous>, transform_indices = @transform_1, window_bounds = array<i64: 16, 8>}, {pipeline_mode = #tpu.pipeline_mode<synchronous>, transform_indices = @transform_2, window_bounds = array<i64: 1, 8>}, {pipeline_mode = #tpu.pipeline_mode<synchronous>, transform_indices = @transform_3, window_bounds = array<i64: 16, 8>}, {pipeline_mode = #tpu.pipeline_mode<synchronous>, transform_indices = @transform_4, window_bounds = array<i64: 1, 8>}, {transform_indices = @transform_5, window_bounds = array<i64: 256, 8>}, {transform_indices = @transform_6, window_bounds = array<i64: 256, 8>}]} {
    %c0 = arith.constant 0 : index
    %c0_0 = arith.constant 0 : index
    %0 = vector.load %arg1[%c0, %c0_0] : memref<256x16xbf16, #tpu.memory_space<vmem>>, vector<256x16xbf16>
    %c0_1 = arith.constant 0 : index
    %c0_2 = arith.constant 0 : index
    %1 = vector.load %arg2[%c0_1, %c0_2] : memref<16x8xbf16, #tpu.memory_space<vmem>>, vector<16x8xbf16>
    %cst = arith.constant dense<0.000000e+00> : vector<256x8xf32>
    %2 = tpu.matmul %0, %1, %cst {dimension_numbers = #tpu.dot_dimension_numbers<[1], [0], [0], [1], [0, 0, 1, 1], [], []>} : vector<256x16xbf16>, vector<16x8xbf16>, vector<256x8xf32> -> vector<256x8xf32>
    %c0_3 = arith.constant 0 : index
    %c0_4 = arith.constant 0 : index
    %3 = vector.load %arg3[%c0_3, %c0_4] : memref<1x8xf32, #tpu.memory_space<vmem>>, vector<1x8xf32>
    %4 = vector.broadcast %3 : vector<1x8xf32> to vector<256x8xf32>
    %5 = arith.addf %2, %4 : vector<256x8xf32>
    %c0_5 = arith.constant 0 : index
    %c0_6 = arith.constant 0 : index
    %6 = vector.load %arg4[%c0_5, %c0_6] : memref<16x8xbf16, #tpu.memory_space<vmem>>, vector<16x8xbf16>
    %cst_7 = arith.constant dense<0.000000e+00> : vector<256x8xf32>
    %7 = tpu.matmul %0, %6, %cst_7 {dimension_numbers = #tpu.dot_dimension_numbers<[1], [0], [0], [1], [0, 0, 1, 1], [], []>} : vector<256x16xbf16>, vector<16x8xbf16>, vector<256x8xf32> -> vector<256x8xf32>
    %c0_8 = arith.constant 0 : index
    %c0_9 = arith.constant 0 : index
    %8 = vector.load %arg5[%c0_8, %c0_9] : memref<1x8xf32, #tpu.memory_space<vmem>>, vector<1x8xf32>
    %9 = vector.broadcast %8 : vector<1x8xf32> to vector<256x8xf32>
    %10 = arith.addf %7, %9 : vector<256x8xf32>
    %cst_10 = arith.constant 0.000000e+00 : f32
    %11 = vector.broadcast %cst_10 : f32 to vector<256x8xf32>
    %12 = arith.subf %11, %5 : vector<256x8xf32>
    %13 = math.exp %12 : vector<256x8xf32>
    %cst_11 = arith.constant 1.000000e+00 : f32
    %14 = vector.broadcast %cst_11 : f32 to vector<256x8xf32>
    %15 = arith.addf %14, %13 : vector<256x8xf32>
    %16 = arith.divf %5, %15 : vector<256x8xf32>
    %17 = arith.truncf %16 : vector<256x8xf32> to vector<256x8xbf16>
    %c0_12 = arith.constant 0 : index
    %c0_13 = arith.constant 0 : index
    %18 = vector.load %arg6[%c0_12, %c0_13] : memref<256x8xbf16, #tpu.memory_space<vmem>>, vector<256x8xbf16>
    tpu.vector_store %arg6[%c0_12, %c0_13], %17 {strides = array<i32>} : memref<256x8xbf16, #tpu.memory_space<vmem>>, vector<256x8xbf16>,
    %cst_14 = arith.constant 0.000000e+00 : f32
    %19 = vector.broadcast %cst_14 : f32 to vector<256x8xf32>
    %20 = arith.subf %19, %10 : vector<256x8xf32>
    %21 = math.exp %20 : vector<256x8xf32>
    %cst_15 = arith.constant 1.000000e+00 : f32
    %22 = vector.broadcast %cst_15 : f32 to vector<256x8xf32>
    %23 = arith.addf %22, %21 : vector<256x8xf32>
    %24 = arith.divf %10, %23 : vector<256x8xf32>
    %25 = arith.truncf %24 : vector<256x8xf32> to vector<256x8xbf16>
    %c0_16 = arith.constant 0 : index
    %c0_17 = arith.constant 0 : index
    %26 = vector.load %arg7[%c0_16, %c0_17] : memref<256x8xbf16, #tpu.memory_space<vmem>>, vector<256x8xbf16>
    tpu.vector_store %arg7[%c0_16, %c0_17], %25 {strides = array<i32>} : memref<256x8xbf16, #tpu.memory_space<vmem>>, vector<256x8xbf16>,
    return
  }
  func.func @transform_0(%arg0: i32) -> (i32, i32) {
    %c0_i32 = arith.constant 0 : i32
    %c0_i32_0 = arith.constant 0 : i32
    return %arg0, %c0_i32 : i32, i32
  }
  func.func @transform_1(%arg0: i32) -> (i32, i32) {
    %c0_i32 = arith.constant 0 : i32
    %c0_i32_0 = arith.constant 0 : i32
    %c0_i32_1 = arith.constant 0 : i32
    return %c0_i32, %c0_i32_0 : i32, i32
  }
  func.func @transform_2(%arg0: i32) -> (i32, i32) {
    %c0_i32 = arith.constant 0 : i32
    %c0_i32_0 = arith.constant 0 : i32
    %c0_i32_1 = arith.constant 0 : i32
    return %c0_i32, %c0_i32_0 : i32, i32
  }
  func.func @transform_3(%arg0: i32) -> (i32, i32) {
    %c0_i32 = arith.constant 0 : i32
    %c0_i32_0 = arith.constant 0 : i32
    %c0_i32_1 = arith.constant 0 : i32
    return %c0_i32, %c0_i32_0 : i32, i32
  }
  func.func @transform_4(%arg0: i32) -> (i32, i32) {
    %c0_i32 = arith.constant 0 : i32
    %c0_i32_0 = arith.constant 0 : i32
    %c0_i32_1 = arith.constant 0 : i32
    return %c0_i32, %c0_i32_0 : i32, i32
  }
  func.func @transform_5(%arg0: i32) -> (i32, i32) {
    %c0_i32 = arith.constant 0 : i32
    %c0_i32_0 = arith.constant 0 : i32
    return %arg0, %c0_i32 : i32, i32
  }
  func.func @transform_6(%arg0: i32) -> (i32, i32) {
    %c0_i32 = arith.constant 0 : i32
    %c0_i32_0 = arith.constant 0 : i32
    return %arg0, %c0_i32 : i32, i32
  }
}

</mosaic_0001>

<bundles_post_ra>
// kernel: csp_layer_forward.2
= control target key start
LH: loop header
LB: loop body
LE: loop exit
PB: predicated region body
PF: predicated region fallthrough
CT: control target
= control target key end

     0   :  { %s2518_s21 = smov 0   ;;  %s4011_s0 = inlined_call_operand.vmem [shape: bf16[512,16], index: 0, kind: input, shape index: {}]   ;;  %s4012_s1 = inlined_call_operand.vmem [shape: bf16[16,8], index: 1, kind: input, shape index: {}]   ;;  %s4013_s2 = inlined_call_operand.vmem [shape: f32[1,8], index: 2, kind: input, shape index: {}]   ;;  %s4014_s3 = inlined_call_operand.vmem [shape: bf16[16,8], index: 3, kind: input, shape index: {}]   ;;  %s4015_s4 = inlined_call_operand.vmem [shape: f32[1,8], index: 4, kind: input, shape index: {}]   ;;  %s4016_s5 = inlined_call_operand.vmem [shape: bf16[512,8], index: 5, kind: output, shape index: {0}]   ;;  %s4017_s6 = inlined_call_operand.vmem [shape: bf16[512,8], index: 6, kind: output, shape index: {1}]  }
   0x1 LB: > { %s2068_s22 = sadd.s32 4294967295, %s2481_s21   ;;  %p2072_p0 = scmp.ge.s32.totalorder %s2481_s21, 1  ;;  %s2481_s21 = sphi %s2518_s21, %s17_s21  }
   0x2   : > { %p216_p1 = scmp.lt.s32.totalorder %s2481_s21, 3 }
   0x4   : > { %p217_p2 = pnand %p2072_p0, %p216_p1 }
   0x5   : > { %s2073_s27 = sshll.u32 (!%p217_p2), %s2068_s22, 5 }
   0x6   : > { %220 = sbr.rel (%p217_p2) target bundleno = 481 (0x1e1), region = 40  ;;  %p252_p3 = scmp.lt.s32.totalorder (!%p217_p2), %s2073_s27, 63 }
   0xb   : > { %v2201_v0 = vld [vmem:[%s4012_s1] sm:$0xff]  ;;  %s4123_s27 = smov (!%p252_p3, %s2073_s27), 63  ;;  %vm394_vm0 = vcmask 130048   ;;  %vm1273_vm5 = vcmask 60416  }
   0xc   : > { %v2202_v1 = vld [vmem:[%s4014_s3] sm:$0xff]  ;;  %450 = vmatpush.bf16.msra.mxu0 %v2201_v0  ;;  %2203 = vmatpush.bf16.msra.mxu2 %v2201_v0  ;;  %s2532_s28 = sshll.u32 %s4123_s27, 2 }
   0xd   : > { %551 = vmatpush.bf16.msra.mxu1 %v2202_v1  ;;  %2204 = vmatpush.bf16.msra.mxu3 %v2202_v1  ;;  %s2538_s7 = scalar_lea.vmem %s4011_s0, %s2532_s28  ;;  %v2591_v18 = vld [vmem:[%s4013_s2] ss:$0 sm:$0xff]  ;;  %s2705_s14 = scalar_lea.vmem %s4016_s5, %s2532_s28 }
   0xe   : > { %v2185_v2 = vld [vmem:[%s2538_s7] sm:$0xff]  ;;  %v2186_v4 = vld [vmem:[%s2538_s7 + $0x8] sm:$0xff]  ;;  %v2187_v6 = vld [vmem:[%s2538_s7 + $0x10] sm:$0xff]  ;;  %s2717_s17 = scalar_lea.vmem %s4017_s6, %s2532_s28 }
   0xf   : > { %v2193_v3 = vld [vmem:[%s2538_s7 + $0x40] sm:$0xff]  ;;  %2147 = vmatmul.msk.bf16.vlgmr.msra.gmra.mxu0 %vm394_vm0, %v2185_v2  ;;  %v2194_v5 = vld [vmem:[%s2538_s7 + $0x48] sm:$0xff]  ;;  %v2195_v7 = vld [vmem:[%s2538_s7 + $0x50] sm:$0xff] }
  0x10   : > { %2155 = vmatmul.msk.bf16.vlgmr.msra.gmra.mxu2 %vm394_vm0, %v2193_v3  ;;  %2167 = vmatmul.msk.bf16.vlgmr.msra.gmra.mxu1 %vm394_vm0, %v2185_v2  ;;  %v2188_v8 = vld [vmem:[%s2538_s7 + $0x18] sm:$0xff]  ;;  %v2189_v10 = vld [vmem:[%s2538_s7 + $0x20] sm:$0xff]  ;;  %v2190_v12 = vld [vmem:[%s2538_s7 + $0x28] sm:$0xff] }
  0x11   : > { %2175 = vmatmul.msk.bf16.vlgmr.msra.gmra.mxu3 %vm394_vm0, %v2193_v3  ;;  %v2196_v9 = vld [vmem:[%s2538_s7 + $0x58] sm:$0xff]  ;;  %v2197_v11 = vld [vmem:[%s2538_s7 + $0x60] sm:$0xff]  ;;  %v2198_v13 = vld [vmem:[%s2538_s7 + $0x68] sm:$0xff] }
  0x12   : > { %v2191_v14 = vld [vmem:[%s2538_s7 + $0x30] sm:$0xff]  ;;  %v2192_v16 = vld [vmem:[%s2538_s7 + $0x38] sm:$0xff]  ;;  %v2596_v19 = vld [vmem:[%s4015_s4] ss:$0 sm:$0xff] }
  0x13   : > { %v2199_v15 = vld [vmem:[%s2538_s7 + $0x70] sm:$0xff]  ;;  %v2200_v17 = vld [vmem:[%s2538_s7 + $0x78] sm:$0xff] }
  0x1f   : > { %2148 = vmatmul.msk.bf16.gmra.mxu0 %vm394_vm0, %v2186_v4 }
  0x20   : > { %2156 = vmatmul.msk.bf16.gmra.mxu2 %vm394_vm0, %v2194_v5  ;;  %2168 = vmatmul.msk.bf16.gmra.mxu1 %vm394_vm0, %v2186_v4 }
  0x21   : > { %2176 = vmatmul.msk.bf16.gmra.mxu3 %vm394_vm0, %v2194_v5 }
  0x2f   : > { %2149 = vmatmul.msk.bf16.gmra.mxu0 %vm394_vm0, %v2187_v6 }
  0x30   : > { %2157 = vmatmul.msk.bf16.gmra.mxu2 %vm394_vm0, %v2195_v7  ;;  %2169 = vmatmul.msk.bf16.gmra.mxu1 %vm394_vm0, %v2187_v6 }
  0x31   : > { %2177 = vmatmul.msk.bf16.gmra.mxu3 %vm394_vm0, %v2195_v7 }
  0x3f   : > { %2150 = vmatmul.msk.bf16.gmra.mxu0 %vm394_vm0, %v2188_v8 }
  0x40   : > { %2158 = vmatmul.msk.bf16.gmra.mxu2 %vm394_vm0, %v2196_v9  ;;  %2170 = vmatmul.msk.bf16.gmra.mxu1 %vm394_vm0, %v2188_v8 }
  0x41   : > { %2178 = vmatmul.msk.bf16.gmra.mxu3 %vm394_vm0, %v2196_v9 }
  0x4f   : > { %2151 = vmatmul.msk.bf16.gmra.mxu0 %vm394_vm0, %v2189_v10 }
  0x50   : > { %2159 = vmatmul.msk.bf16.gmra.mxu2 %vm394_vm0, %v2197_v11  ;;  %2171 = vmatmul.msk.bf16.gmra.mxu1 %vm394_vm0, %v2189_v10 }
  0x51   : > { %2179 = vmatmul.msk.bf16.gmra.mxu3 %vm394_vm0, %v2197_v11 }
  0x5f   : > { %2152 = vmatmul.msk.bf16.gmra.mxu0 %vm394_vm0, %v2190_v12 }
  0x60   : > { %2160 = vmatmul.msk.bf16.gmra.mxu2 %vm394_vm0, %v2198_v13  ;;  %2172 = vmatmul.msk.bf16.gmra.mxu1 %vm394_vm0, %v2190_v12 }
  0x61   : > { %2180 = vmatmul.msk.bf16.gmra.mxu3 %vm394_vm0, %v2198_v13 }
  0x6f   : > { %2153 = vmatmul.msk.bf16.gmra.mxu0 %vm394_vm0, %v2191_v14 }
  0x70   : > { %2161 = vmatmul.msk.bf16.gmra.mxu2 %vm394_vm0, %v2199_v15  ;;  %2173 = vmatmul.msk.bf16.gmra.mxu1 %vm394_vm0, %v2191_v14 }
  0x71   : > { %2181 = vmatmul.msk.bf16.gmra.mxu3 %vm394_vm0, %v2199_v15 }
  0x7f   : > { %2154 = vmatmul.msk.bf16.gmra.mxu0 %vm394_vm0, %v2192_v16 }
  0x80   : > { %2162 = vmatmul.msk.bf16.gmra.mxu2 %vm394_vm0, %v2200_v17  ;;  %2174 = vmatmul.msk.bf16.gmra.mxu1 %vm394_vm0, %v2192_v16 }
  0x81   : > { %2182 = vmatmul.msk.bf16.gmra.mxu3 %vm394_vm0, %v2200_v17 }
  0x8c   : > { %v452_v20 = vpop.f32.mrf.mxu0 }
  0x8d   : > { %v2599_v21 = vadd.f32 %v2591_v18, %v452_v20  ;;  %v553_v22 = vpop.f32.mrf.mxu1 }
  0x8e   : > { %v2602_v23 = vadd.f32 %v2596_v19, %v553_v22 }
  0x8f   : > { %v633_v24 = vsub.f32 0.0, %v2599_v21 }
  0x90   : > { %v1306_v25 = vsub.f32 0.0, %v2602_v23 }
  0x91   : > { %v665_v26 = vmul.f32 1.442695, %v633_v24 }
  0x92   : > { %v1338_v27 = vmul.f32 1.442695, %v1306_v25 }
  0x93   : > { %v492_v28 = vpop.f32.mrf.mxu2  ;;  %2215 = vpow2.f32 %v665_v26 }
  0x94   : > { %v2607_v29 = vadd.f32 %v2591_v18, %v492_v28  ;;  %v593_v30 = vpop.f32.mrf.mxu3  ;;  %2217 = vpow2.f32 %v1338_v27  ;;  %v454_v32 = vpop.f32.mrf.mxu0 }
  0x95   : > { %v2610_v31 = vadd.f32 %v2596_v19, %v593_v30  ;;  %v2614_v34 = vadd.f32 %v2591_v18, %v454_v32  ;;  %v555_v35 = vpop.f32.mrf.mxu1 }
  0x96   : > { %v649_v33 = vsub.f32 0.0, %v2607_v29  ;;  %v2618_v37 = vadd.f32 %v2596_v19, %v555_v35 }
  0x97   : > { %v1322_v36 = vsub.f32 0.0, %v2610_v31  ;;  %v634_v39 = vsub.f32 0.0, %v2614_v34 }
  0x98   : > { %v697_v38 = vmul.f32 1.442695, %v649_v33  ;;  %v1307_v41 = vsub.f32 0.0, %v2618_v37 }
  0x99   : > { %v1370_v40 = vmul.f32 1.442695, %v1322_v36  ;;  %v2216_v42 = vpop.eup %2215  ;;  %v667_v43 = vmul.f32 1.442695, %v634_v39 }
  0x9a   : > { %2219 = vpow2.f32 %v697_v38  ;;  %v2218_v44 = vpop.eup %2217  ;;  %v2622_v45 = vadd.f32 1.0, %v2216_v42  ;;  %v1340_v46 = vmul.f32 1.442695, %v1307_v41 }
  0x9b   : > { %2221 = vpow2.f32 %v1370_v40  ;;  %v494_v47 = vpop.f32.mrf.mxu2  ;;  %v2624_v48 = vadd.f32 1.0, %v2218_v44 }
  0x9c   : > { %2223 = vpow2.f32 %v667_v43  ;;  %v2628_v49 = vadd.f32 %v2591_v18, %v494_v47  ;;  %v595_v50 = vpop.f32.mrf.mxu3  ;;  %v770_v52 = vand.u32 2147483647, %v2622_v45  ;;  %v772_v53 = vand.u32 2147483648, %v2622_v45  ;;  %v457_v55 = vpop.f32.mrf.mxu0 }
  0x9d   : > { %2225 = vrcp.f32 %v2622_v45  ;;  %v1445_v54 = vand.u32 2147483648, %v2624_v48  ;;  %v1443_v57 = vand.u32 2147483647, %v2624_v48  ;;  %v2641_v62 = vadd.f32 %v2596_v19, %v595_v50  ;;  %v558_v63 = vpop.f32.mrf.mxu1 }
  0x9e   : > { %2227 = vrcp.f32 %v2624_v48  ;;  %v650_v59 = vsub.f32 0.0, %v2628_v49  ;;  %vm766_vm1 = vweird.f32 %v2622_v45  ;;  %vm1439_vm2 = vweird.f32 %v2624_v48 }
  0x9f   : > { %2229 = vpow2.f32 %v1340_v46  ;;  %v2647_v1 = vadd.f32 %v2591_v18, %v457_v55  ;;  %vm2650_vm3 = vcmp.eq.f32.partialorder %v770_v52, 8.507059e+37  ;;  %v773_v5 = vor.u32 1.1754944e-38, %v772_v53 }
  0xa0   : > { %v2220_v51 = vpop.eup %2219  ;;  %v1446_v6 = vor.u32 1.1754944e-38, %v1445_v54  ;;  %vm2656_vm4 = vcmp.eq.f32.partialorder %v1443_v57, 8.507059e+37  ;;  %v699_v11 = vmul.f32 1.442695, %v650_v59  ;;  %v2662_v12 = vadd.f32 %v2596_v19, %v558_v63 }
  0xa1   : > { %v2222_v56 = vpop.eup %2221  ;;  %v2635_v58 = vadd.f32 1.0, %v2220_v51  ;;  %v1323_v16 = vsub.f32 0.0, %v2641_v62  ;;  %v635_v24 = vsub.f32 0.0, %v2647_v1 }
  0xa2   : > { %v2224_v60 = vpop.eup %2223  ;;  %v2638_v61 = vadd.f32 1.0, %v2222_v56 }
  0xa3   : > { %v2226_v0 = vpop.eup %2225  ;;  %2231 = vrcp.f32 %v2635_v58  ;;  %v1012_v10 = vand.u32 2147483648, %v2635_v58  ;;  %v1010_v14 = vand.u32 2147483647, %v2635_v58  ;;  %v2665_v15 = vadd.f32 1.0, %v2224_v60 }
  0xa4   : > { %v2228_v2 = vpop.eup %2227  ;;  %v762_v3 = vmul.f32 %v2226_v0, %v2622_v45  ;;  %2233 = vrcp.f32 %v2638_v61  ;;  %v1683_v20 = vand.u32 2147483647, %v2638_v61  ;;  %vm767_vm6 = vweird.f32 %v2226_v0  ;;  %v459_v36 = vpop.f32.mrf.mxu0 }
  0xa5   : > { %v2230_v7 = vpop.eup %2229  ;;  %v1435_v8 = vmul.f32 %v2228_v2, %v2624_v48  ;;  %vm1006_vm7 = vweird.f32 %v2635_v58  ;;  %v1685_v26 = vand.u32 2147483648, %v2638_v61  ;;  %2235 = vrcp.f32 %v2665_v15  ;;  %vm768_vm11 = vmor %vm766_vm1, %vm767_vm6 }
  0xa6   : > { %v763_v13 = vsub.f32 1.0, %v762_v3  ;;  %v2669_v22 = vadd.f32 1.0, %v2230_v7  ;;  %vm1440_vm8 = vweird.f32 %v2228_v2  ;;  %v1013_v30 = vor.u32 1.1754944e-38, %v1012_v10 }
  0xa7   : > { %v1436_v17 = vsub.f32 1.0, %v1435_v8  ;;  %vm1679_vm9 = vweird.f32 %v2638_v61  ;;  %2237 = vpow2.f32 %v699_v11  ;;  %vm2677_vm10 = vcmp.eq.f32.partialorder %v1010_v14, 8.507059e+37  ;;  %vm1441_vm13 = vmor %vm1439_vm2, %vm1440_vm8 }
  0xa8   : > { %v764_v25 = vmul.f32 %v2226_v0, %v763_v13  ;;  %2239 = vrcp.f32 %v2669_v22  ;;  %v1372_v38 = vmul.f32 1.442695, %v1323_v16  ;;  %vm2686_vm12 = vcmp.eq.f32.partialorder %v1683_v20, 8.507059e+37 }
  0xa9   : > { %v2232_v27 = vpop.eup %2231  ;;  %v1437_v28 = vmul.f32 %v2228_v2, %v1436_v17  ;;  %v785_v42 = vand.u32 2147483647, %v2665_v15  ;;  %v1686_v46 = vor.u32 1.1754944e-38, %v1685_v26  ;;  %v787_v45 = vand.u32 2147483648, %v2665_v15 }
  0xaa   : > { %v2234_v32 = vpop.eup %2233  ;;  %v765_v33 = vadd.f32 %v2226_v0, %v764_v25  ;;  %v1002_v35 = vmul.f32 %v2232_v27, %v2635_v58  ;;  %vm1007_vm14 = vweird.f32 %v2232_v27  ;;  %vm781_vm15 = vweird.f32 %v2665_v15  ;;  %v497_v25 = vpop.f32.mrf.mxu2 }
  0xab   : > { %v1438_v39 = vadd.f32 %v2228_v2, %v1437_v28  ;;  %v1675_v40 = vmul.f32 %v2234_v32, %v2638_v61  ;;  %v2236_v52 = vpop.eup %2235  ;;  %vm1680_vm0 = vweird.f32 %v2234_v32  ;;  %vm2709_vm1 = vcmp.eq.f32.partialorder %v785_v42, 8.507059e+37  ;;  %vm1008_vm2 = vmor %vm1006_vm7, %vm1007_vm14  ;;  %v598_v28 = vpop.f32.mrf.mxu3 }
  0xac   : > { %v769_v43 = vsel %vm768_vm11, %v2226_v0, %v765_v33  ;;  %v1003_v44 = vsub.f32 1.0, %v1002_v35  ;;  %v777_v59 = vmul.f32 %v2236_v52, %v2665_v15  ;;  %v1458_v3 = vand.u32 2147483647, %v2669_v22 }
  0xad   : > { %v774_v47 = vsel %vm2650_vm3, %v773_v5, %v769_v43  ;;  %v1442_v50 = vsel %vm1441_vm13, %v2228_v2, %v1438_v39  ;;  %v1676_v51 = vsub.f32 1.0, %v1675_v40  ;;  %v2238_v55 = vpop.eup %2237  ;;  %v788_v2 = vor.u32 1.1754944e-38, %v787_v45  ;;  %vm1681_vm3 = vmor %vm1679_vm9, %vm1680_vm0 }
  0xae   : > { %v775_v53 = vmul.f32 %v774_v47, %v2599_v21  ;;  %v1447_v48 = vsel %vm2656_vm4, %v1446_v6, %v1442_v50  ;;  %v1004_v54 = vmul.f32 %v2232_v27, %v1003_v44  ;;  %v2240_v21 = vpop.eup %2239  ;;  %v778_v5 = vsub.f32 1.0, %v777_v59  ;;  %v560_v47 = vpop.f32.mrf.mxu1 }
  0xaf   : > { %v1448_v56 = vmul.f32 %v1447_v48, %v2602_v23  ;;  %v1677_v57 = vmul.f32 %v2234_v32, %v1676_v51  ;;  %v1450_v6 = vmul.f32 %v2240_v21, %v2669_v22  ;;  %vm782_vm4 = vweird.f32 %v2236_v52 }
  0xb0   : > { %v1241_v63 = vpack.c.bf16 %v775_v53, %v775_v53  ;;  %v1005_v0 = vadd.f32 %v2232_v27, %v1004_v54  ;;  %v2729_v8 = vadd.f32 1.0, %v2238_v55  ;;  %2241 = vpow2.f32 %v1372_v38  ;;  %vm783_vm7 = vmor %vm781_vm15, %vm782_vm4 }
  0xb1   : > { %v1914_v23 = vpack.c.bf16 %v1448_v56, %v1448_v56  ;;  %v1678_v4 = vadd.f32 %v2234_v32, %v1677_v57  ;;  %v779_v10 = vmul.f32 %v2236_v52, %v778_v5  ;;  %v1451_v11 = vsub.f32 1.0, %v1450_v6 }
  0xb2   : > { %1274 = vst.msk [vmem:[%s2705_s14] sm:$0xf] %vm1273_vm5, %v1241_v63  ;;  %v1009_v7 = vsel %vm1008_vm2, %v2232_v27, %v1005_v0  ;;  %v1460_v61 = vand.u32 2147483648, %v2669_v22  ;;  %2243 = vrcp.f32 %v2729_v8  ;;  %vm1455_vm6 = vweird.f32 %v2240_v21 }
  0xb3   : > { %1946 = vst.msk [vmem:[%s2717_s17] sm:$0xf] %vm1273_vm5, %v1914_v23  ;;  %v1014_v58 = vsel %vm2677_vm10, %v1013_v30, %v1009_v7  ;;  %v1682_v9 = vsel %vm1681_vm3, %v2234_v32, %v1678_v4  ;;  %v780_v17 = vadd.f32 %v2236_v52, %v779_v10  ;;  %v1452_v20 = vmul.f32 %v2240_v21, %v1451_v11  ;;  %v600_v23 = vpop.f32.mrf.mxu3 }
  0xb4   : > { %v1015_v13 = vmul.f32 %v1014_v58, %v2607_v29  ;;  %v1687_v14 = vsel %vm2686_vm12, %v1686_v46, %v1682_v9  ;;  %vm1454_vm8 = vweird.f32 %v2669_v22  ;;  %v669_v29 = vmul.f32 1.442695, %v635_v24 }
  0xb5   : > { %v1688_v16 = vmul.f32 %v1687_v14, %v2610_v31  ;;  %v1308_v27 = vsub.f32 0.0, %v2662_v12  ;;  %v784_v30 = vsel %vm783_vm7, %v2236_v52, %v780_v17  ;;  %v1453_v32 = vadd.f32 %v2240_v21, %v1452_v20  ;;  %vm1456_vm10 = vmor %vm1454_vm8, %vm1455_vm6 }
  0xb6   : > { %v1257_v26 = vpack.c.bf16 %v1015_v13, %v1015_v13  ;;  %vm1459_vm9 = vcmp.eq.f32.partialorder %v1458_v3, 8.507059e+37  ;;  %v2242_v33 = vpop.eup %2241  ;;  %v789_v15 = vsel %vm2709_vm1, %v788_v2, %v784_v30  ;;  %v1461_v22 = vor.u32 1.1754944e-38, %v1460_v61 }
  0xb7   : > { %v1930_v31 = vpack.c.bf16 %v1688_v16, %v1688_v16  ;;  %2245 = vpow2.f32 %v669_v29  ;;  %v1342_v35 = vmul.f32 1.442695, %v1308_v27  ;;  %v790_v24 = vmul.f32 %v789_v15, %v2614_v34 }
  0xb8   : > { %1290 = vst.msk [vmem:[%s2705_s14 + $0x40] sm:$0xf] %vm1273_vm5, %v1257_v26  ;;  %v1457_v38 = vsel %vm1456_vm10, %v2240_v21, %v1453_v32  ;;  %v2756_v39 = vadd.f32 1.0, %v2242_v33  ;;  %v2759_v40 = vadd.f32 %v2591_v18, %v497_v25  ;;  %v2244_v41 = vpop.eup %2243  ;;  %v2762_v43 = vadd.f32 %v2596_v19, %v598_v28  ;;  %v499_v21 = vpop.f32.mrf.mxu2 }
  0xb9   : > { %1962 = vst.msk [vmem:[%s2717_s17 + $0x40] sm:$0xf] %vm1273_vm5, %v1930_v31  ;;  %v1462_v42 = vsel %vm1459_vm9, %v1461_v22, %v1457_v38  ;;  %2247 = vpow2.f32 %v1342_v35  ;;  %v1242_v44 = vpack.c.bf16 %v790_v24, %v790_v24  ;;  %v1017_v45 = vmul.f32 %v2244_v41, %v2729_v8 }
  0xba   : > { %v1463_v46 = vmul.f32 %v1462_v42, %v2618_v37  ;;  %v2767_v34 = vadd.f32 %v2591_v18, %v459_v36  ;;  %v1025_v50 = vand.u32 2147483647, %v2729_v8  ;;  %v1027_v51 = vand.u32 2147483648, %v2729_v8 }
  0xbb   : > { %2249 = vrcp.f32 %v2756_v39  ;;  %1275 = vst.msk [vmem:[%s2705_s14 + $0x4] sm:$0xf] %vm1273_vm5, %v1242_v44  ;;  %v1018_v53 = vsub.f32 1.0, %v1017_v45  ;;  %v651_v48 = vsub.f32 0.0, %v2759_v40  ;;  %vm1022_vm11 = vweird.f32 %v2244_v41 }
  0xbc   : > { %v1915_v52 = vpack.c.bf16 %v1463_v46, %v1463_v46  ;;  %v1324_v37 = vsub.f32 0.0, %v2762_v43  ;;  %v2777_v55 = vadd.f32 %v2596_v19, %v560_v47  ;;  %v636_v60 = vsub.f32 0.0, %v2767_v34 }
  0xbd   : > { %v2246_v54 = vpop.eup %2245  ;;  %v1019_v56 = vmul.f32 %v2244_v41, %v1018_v53  ;;  %v701_v59 = vmul.f32 1.442695, %v651_v48  ;;  %vm1021_vm12 = vweird.f32 %v2729_v8  ;;  %vm2785_vm13 = vcmp.eq.f32.partialorder %v1025_v50, 8.507059e+37 }
  0xbe   : > { %1947 = vst.msk [vmem:[%s2717_s17 + $0x4] sm:$0xf] %vm1273_vm5, %v1915_v52  ;;  %v2781_v57 = vadd.f32 1.0, %v2246_v54  ;;  %v1028_v2 = vor.u32 1.1754944e-38, %v1027_v51  ;;  %v1698_v3 = vand.u32 2147483647, %v2756_v39  ;;  %vm1694_vm14 = vweird.f32 %v2756_v39  ;;  %vm1023_vm15 = vmor %vm1021_vm12, %vm1022_vm11 }
  0xbf   : > { %v2248_v63 = vpop.eup %2247  ;;  %v1020_v4 = vadd.f32 %v2244_v41, %v1019_v56  ;;  %v1700_v5 = vand.u32 2147483648, %v2756_v39  ;;  %v1309_v6 = vsub.f32 0.0, %v2777_v55  ;;  %v1374_v58 = vmul.f32 1.442695, %v1324_v37 }
  0xc0   : > { %2251 = vrcp.f32 %v2781_v57  ;;  %v2795_v8 = vadd.f32 1.0, %v2248_v63  ;;  %v2798_v9 = vadd.f32 %v2591_v18, %v499_v21  ;;  %v671_v13 = vmul.f32 1.442695, %v636_v60  ;;  %v563_v21 = vpop.f32.mrf.mxu1 }
  0xc1   : > { %v2250_v7 = vpop.eup %2249  ;;  %2253 = vpow2.f32 %v701_v59  ;;  %v1024_v10 = vsel %vm1023_vm15, %v2244_v41, %v1020_v4  ;;  %v2802_v14 = vadd.f32 %v2596_v19, %v600_v23  ;;  %v800_v16 = vand.u32 2147483647, %v2781_v57 }
  0xc2   : > { %v1690_v11 = vmul.f32 %v2250_v7, %v2756_v39  ;;  %v1029_v61 = vsel %vm2785_vm13, %v1028_v2, %v1024_v10  ;;  %v802_v17 = vand.u32 2147483648, %v2781_v57  ;;  %2255 = vrcp.f32 %v2795_v8 }
  0xc3   : > { %v1030_v20 = vmul.f32 %v1029_v61, %v2628_v49  ;;  %vm2810_vm0 = vcmp.eq.f32.partialorder %v1698_v3, 8.507059e+37  ;;  %v1344_v29 = vmul.f32 1.442695, %v1309_v6  ;;  %v1701_v27 = vor.u32 1.1754944e-38, %v1700_v5  ;;  %v462_v49 = vpop.f32.mrf.mxu0 }
  0xc4   : > { %v1691_v25 = vsub.f32 1.0, %v1690_v11  ;;  %vm796_vm1 = vweird.f32 %v2781_v57  ;;  %2257 = vpow2.f32 %v1374_v58  ;;  %v652_v28 = vsub.f32 0.0, %v2798_v9 }
  0xc5   : > { %v1258_v30 = vpack.c.bf16 %v1030_v20, %v1030_v20  ;;  %vm1695_vm2 = vweird.f32 %v2250_v7  ;;  %v1473_v33 = vand.u32 2147483647, %v2795_v8  ;;  %vm2818_vm3 = vcmp.eq.f32.partialorder %v800_v16, 8.507059e+37 }
  0xc6   : > { %v2252_v31 = vpop.eup %2251  ;;  %v1692_v32 = vmul.f32 %v2250_v7, %v1691_v25  ;;  %v803_v36 = vor.u32 1.1754944e-38, %v802_v17  ;;  %2259 = vpow2.f32 %v671_v13  ;;  %v1325_v24 = vsub.f32 0.0, %v2802_v14  ;;  %vm1696_vm4 = vmor %vm1694_vm14, %vm1695_vm2  ;;  %v502_v17 = vpop.f32.mrf.mxu2 }
  0xc7   : > { %v2254_v15 = vpop.eup %2253  ;;  %v792_v22 = vmul.f32 %v2252_v31, %v2781_v57  ;;  %1291 = vst.msk [vmem:[%s2705_s14 + $0x44] sm:$0xf] %vm1273_vm5, %v1258_v30  ;;  %v1475_v41 = vand.u32 2147483648, %v2795_v8  ;;  %2261 = vpow2.f32 %v1344_v29  ;;  %vm1469_vm6 = vweird.f32 %v2795_v8 }
  0xc8   : > { %v1693_v38 = vadd.f32 %v2250_v7, %v1692_v32  ;;  %v2826_v42 = vadd.f32 1.0, %v2254_v15  ;;  %v2256_v44 = vpop.eup %2255  ;;  %v703_v45 = vmul.f32 1.442695, %v652_v28  ;;  %v2833_v47 = vadd.f32 %v2591_v18, %v462_v49 }
  0xc9   : > { %v793_v46 = vsub.f32 1.0, %v792_v22  ;;  %v1465_v51 = vmul.f32 %v2256_v44, %v2795_v8  ;;  %vm2836_vm7 = vcmp.eq.f32.partialorder %v1473_v33, 8.507059e+37  ;;  %vm797_vm8 = vweird.f32 %v2252_v31 }
  0xca   : > { %v1697_v50 = vsel %vm1696_vm4, %v2250_v7, %v1693_v38  ;;  %2263 = vrcp.f32 %v2826_v42  ;;  %v2258_v53 = vpop.eup %2257  ;;  %v1376_v54 = vmul.f32 1.442695, %v1325_v24  ;;  %v1476_v59 = vor.u32 1.1754944e-38, %v1475_v41  ;;  %vm798_vm9 = vmor %vm796_vm1, %vm797_vm8 }
  0xcb   : > { %v1702_v39 = vsel %vm2810_vm0, %v1701_v27, %v1697_v50  ;;  %v794_v48 = vmul.f32 %v2252_v31, %v793_v46  ;;  %v1466_v56 = vsub.f32 1.0, %v1465_v51  ;;  %v2844_v60 = vadd.f32 1.0, %v2258_v53 }
  0xcc   : > { %v1703_v37 = vmul.f32 %v1702_v39, %v2641_v62  ;;  %v2260_v63 = vpop.eup %2259  ;;  %v1040_v2 = vand.u32 2147483647, %v2826_v42  ;;  %2265 = vpow2.f32 %v703_v45  ;;  %v637_v3 = vsub.f32 0.0, %v2833_v47 }
  0xcd   : > { %v795_v0 = vadd.f32 %v2252_v31, %v794_v48  ;;  %v2262_v23 = vpop.eup %2261  ;;  %v1467_v5 = vmul.f32 %v2256_v44, %v1466_v56  ;;  %vm1470_vm10 = vweird.f32 %v2256_v44  ;;  %2267 = vrcp.f32 %v2844_v60 }
  0xce   : > { %v1931_v4 = vpack.c.bf16 %v1703_v37, %v1703_v37  ;;  %v1042_v6 = vand.u32 2147483648, %v2826_v42  ;;  %2269 = vpow2.f32 %v1376_v54  ;;  %v2853_v7 = vadd.f32 %v2596_v19, %v563_v21  ;;  %vm1471_vm11 = vmor %vm1469_vm6, %vm1470_vm10 }
  0xcf   : > { %v799_v62 = vsel %vm798_vm9, %v2252_v31, %v795_v0  ;;  %v1468_v11 = vadd.f32 %v2256_v44, %v1467_v5  ;;  %v2859_v57 = vadd.f32 1.0, %v2260_v63  ;;  %v2861_v13 = vadd.f32 1.0, %v2262_v23 }
  0xd0   : > { %v2264_v58 = vpop.eup %2263  ;;  %1963 = vst.msk [vmem:[%s2717_s17 + $0x44] sm:$0xf] %vm1273_vm5, %v1931_v4  ;;  %v804_v10 = vsel %vm2818_vm3, %v803_v36, %v799_v62  ;;  %vm1036_vm12 = vweird.f32 %v2826_v42  ;;  %vm2868_vm13 = vcmp.eq.f32.partialorder %v1040_v2, 8.507059e+37  ;;  %v1713_v25 = vand.u32 2147483647, %v2844_v60 }
  0xd1   : > { %v805_v61 = vmul.f32 %v804_v10, %v2647_v1  ;;  %v1032_v16 = vmul.f32 %v2264_v58, %v2826_v42  ;;  %v1472_v20 = vsel %vm1471_vm11, %v2256_v44, %v1468_v11  ;;  %v1715_v26 = vand.u32 2147483648, %v2844_v60 }
  0xd2   : > { %2271 = vrcp.f32 %v2859_v57  ;;  %v2266_v1 = vpop.eup %2265  ;;  %v1477_v8 = vsel %vm2836_vm7, %v1476_v59, %v1472_v20  ;;  %v673_v28 = vmul.f32 1.442695, %v637_v3  ;;  %v1043_v32 = vor.u32 1.1754944e-38, %v1042_v6 }
  0xd3   : > { %v1243_v29 = vpack.c.bf16 %v805_v61, %v805_v61  ;;  %v1033_v27 = vsub.f32 1.0, %v1032_v16  ;;  %v2268_v31 = vpop.eup %2267  ;;  %v1478_v30 = vmul.f32 %v1477_v8, %v2662_v12  ;;  %vm1709_vm14 = vweird.f32 %v2844_v60 }
  0xd4   : > { %2273 = vrcp.f32 %v2861_v13  ;;  %v2270_v33 = vpop.eup %2269  ;;  %vm1037_vm15 = vweird.f32 %v2264_v58  ;;  %v1705_v15 = vmul.f32 %v2268_v31, %v2844_v60  ;;  %v815_v22 = vand.u32 2147483647, %v2859_v57 }
  0xd5   : > { %1276 = vst.msk [vmem:[%s2705_s14 + $0x8] sm:$0xf] %vm1273_vm5, %v1243_v29  ;;  %v1034_v49 = vmul.f32 %v2264_v58, %v1033_v27  ;;  %v1916_v35 = vpack.c.bf16 %v1478_v30, %v1478_v30  ;;  %vm2884_vm0 = vcmp.eq.f32.partialorder %v1713_v25, 8.507059e+37  ;;  %v1716_v12 = vor.u32 1.1754944e-38, %v1715_v26  ;;  %vm1038_vm1 = vmor %vm1036_vm12, %vm1037_vm15 }
  0xd6   : > { %v817_v24 = vand.u32 2147483648, %v2859_v57  ;;  %v1706_v41 = vsub.f32 1.0, %v1705_v15  ;;  %v1488_v44 = vand.u32 2147483647, %v2861_v13  ;;  %v2890_v46 = vadd.f32 1.0, %v2266_v1 }
  0xd7   : > { %v1035_v38 = vadd.f32 %v2264_v58, %v1034_v49  ;;  %1948 = vst.msk [vmem:[%s2717_s17 + $0x8] sm:$0xf] %vm1273_vm5, %v1916_v35  ;;  %vm1710_vm2 = vweird.f32 %v2268_v31  ;;  %vm811_vm3 = vweird.f32 %v2859_v57  ;;  %v2897_v50 = vadd.f32 1.0, %v2270_v33 }
  0xd8   : > { %v2272_v45 = vpop.eup %2271  ;;  %2275 = vpow2.f32 %v673_v28  ;;  %v1707_v52 = vmul.f32 %v2268_v31, %v1706_v41  ;;  %vm2900_vm4 = vcmp.eq.f32.partialorder %v815_v22, 8.507059e+37  ;;  %vm1484_vm6 = vweird.f32 %v2861_v13  ;;  %vm1711_vm8 = vmor %vm1709_vm14, %vm1710_vm2 }
  0xd9   : > { %v1039_v51 = vsel %vm1038_vm1, %v2264_v58, %v1035_v38  ;;  %v807_v53 = vmul.f32 %v2272_v45, %v2859_v57  ;;  %v818_v54 = vor.u32 1.1754944e-38, %v817_v24  ;;  %v1490_v37 = vand.u32 2147483648, %v2861_v13  ;;  %v603_v57 = vpop.f32.mrf.mxu3 }
  0xda   : > { %v2274_v48 = vpop.eup %2273  ;;  %v1044_v42 = vsel %vm2868_vm13, %v1043_v32, %v1039_v51  ;;  %2277 = vrcp.f32 %v2890_v46  ;;  %v1708_v59 = vadd.f32 %v2268_v31, %v1707_v52  ;;  %vm2911_vm7 = vcmp.eq.f32.partialorder %v1488_v44, 8.507059e+37  ;;  %v464_v44 = vpop.f32.mrf.mxu0 }
  0xdb   : > { %v1045_v56 = vmul.f32 %v1044_v42, %v2759_v40  ;;  %v808_v21 = vsub.f32 1.0, %v807_v53  ;;  %v1480_v63 = vmul.f32 %v2274_v48, %v2861_v13  ;;  %vm812_vm9 = vweird.f32 %v2272_v45 }
  0xdc   : > { %v1055_v2 = vand.u32 2147483647, %v2890_v46  ;;  %v1057_v3 = vand.u32 2147483648, %v2890_v46  ;;  %2279 = vrcp.f32 %v2897_v50  ;;  %v1712_v23 = vsel %vm1711_vm8, %v2268_v31, %v1708_v59  ;;  %vm813_vm11 = vmor %vm811_vm3, %vm812_vm9 }
  0xdd   : > { %v1259_v40 = vpack.c.bf16 %v1045_v56, %v1045_v56  ;;  %v809_v4 = vmul.f32 %v2272_v45, %v808_v21  ;;  %v1481_v5 = vsub.f32 1.0, %v1480_v63  ;;  %v1717_v6 = vsel %vm2884_vm0, %v1716_v12, %v1712_v23 }
  0xde   : > { %v2276_v62 = vpop.eup %2275  ;;  %vm1485_vm10 = vweird.f32 %v2274_v48  ;;  %v1491_v58 = vor.u32 1.1754944e-38, %v1490_v37  ;;  %v1310_v60 = vsub.f32 0.0, %v2853_v7  ;;  %v1718_v10 = vmul.f32 %v1717_v6, %v2762_v43 }
  0xdf   : > { %1292 = vst.msk [vmem:[%s2705_s14 + $0x48] sm:$0xf] %vm1273_vm5, %v1259_v40  ;;  %v810_v11 = vadd.f32 %v2272_v45, %v809_v4  ;;  %v1482_v61 = vmul.f32 %v2274_v48, %v1481_v5  ;;  %v1728_v16 = vand.u32 2147483647, %v2897_v50  ;;  %vm1051_vm12 = vweird.f32 %v2890_v46  ;;  %vm1486_vm15 = vmor %vm1484_vm6, %vm1485_vm10 }
  0xe0   : > { %v2278_v20 = vpop.eup %2277  ;;  %v1058_v25 = vor.u32 1.1754944e-38, %v1057_v3  ;;  %v1730_v26 = vand.u32 2147483648, %v2897_v50  ;;  %v2933_v1 = vadd.f32 1.0, %v2276_v62  ;;  %v1932_v29 = vpack.c.bf16 %v1718_v10, %v1718_v10 }
  0xe1   : > { %v814_v43 = vsel %vm813_vm11, %v2272_v45, %v810_v11  ;;  %v1483_v8 = vadd.f32 %v2274_v48, %v1482_v61  ;;  %v1047_v27 = vmul.f32 %v2278_v20, %v2890_v46  ;;  %vm2936_vm13 = vcmp.eq.f32.partialorder %v1055_v2, 8.507059e+37  ;;  %v565_v45 = vpop.f32.mrf.mxu1  ;;  %v504_v2 = vpop.f32.mrf.mxu2 }
  0xe2   : > { %vm1724_vm14 = vweird.f32 %v2897_v50  ;;  %v2280_v31 = vpop.eup %2279  ;;  %v819_v30 = vsel %vm2900_vm4, %v818_v54, %v814_v43  ;;  %2281 = vrcp.f32 %v2933_v1  ;;  %v1346_v32 = vmul.f32 1.442695, %v1310_v60  ;;  %1964 = vst.msk [vmem:[%s2717_s17 + $0x48] sm:$0xf] %vm1273_vm5, %v1932_v29  ;;  %v605_v6 = vpop.f32.mrf.mxu3 }
  0xe3   : > { %v2948_v33 = vadd.f32 %v2591_v18, %v502_v17  ;;  %v820_v49 = vmul.f32 %v819_v30, %v2767_v34  ;;  %v1487_v15 = vsel %vm1486_vm15, %v2274_v48, %v1483_v8  ;;  %v1048_v22 = vsub.f32 1.0, %v1047_v27 }
  0xe4   : > { %v1720_v35 = vmul.f32 %v2280_v31, %v2897_v50  ;;  %vm2954_vm0 = vcmp.eq.f32.partialorder %v1728_v16, 8.507059e+37  ;;  %v1492_v13 = vsel %vm2911_vm7, %v1491_v58, %v1487_v15  ;;  %vm1052_vm1 = vweird.f32 %v2278_v20 }
  0xe5   : > { %vm1725_vm2 = vweird.f32 %v2280_v31  ;;  %v1731_v12 = vor.u32 1.1754944e-38, %v1730_v26  ;;  %v1244_v24 = vpack.c.bf16 %v820_v49, %v820_v49  ;;  %v1493_v38 = vmul.f32 %v1492_v13, %v2777_v55  ;;  %vm1053_vm4 = vmor %vm1051_vm12, %vm1052_vm1 }
  0xe6   : > { %v1049_v41 = vmul.f32 %v2278_v20, %v1048_v22  ;;  %v1721_v34 = vsub.f32 1.0, %v1720_v35  ;;  %vm826_vm3 = vweird.f32 %v2933_v1  ;;  %v830_v51 = vand.u32 2147483647, %v2933_v1  ;;  %vm1726_vm7 = vmor %vm1724_vm14, %vm1725_vm2  ;;  %v467_v35 = vpop.f32.mrf.mxu0 }
  0xe7   : > { %2283 = vpow2.f32 %v1346_v32  ;;  %v653_v52 = vsub.f32 0.0, %v2948_v33  ;;  %1277 = vst.msk [vmem:[%s2705_s14 + $0xc] sm:$0xf] %vm1273_vm5, %v1244_v24  ;;  %v1917_v53 = vpack.c.bf16 %v1493_v38, %v1493_v38  ;;  %v2967_v42 = vadd.f32 %v2596_v19, %v603_v57 }
  0xe8   : > { %v1050_v39 = vadd.f32 %v2278_v20, %v1049_v41  ;;  %v1722_v48 = vmul.f32 %v2280_v31, %v1721_v34  ;;  %v2282_v55 = vpop.eup %2281  ;;  %v832_v54 = vand.u32 2147483648, %v2933_v1  ;;  %v2974_v56 = vadd.f32 %v2591_v18, %v464_v44 }
  0xe9   : > { %v705_v37 = vmul.f32 1.442695, %v653_v52  ;;  %v2977_v59 = vadd.f32 %v2596_v19, %v565_v45  ;;  %1949 = vst.msk [vmem:[%s2717_s17 + $0xc] sm:$0xf] %vm1273_vm5, %v1917_v53  ;;  %v822_v0 = vmul.f32 %v2282_v55, %v2933_v1  ;;  %vm827_vm6 = vweird.f32 %v2282_v55  ;;  %v568_v34 = vpop.f32.mrf.mxu1 }
  0xea   : > { %v1054_v21 = vsel %vm1053_vm4, %v2278_v20, %v1050_v39  ;;  %v1723_v63 = vadd.f32 %v2280_v31, %v1722_v48  ;;  %v1326_v3 = vsub.f32 0.0, %v2967_v42  ;;  %v638_v40 = vsub.f32 0.0, %v2974_v56  ;;  %vm828_vm8 = vmor %vm826_vm3, %vm827_vm6 }
  0xeb   : > { %v1059_v46 = vsel %vm2936_vm13, %v1058_v25, %v1054_v21  ;;  %2285 = vpow2.f32 %v705_v37  ;;  %v823_v5 = vsub.f32 1.0, %v822_v0  ;;  %v1311_v62 = vsub.f32 0.0, %v2977_v59 }
  0xec   : > { %v1060_v23 = vmul.f32 %v1059_v46, %v2798_v9  ;;  %v1727_v4 = vsel %vm1726_vm7, %v2280_v31, %v1723_v63  ;;  %v1378_v10 = vmul.f32 1.442695, %v1326_v3  ;;  %v675_v50 = vmul.f32 1.442695, %v638_v40 }
  0xed   : > { %v2284_v58 = vpop.eup %2283  ;;  %v1732_v60 = vsel %vm2954_vm0, %v1731_v12, %v1727_v4  ;;  %v2994_v11 = vadd.f32 %v2591_v18, %v504_v2  ;;  %v824_v17 = vmul.f32 %v2282_v55, %v823_v5  ;;  %v1348_v20 = vmul.f32 1.442695, %v1311_v62 }
  0xee   : > { %v1260_v61 = vpack.c.bf16 %v1060_v23, %v1060_v23  ;;  %v1733_v16 = vmul.f32 %v1732_v60, %v2802_v14  ;;  %v2997_v9 = vadd.f32 1.0, %v2284_v58  ;;  %2287 = vpow2.f32 %v1378_v10 }
  0xef   : > { %v654_v25 = vsub.f32 0.0, %v2994_v11  ;;  %v3001_v26 = vadd.f32 %v2596_v19, %v605_v6  ;;  %v825_v43 = vadd.f32 %v2282_v55, %v824_v17  ;;  %vm831_vm9 = vcmp.eq.f32.partialorder %v830_v51, 8.507059e+37 }
  0xf0   : > { %1293 = vst.msk [vmem:[%s2705_s14 + $0x4c] sm:$0xf] %vm1273_vm5, %v1260_v61  ;;  %v1933_v29 = vpack.c.bf16 %v1733_v16, %v1733_v16  ;;  %2289 = vrcp.f32 %v2997_v9  ;;  %v833_v14 = vor.u32 1.1754944e-38, %v832_v54  ;;  %v1503_v32 = vand.u32 2147483647, %v2997_v9  ;;  %v507_v54 = vpop.f32.mrf.mxu2 }
  0xf1   : > { %v2286_v8 = vpop.eup %2285  ;;  %2291 = vpow2.f32 %v675_v50  ;;  %v707_v27 = vmul.f32 1.442695, %v654_v25  ;;  %v829_v28 = vsel %vm828_vm8, %v2282_v55, %v825_v43  ;;  %v1327_v31 = vsub.f32 0.0, %v3001_v26 }
  0xf2   : > { %1965 = vst.msk [vmem:[%s2717_s17 + $0x4c] sm:$0xf] %vm1273_vm5, %v1933_v29  ;;  %v3011_v57 = vadd.f32 1.0, %v2286_v8  ;;  %2293 = vpow2.f32 %v1348_v20  ;;  %v834_v30 = vsel %vm831_vm9, %v833_v14, %v829_v28  ;;  %v1505_v1 = vand.u32 2147483648, %v2997_v9 }
  0xf3   : > { %2295 = vpow2.f32 %v707_v27  ;;  %v835_v49 = vmul.f32 %v834_v30, %v2833_v47  ;;  %v1380_v22 = vmul.f32 1.442695, %v1327_v31  ;;  %vm1499_vm10 = vweird.f32 %v2997_v9 }
  0xf4   : > { %2297 = vrcp.f32 %v3011_v57  ;;  %v2288_v15 = vpop.eup %2287  ;;  %vm3022_vm11 = vcmp.eq.f32.partialorder %v1503_v32, 8.507059e+37  ;;  %v1070_v47 = vand.u32 2147483647, %v3011_v57  ;;  %v1506_v45 = vor.u32 1.1754944e-38, %v1505_v1 }
  0xf5   : > { %v1245_v13 = vpack.c.bf16 %v835_v49, %v835_v49  ;;  %v3018_v12 = vadd.f32 1.0, %v2288_v15  ;;  %v1072_v51 = vand.u32 2147483648, %v3011_v57  ;;  %v3032_v52 = vadd.f32 %v2591_v18, %v467_v35 }
  0xf6   : > { %v2290_v36 = vpop.eup %2289  ;;  %vm1066_vm13 = vweird.f32 %v3011_v57  ;;  %v3042_v63 = vadd.f32 %v2596_v19, %v568_v34  ;;  %vm3045_vm14 = vcmp.eq.f32.partialorder %v1070_v47, 8.507059e+37  ;;  %v3054_v4 = vadd.f32 %v2591_v18, %v507_v54  ;;  %v608_v47 = vpop.f32.mrf.mxu3 }
  0xf7   : > { %v2292_v24 = vpop.eup %2291  ;;  %v1495_v38 = vmul.f32 %v2290_v36, %v2997_v9  ;;  %1278 = vst.msk [vmem:[%s2705_s14 + $0x10] sm:$0xf] %vm1273_vm5, %v1245_v13  ;;  %2299 = vrcp.f32 %v3018_v12  ;;  %vm1500_vm12 = vweird.f32 %v2290_v36  ;;  %v1743_v3 = vand.u32 2147483647, %v3018_v12 }
  0xf8   : > { %v2294_v44 = vpop.eup %2293  ;;  %v3034_v48 = vadd.f32 1.0, %v2292_v24  ;;  %2301 = vpow2.f32 %v1380_v22  ;;  %v1073_v40 = vor.u32 1.1754944e-38, %v1072_v51  ;;  %v1745_v23 = vand.u32 2147483648, %v3018_v12  ;;  %vm1501_vm0 = vmor %vm1499_vm10, %vm1500_vm12 }
  0xf9   : > { %v2296_v53 = vpop.eup %2295  ;;  %v1496_v39 = vsub.f32 1.0, %v1495_v38  ;;  %v3036_v55 = vadd.f32 1.0, %v2294_v44  ;;  %vm1739_vm15 = vweird.f32 %v3018_v12  ;;  %v639_v6 = vsub.f32 0.0, %v3032_v52 }
  0xfa   : > { %v2298_v37 = vpop.eup %2297  ;;  %v3039_v21 = vadd.f32 1.0, %v2296_v53  ;;  %2303 = vrcp.f32 %v3034_v48  ;;  %v847_v62 = vand.u32 2147483648, %v3034_v48  ;;  %v845_v60 = vand.u32 2147483647, %v3034_v48 }
  0xfb   : > { %v1497_v0 = vmul.f32 %v2290_v36, %v1496_v39  ;;  %v1062_v2 = vmul.f32 %v2298_v37, %v3011_v57  ;;  %2305 = vrcp.f32 %v3036_v55  ;;  %vm1067_vm1 = vweird.f32 %v2298_v37 }
  0xfc   : > { %v1520_v10 = vand.u32 2147483648, %v3036_v55  ;;  %2307 = vrcp.f32 %v3039_v21  ;;  %vm3066_vm2 = vcmp.eq.f32.partialorder %v1743_v3, 8.507059e+37  ;;  %v1518_v20 = vand.u32 2147483647, %v3036_v55  ;;  %vm1068_vm6 = vmor %vm1066_vm13, %vm1067_vm1 }
  0xfd   : > { %v1498_v19 = vadd.f32 %v2290_v36, %v1497_v0  ;;  %v1063_v5 = vsub.f32 1.0, %v1062_v2  ;;  %v2300_v58 = vpop.eup %2299  ;;  %v1746_v25 = vor.u32 1.1754944e-38, %v1745_v23  ;;  %vm841_vm3 = vweird.f32 %v3034_v48 }
  0xfe   : > { %v2302_v18 = vpop.eup %2301  ;;  %v1735_v16 = vmul.f32 %v2300_v58, %v3018_v12  ;;  %v1312_v29 = vsub.f32 0.0, %v3042_v63  ;;  %v848_v28 = vor.u32 1.1754944e-38, %v847_v62  ;;  %vm1514_vm4 = vweird.f32 %v3036_v55 }
  0xff   : > { %v1502_v50 = vsel %vm1501_vm0, %v2290_v36, %v1498_v19  ;;  %v1064_v61 = vmul.f32 %v2298_v37, %v1063_v5  ;;  %vm1740_vm7 = vweird.f32 %v2300_v58  ;;  %vm3081_vm8 = vcmp.eq.f32.partialorder %v845_v60, 8.507059e+37 }
 0x100   : > { %v1507_v9 = vsel %vm3022_vm11, %v1506_v45, %v1502_v50  ;;  %v2304_v43 = vpop.eup %2303  ;;  %v1736_v27 = vsub.f32 1.0, %v1735_v16  ;;  %v1521_v49 = vor.u32 1.1754944e-38, %v1520_v10  ;;  %vm3088_vm9 = vcmp.eq.f32.partialorder %v1518_v20, 8.507059e+37  ;;  %vm1741_vm11 = vmor %vm1739_vm15, %vm1740_vm7 }
 0x101   : > { %v1508_v8 = vmul.f32 %v1507_v9, %v2853_v7  ;;  %v1065_v14 = vadd.f32 %v2298_v37, %v1064_v61  ;;  %v2306_v31 = vpop.eup %2305  ;;  %v837_v30 = vmul.f32 %v2304_v43, %v3034_v48  ;;  %v3085_v7 = vadd.f32 1.0, %v2302_v18  ;;  %v509_v9 = vpop.f32.mrf.mxu2 }
 0x102   : > { %v1737_v22 = vmul.f32 %v2300_v58, %v1736_v27  ;;  %v1510_v35 = vmul.f32 %v2306_v31, %v3036_v55  ;;  %vm1081_vm10 = vweird.f32 %v3039_v21  ;;  %v2308_v57 = vpop.eup %2307  ;;  %v1085_v38 = vand.u32 2147483647, %v3039_v21  ;;  %v3142_v27 = vld [vmem:[%s4015_s4] ss:$0 sm:$0xff] }
 0x103   : > { %v1918_v1 = vpack.c.bf16 %v1508_v8, %v1508_v8  ;;  %v1069_v15 = vsel %vm1068_vm6, %v2298_v37, %v1065_v14  ;;  %v838_v24 = vsub.f32 1.0, %v837_v30  ;;  %v1087_v41 = vand.u32 2147483648, %v3039_v21  ;;  %v3152_v30 = vld [vmem:[%s4013_s2] ss:$0 sm:$0xff] }
 0x104   : > { %v1074_v13 = vsel %vm3045_vm14, %v1073_v40, %v1069_v15  ;;  %v1738_v44 = vadd.f32 %v2300_v58, %v1737_v22  ;;  %v1511_v45 = vsub.f32 1.0, %v1510_v35  ;;  %v1077_v51 = vmul.f32 %v2308_v57, %v3039_v21 }
 0x105   : > { %1950 = vst.msk [vmem:[%s2717_s17 + $0x10] sm:$0xf] %vm1273_vm5, %v1918_v1  ;;  %v1075_v34 = vmul.f32 %v1074_v13, %v2948_v33  ;;  %v839_v53 = vmul.f32 %v2304_v43, %v838_v24  ;;  %vm842_vm12 = vweird.f32 %v2304_v43  ;;  %vm1515_vm13 = vweird.f32 %v2306_v31 }
 0x106   : > { %2309 = vrcp.f32 %v3085_v7  ;;  %v1742_v54 = vsel %vm1741_vm11, %v2300_v58, %v1738_v44  ;;  %v1512_v37 = vmul.f32 %v2306_v31, %v1511_v45  ;;  %v1078_v0 = vsub.f32 1.0, %v1077_v51  ;;  %vm843_vm15 = vmor %vm841_vm3, %vm842_vm12 }
 0x107   : > { %v1261_v39 = vpack.c.bf16 %v1075_v34, %v1075_v34  ;;  %v1747_v33 = vsel %vm3066_vm2, %v1746_v25, %v1742_v54  ;;  %v840_v2 = vadd.f32 %v2304_v43, %v839_v53  ;;  %vm1082_vm14 = vweird.f32 %v2308_v57  ;;  %vm1516_vm1 = vmor %vm1514_vm4, %vm1515_vm13 }
 0x108   : > { %vm3107_vm0 = vcmp.eq.f32.partialorder %v1085_v38, 8.507059e+37  ;;  %v1748_v12 = vmul.f32 %v1747_v33, %v2967_v42  ;;  %v1513_v3 = vadd.f32 %v2306_v31, %v1512_v37  ;;  %v1079_v40 = vmul.f32 %v2308_v57, %v1078_v0  ;;  %vm1083_vm2 = vmor %vm1081_vm10, %vm1082_vm14 }
 0x109   : > { %1294 = vst.msk [vmem:[%s2705_s14 + $0x50] sm:$0xf] %vm1273_vm5, %v1261_v39  ;;  %v1088_v23 = vor.u32 1.1754944e-38, %v1087_v41  ;;  %v844_v19 = vsel %vm843_vm15, %v2304_v43, %v840_v2  ;;  %v1758_v5 = vand.u32 2147483647, %v3085_v7  ;;  %v1760_v61 = vand.u32 2147483648, %v3085_v7  ;;  %v610_v43 = vpop.f32.mrf.mxu3 }
 0x10a   : > { %v677_v62 = vmul.f32 1.442695, %v639_v6  ;;  %v1350_v58 = vmul.f32 1.442695, %v1312_v29  ;;  %v1934_v60 = vpack.c.bf16 %v1748_v12, %v1748_v12  ;;  %v849_v42 = vsel %vm3081_vm8, %v848_v28, %v844_v19  ;;  %v469_v6 = vpop.f32.mrf.mxu0 }
 0x10b   : > { %v1517_v48 = vsel %vm1516_vm1, %v2306_v31, %v1513_v3  ;;  %v1080_v10 = vadd.f32 %v2308_v57, %v1079_v40  ;;  %v850_v50 = vmul.f32 %v849_v42, %v2974_v56  ;;  %v570_v56 = vpop.f32.mrf.mxu1  ;;  %v655_v29 = vsub.f32 0.0, %v3054_v4 }
 0x10c   : > { %v2310_v18 = vpop.eup %2309  ;;  %v1522_v55 = vsel %vm3088_vm9, %v1521_v49, %v1517_v48  ;;  %2311 = vpow2.f32 %v677_v62  ;;  %1966 = vst.msk [vmem:[%s2717_s17 + $0x50] sm:$0xf] %vm1273_vm5, %v1934_v60  ;;  %v3145_v28 = vadd.f32 %v3142_v27, %v608_v47  ;;  %v3158_v32 = vadd.f32 %v3142_v27, %v570_v56 }
 0x10d   : > { %v1523_v16 = vmul.f32 %v1522_v55, %v2977_v59  ;;  %v1084_v17 = vsel %vm1083_vm2, %v2308_v57, %v1080_v10  ;;  %v1750_v20 = vmul.f32 %v2310_v18, %v3085_v7  ;;  %vm1755_vm3 = vweird.f32 %v2310_v18 }
 0x10e   : > { %v1246_v25 = vpack.c.bf16 %v850_v50, %v850_v50  ;;  %v1089_v21 = vsel %vm3107_vm0, %v1088_v23, %v1084_v17  ;;  %2313 = vpow2.f32 %v1350_v58  ;;  %v709_v31 = vmul.f32 1.442695, %v655_v29  ;;  %v512_v29 = vpop.f32.mrf.mxu2 }
 0x10f   : > { %v1919_v8 = vpack.c.bf16 %v1523_v16, %v1523_v16  ;;  %v1090_v14 = vmul.f32 %v1089_v21, %v2994_v11  ;;  %v1751_v59 = vsub.f32 1.0, %v1750_v20  ;;  %v3155_v11 = vadd.f32 %v3152_v30, %v469_v6 }
 0x110   : > { %1279 = vst.msk [vmem:[%s2705_s14 + $0x14] sm:$0xf] %vm1273_vm5, %v1246_v25  ;;  %v3161_v49 = vadd.f32 %v3152_v30, %v509_v9  ;;  %v1328_v22 = vsub.f32 0.0, %v3145_v28  ;;  %v3167_v35 = vadd.f32 %v3142_v27, %v610_v43  ;;  %2315 = vpow2.f32 %v709_v31 }
 0x111   : > { %1951 = vst.msk [vmem:[%s2717_s17 + $0x14] sm:$0xf] %vm1273_vm5, %v1919_v8  ;;  %v1262_v1 = vpack.c.bf16 %v1090_v14, %v1090_v14  ;;  %v1752_v15 = vmul.f32 %v2310_v18, %v1751_v59  ;;  %v640_v57 = vsub.f32 0.0, %v3155_v11  ;;  %v1313_v13 = vsub.f32 0.0, %v3158_v32 }
 0x112   : > { %v2312_v36 = vpop.eup %2311  ;;  %vm1754_vm4 = vweird.f32 %v3085_v7  ;;  %v1382_v41 = vmul.f32 1.442695, %v1328_v22  ;;  %v1761_v34 = vor.u32 1.1754944e-38, %v1760_v61  ;;  %v656_v45 = vsub.f32 0.0, %v3161_v49  ;;  %v472_v37 = vpop.f32.mrf.mxu0 }
 0x113   : > { %1295 = vst.msk [vmem:[%s2705_s14 + $0x54] sm:$0xf] %vm1273_vm5, %v1262_v1  ;;  %v1753_v24 = vadd.f32 %v2310_v18, %v1752_v15  ;;  %v3174_v38 = vadd.f32 1.0, %v2312_v36  ;;  %vm1756_vm6 = vmor %vm1754_vm4, %vm1755_vm3  ;;  %v679_v44 = vmul.f32 1.442695, %v640_v57  ;;  %vm1759_vm7 = vcmp.eq.f32.partialorder %v1758_v5, 8.507059e+37  ;;  %v573_v5 = vpop.f32.mrf.mxu1 }
 0x114   : > { %v2314_v47 = vpop.eup %2313  ;;  %v1329_v53 = vsub.f32 0.0, %v3167_v35  ;;  %v1352_v7 = vmul.f32 1.442695, %v1313_v13  ;;  %v711_v12 = vmul.f32 1.442695, %v656_v45  ;;  %v3189_v23 = vadd.f32 %v3152_v30, %v472_v37 }
 0x115   : > { %v1757_v51 = vsel %vm1756_vm6, %v2310_v18, %v1753_v24  ;;  %2317 = vrcp.f32 %v3174_v38  ;;  %v3180_v54 = vadd.f32 1.0, %v2314_v47  ;;  %v860_v2 = vand.u32 2147483647, %v3174_v38 }
 0x116   : > { %v1762_v39 = vsel %vm1759_vm7, %v1761_v34, %v1757_v51  ;;  %2319 = vpow2.f32 %v1382_v41  ;;  %v2316_v33 = vpop.eup %2315  ;;  %v862_v46 = vand.u32 2147483648, %v3174_v38  ;;  %v1384_v19 = vmul.f32 1.442695, %v1329_v53 }
 0x117   : > { %v1763_v0 = vmul.f32 %v1762_v39, %v3001_v26  ;;  %2321 = vpow2.f32 %v679_v44  ;;  %v3186_v40 = vadd.f32 1.0, %v2316_v33  ;;  %vm856_vm8 = vweird.f32 %v3174_v38 }
 0x118   : > { %2323 = vrcp.f32 %v3180_v54  ;;  %v1533_v26 = vand.u32 2147483647, %v3180_v54  ;;  %v1535_v58 = vand.u32 2147483648, %v3180_v54  ;;  %vm3198_vm9 = vcmp.eq.f32.partialorder %v860_v2, 8.507059e+37 }
 0x119   : > { %v1935_v3 = vpack.c.bf16 %v1763_v0, %v1763_v0  ;;  %2325 = vpow2.f32 %v1352_v7  ;;  %v863_v10 = vor.u32 1.1754944e-38, %v862_v46  ;;  %vm1529_vm10 = vweird.f32 %v3180_v54 }
 0x11a   : > { %2327 = vrcp.f32 %v3186_v40  ;;  %v1102_v50 = vand.u32 2147483648, %v3186_v40  ;;  %v641_v61 = vsub.f32 0.0, %v3189_v23  ;;  %v3208_v6 = vadd.f32 %v3142_v27, %v573_v5 }
 0x11b   : > { %v2318_v62 = vpop.eup %2317  ;;  %1967 = vst.msk [vmem:[%s2717_s17 + $0x54] sm:$0xf] %vm1273_vm5, %v1935_v3  ;;  %2329 = vpow2.f32 %v711_v12  ;;  %v1100_v20 = vand.u32 2147483647, %v3186_v40  ;;  %vm3214_vm11 = vcmp.eq.f32.partialorder %v1533_v26, 8.507059e+37  ;;  %v1536_v21 = vor.u32 1.1754944e-38, %v1535_v58 }
 0x11c   : > { %v2320_v60 = vpop.eup %2319  ;;  %v852_v42 = vmul.f32 %v2318_v62, %v3174_v38  ;;  %2331 = vpow2.f32 %v1384_v19  ;;  %vm857_vm12 = vweird.f32 %v2318_v62  ;;  %vm1096_vm13 = vweird.f32 %v3186_v40 }
 0x11d   : > { %v2322_v18 = vpop.eup %2321  ;;  %v3204_v55 = vadd.f32 1.0, %v2320_v60  ;;  %v1103_v31 = vor.u32 1.1754944e-38, %v1102_v50  ;;  %v681_v1 = vmul.f32 1.442695, %v641_v61  ;;  %v1314_v15 = vsub.f32 0.0, %v3208_v6  ;;  %vm858_vm0 = vmor %vm856_vm8, %vm857_vm12 }
 0x11e   : > { %v2324_v16 = vpop.eup %2323  ;;  %v853_v17 = vsub.f32 1.0, %v852_v42  ;;  %v3211_v56 = vadd.f32 1.0, %v2322_v18  ;;  %vm3223_vm14 = vcmp.eq.f32.partialorder %v1100_v20, 8.507059e+37  ;;  %v3229_v41 = vadd.f32 %v3152_v30, %v512_v29 }
 0x11f   : > { %v1525_v9 = vmul.f32 %v2324_v16, %v3180_v54  ;;  %2333 = vrcp.f32 %v3204_v55  ;;  %v2326_v43 = vpop.eup %2325  ;;  %v1773_v24 = vand.u32 2147483647, %v3204_v55  ;;  %vm1530_vm15 = vweird.f32 %v2324_v16 }
 0x120   : > { %v854_v8 = vmul.f32 %v2318_v62, %v853_v17  ;;  %2335 = vrcp.f32 %v3211_v56  ;;  %v2328_v14 = vpop.eup %2327  ;;  %v1775_v34 = vand.u32 2147483648, %v3204_v55  ;;  %v875_v44 = vand.u32 2147483647, %v3211_v56  ;;  %vm1531_vm4 = vmor %vm1529_vm10, %vm1530_vm15 }
 0x121   : > { %v1526_v59 = vsub.f32 1.0, %v1525_v9  ;;  %v2330_v22 = vpop.eup %2329  ;;  %v1092_v57 = vmul.f32 %v2328_v14, %v3186_v40  ;;  %vm1769_vm1 = vweird.f32 %v3204_v55  ;;  %v877_v39 = vand.u32 2147483648, %v3211_v56 }
 0x122   : > { %v855_v36 = vadd.f32 %v2318_v62, %v854_v8  ;;  %v2332_v45 = vpop.eup %2331  ;;  %v3237_v7 = vadd.f32 1.0, %v2326_v43  ;;  %vm1097_vm2 = vweird.f32 %v2328_v14  ;;  %vm871_vm3 = vweird.f32 %v3211_v56 }
 0x123   : > { %v1527_v47 = vmul.f32 %v2324_v16, %v1526_v59  ;;  %v1093_v53 = vsub.f32 1.0, %v1092_v57  ;;  %v3242_v33 = vadd.f32 1.0, %v2330_v22  ;;  %vm3249_vm6 = vcmp.eq.f32.partialorder %v1773_v24, 8.507059e+37  ;;  %vm1098_vm7 = vmor %vm1096_vm13, %vm1097_vm2 }
 0x124   : > { %v859_v51 = vsel %vm858_vm0, %v2318_v62, %v855_v36  ;;  %2337 = vpow2.f32 %v681_v1  ;;  %v3255_v26 = vadd.f32 1.0, %v2332_v45  ;;  %v1548_v50 = vand.u32 2147483647, %v3237_v7 }
 0x125   : > { %v2334_v37 = vpop.eup %2333  ;;  %v864_v38 = vsel %vm3198_vm9, %v863_v10, %v859_v51  ;;  %v1528_v0 = vadd.f32 %v2324_v16, %v1527_v47  ;;  %v1094_v12 = vmul.f32 %v2328_v14, %v1093_v53  ;;  %2339 = vrcp.f32 %v3237_v7 }
 0x126   : > { %v2336_v2 = vpop.eup %2335  ;;  %v865_v46 = vmul.f32 %v864_v38, %v3032_v52  ;;  %v1765_v3 = vmul.f32 %v2334_v37, %v3204_v55  ;;  %vm1770_vm8 = vweird.f32 %v2334_v37  ;;  %2341 = vrcp.f32 %v3242_v33 }
 0x127   : > { %v1532_v5 = vsel %vm1531_vm4, %v2324_v16, %v1528_v0  ;;  %v867_v62 = vmul.f32 %v2336_v2, %v3211_v56  ;;  %v1095_v58 = vadd.f32 %v2328_v14, %v1094_v12  ;;  %vm872_vm9 = vweird.f32 %v2336_v2 }
 0x128   : > { %v1247_v52 = vpack.c.bf16 %v865_v46, %v865_v46  ;;  %v1537_v54 = vsel %vm3214_vm11, %v1536_v21, %v1532_v5  ;;  %v1766_v60 = vsub.f32 1.0, %v1765_v3  ;;  %v1550_v40 = vand.u32 2147483648, %v3237_v7  ;;  %vm1771_vm11 = vmor %vm1769_vm1, %vm1770_vm8 }
 0x129   : > { %v1538_v42 = vmul.f32 %v1537_v54, %v3042_v63  ;;  %v868_v48 = vsub.f32 1.0, %v867_v62  ;;  %v1099_v10 = vsel %vm1098_vm7, %v2328_v14, %v1095_v58  ;;  %v1776_v25 = vor.u32 1.1754944e-38, %v1775_v34  ;;  %vm873_vm13 = vmor %vm871_vm3, %vm872_vm9  ;;  %v474_v54 = vpop.f32.mrf.mxu0  ;;  %v575_v58 = vpop.f32.mrf.mxu1 }
 0x12a   : > { %1280 = vst.msk [vmem:[%s2705_s14 + $0x18] sm:$0xf] %vm1273_vm5, %v1247_v52  ;;  %v1767_v18 = vmul.f32 %v2334_v37, %v1766_v60  ;;  %v1104_v63 = vsel %vm3223_vm14, %v1103_v31, %v1099_v10  ;;  %v2338_v17 = vpop.eup %2337  ;;  %vm3271_vm10 = vcmp.eq.f32.partialorder %v875_v44, 8.507059e+37  ;;  %v878_v8 = vor.u32 1.1754944e-38, %v877_v39  ;;  %v613_v39 = vpop.f32.mrf.mxu3 }
 0x12b   : > { %v1920_v61 = vpack.c.bf16 %v1538_v42, %v1538_v42  ;;  %v869_v16 = vmul.f32 %v2336_v2, %v868_v48  ;;  %v1105_v20 = vmul.f32 %v1104_v63, %v3054_v4  ;;  %v2340_v29 = vpop.eup %2339  ;;  %vm1544_vm12 = vweird.f32 %v3237_v7 }
 0x12c   : > { %v1768_v9 = vadd.f32 %v2334_v37, %v1767_v18  ;;  %2343 = vrcp.f32 %v3255_v26  ;;  %v1540_v59 = vmul.f32 %v2340_v29, %v3237_v7  ;;  %vm3286_vm14 = vcmp.eq.f32.partialorder %v1548_v50, 8.507059e+37  ;;  %v2342_v57 = vpop.eup %2341 }
 0x12d   : > { %1952 = vst.msk [vmem:[%s2717_s17 + $0x18] sm:$0xf] %vm1273_vm5, %v1920_v61  ;;  %v870_v43 = vadd.f32 %v2336_v2, %v869_v16  ;;  %v1263_v4 = vpack.c.bf16 %v1105_v20, %v1105_v20  ;;  %v1551_v22 = vor.u32 1.1754944e-38, %v1550_v40  ;;  %v1115_v36 = vand.u32 2147483647, %v3242_v33 }
 0x12e   : > { %v1772_v14 = vsel %vm1771_vm11, %v2334_v37, %v1768_v9  ;;  %v1541_v24 = vsub.f32 1.0, %v1540_v59  ;;  %v1117_v47 = vand.u32 2147483648, %v3242_v33  ;;  %vm1545_vm0 = vweird.f32 %v2340_v29  ;;  %v514_v9 = vpop.f32.mrf.mxu2 }
 0x12f   : > { %v1777_v55 = vsel %vm3249_vm6, %v1776_v25, %v1772_v14  ;;  %v874_v1 = vsel %vm873_vm13, %v2336_v2, %v870_v43  ;;  %1296 = vst.msk [vmem:[%s2705_s14 + $0x58] sm:$0xf] %vm1273_vm5, %v1263_v4  ;;  %v1107_v44 = vmul.f32 %v2342_v57, %v3242_v33  ;;  %vm1111_vm15 = vweird.f32 %v3242_v33  ;;  %vm1546_vm2 = vmor %vm1544_vm12, %vm1545_vm0 }
 0x130   : > { %v1778_v13 = vmul.f32 %v1777_v55, %v3145_v28  ;;  %v879_v56 = vsel %vm3271_vm10, %v878_v8, %v874_v1  ;;  %v1542_v51 = vmul.f32 %v2340_v29, %v1541_v24  ;;  %v1788_v53 = vand.u32 2147483647, %v3255_v26 }
 0x131   : > { %v880_v34 = vmul.f32 %v879_v56, %v3155_v11  ;;  %v3303_v28 = vadd.f32 1.0, %v2338_v17  ;;  %v1108_v0 = vsub.f32 1.0, %v1107_v44  ;;  %vm3305_vm1 = vcmp.eq.f32.partialorder %v1115_v36, 8.507059e+37 }
 0x132   : > { %v1936_v45 = vpack.c.bf16 %v1778_v13, %v1778_v13  ;;  %v2344_v37 = vpop.eup %2343  ;;  %v1354_v11 = vmul.f32 1.442695, %v1314_v15  ;;  %v1543_v46 = vadd.f32 %v2340_v29, %v1542_v51  ;;  %v1118_v12 = vor.u32 1.1754944e-38, %v1117_v47 }
 0x133   : > { %v1248_v38 = vpack.c.bf16 %v880_v34, %v880_v34  ;;  %v1780_v3 = vmul.f32 %v2344_v37, %v3255_v26  ;;  %v1790_v19 = vand.u32 2147483648, %v3255_v26  ;;  %v1109_v5 = vmul.f32 %v2342_v57, %v1108_v0  ;;  %v477_v0 = vpop.f32.mrf.mxu0 }
 0x134   : > { %1968 = vst.msk [vmem:[%s2717_s17 + $0x58] sm:$0xf] %vm1273_vm5, %v1936_v45  ;;  %vm1112_vm3 = vweird.f32 %v2342_v57  ;;  %vm1784_vm4 = vweird.f32 %v3255_v26  ;;  %2345 = vrcp.f32 %v3303_v28  ;;  %v1547_v15 = vsel %vm1546_vm2, %v2340_v29, %v1543_v46  ;;  %v578_v46 = vpop.f32.mrf.mxu1 }
 0x135   : > { %1281 = vst.msk [vmem:[%s2705_s14 + $0x1c] sm:$0xf] %vm1273_vm5, %v1248_v38  ;;  %v1781_v62 = vsub.f32 1.0, %v1780_v3  ;;  %vm3322_vm6 = vcmp.eq.f32.partialorder %v1788_v53, 8.507059e+37  ;;  %2347 = vpow2.f32 %v1354_v11  ;;  %v1552_v60 = vsel %vm3286_vm14, %v1551_v22, %v1547_v15  ;;  %vm1113_vm8 = vmor %vm1111_vm15, %vm1112_vm3 }
 0x136   : > { %v1110_v7 = vadd.f32 %v2342_v57, %v1109_v5  ;;  %vm1785_vm7 = vweird.f32 %v2344_v37  ;;  %v657_v42 = vsub.f32 0.0, %v3229_v41  ;;  %v1553_v48 = vmul.f32 %v1552_v60, %v3158_v32 }
 0x137   : > { %v1782_v10 = vmul.f32 %v2344_v37, %v1781_v62  ;;  %v1791_v18 = vor.u32 1.1754944e-38, %v1790_v19  ;;  %v3333_v50 = vadd.f32 %v3142_v27, %v613_v39  ;;  %v3336_v16 = vadd.f32 %v3152_v30, %v474_v54  ;;  %vm1786_vm9 = vmor %vm1784_vm4, %vm1785_vm7 }
 0x138   : > { %v1114_v61 = vsel %vm1113_vm8, %v2342_v57, %v1110_v7  ;;  %v713_v63 = vmul.f32 1.442695, %v657_v42  ;;  %v3339_v40 = vadd.f32 %v3142_v27, %v575_v58  ;;  %v1921_v17 = vpack.c.bf16 %v1553_v48, %v1553_v48 }
 0x139   : > { %v1119_v32 = vsel %vm3305_vm1, %v1118_v12, %v1114_v61  ;;  %v1783_v33 = vadd.f32 %v2344_v37, %v1782_v10  ;;  %v1330_v20 = vsub.f32 0.0, %v3333_v50  ;;  %v642_v29 = vsub.f32 0.0, %v3336_v16  ;;  %v517_v12 = vpop.f32.mrf.mxu2 }
 0x13a   : > { %v2346_v25 = vpop.eup %2345  ;;  %v1120_v21 = vmul.f32 %v1119_v32, %v3161_v49  ;;  %2349 = vpow2.f32 %v713_v63  ;;  %v1315_v43 = vsub.f32 0.0, %v3339_v40  ;;  %1953 = vst.msk [vmem:[%s2717_s17 + $0x1c] sm:$0xf] %vm1273_vm5, %v1921_v17  ;;  %vm886_vm10 = vweird.f32 %v3303_v28  ;;  %v615_v49 = vpop.f32.mrf.mxu3 }
 0x13b   : > { %v2348_v8 = vpop.eup %2347  ;;  %v1787_v4 = vsel %vm1786_vm9, %v2344_v37, %v1783_v33  ;;  %v882_v14 = vmul.f32 %v2346_v25, %v3303_v28  ;;  %v1386_v59 = vmul.f32 1.442695, %v1330_v20  ;;  %v683_v1 = vmul.f32 1.442695, %v642_v29 }
 0x13c   : > { %v1264_v31 = vpack.c.bf16 %v1120_v21, %v1120_v21  ;;  %v1792_v26 = vsel %vm3322_vm6, %v1791_v18, %v1787_v4  ;;  %v3356_v55 = vadd.f32 1.0, %v2348_v8  ;;  %v1356_v57 = vmul.f32 1.442695, %v1315_v43 }
 0x13d   : > { %v1793_v22 = vmul.f32 %v1792_v26, %v3167_v35  ;;  %v883_v36 = vsub.f32 1.0, %v882_v14  ;;  %2351 = vpow2.f32 %v1386_v59  ;;  %vm887_vm11 = vweird.f32 %v2346_v25 }
 0x13e   : > { %1297 = vst.msk [vmem:[%s2705_s14 + $0x5c] sm:$0xf] %vm1273_vm5, %v1264_v31  ;;  %v890_v13 = vand.u32 2147483647, %v3303_v28  ;;  %v892_v56 = vand.u32 2147483648, %v3303_v28  ;;  %2353 = vrcp.f32 %v3356_v55  ;;  %v3365_v34 = vadd.f32 %v3152_v30, %v514_v9  ;;  %vm888_vm12 = vmor %vm886_vm10, %vm887_vm11 }
 0x13f   : > { %v1937_v24 = vpack.c.bf16 %v1793_v22, %v1793_v22  ;;  %v884_v47 = vmul.f32 %v2346_v25, %v883_v36  ;;  %2355 = vpow2.f32 %v683_v1  ;;  %v1563_v44 = vand.u32 2147483647, %v3356_v55 }
 0x140   : > { %v2350_v35 = vpop.eup %2349  ;;  %v1565_v45 = vand.u32 2147483648, %v3356_v55  ;;  %2357 = vpow2.f32 %v1356_v57  ;;  %v658_v39 = vsub.f32 0.0, %v3365_v34  ;;  %v3375_v37 = vadd.f32 %v3142_v27, %v615_v49 }
 0x141   : > { %1969 = vst.msk [vmem:[%s2717_s17 + $0x5c] sm:$0xf] %vm1273_vm5, %v1937_v24  ;;  %v885_v51 = vadd.f32 %v2346_v25, %v884_v47  ;;  %v3371_v53 = vadd.f32 1.0, %v2350_v35  ;;  %v893_v38 = vor.u32 1.1754944e-38, %v892_v56  ;;  %vm891_vm13 = vcmp.eq.f32.partialorder %v890_v13, 8.507059e+37  ;;  %v580_v13 = vpop.f32.mrf.mxu1 }
 0x142   : > { %vm1559_vm14 = vweird.f32 %v3356_v55  ;;  %v1566_v5 = vor.u32 1.1754944e-38, %v1565_v45  ;;  %v715_v62 = vmul.f32 1.442695, %v658_v39  ;;  %vm3386_vm0 = vcmp.eq.f32.partialorder %v1563_v44, 8.507059e+37  ;;  %v618_v42 = vpop.f32.mrf.mxu3 }
 0x143   : > { %v2352_v2 = vpop.eup %2351  ;;  %v889_v11 = vsel %vm888_vm12, %v2346_v25, %v885_v51  ;;  %2359 = vrcp.f32 %v3371_v53  ;;  %v1331_v60 = vsub.f32 0.0, %v3375_v37  ;;  %v3392_v7 = vadd.f32 %v3152_v30, %v477_v0 }
 0x144   : > { %v2354_v3 = vpop.eup %2353  ;;  %v894_v19 = vsel %vm891_vm13, %v893_v38, %v889_v11  ;;  %v3382_v15 = vadd.f32 1.0, %v2352_v2  ;;  %v1130_v10 = vand.u32 2147483647, %v3371_v53  ;;  %v3400_v18 = vadd.f32 %v3152_v30, %v517_v12 }
 0x145   : > { %v2356_v52 = vpop.eup %2355  ;;  %v895_v28 = vmul.f32 %v894_v19, %v3189_v23  ;;  %v1555_v54 = vmul.f32 %v2354_v3, %v3356_v55  ;;  %v3397_v23 = vadd.f32 %v3142_v27, %v578_v46  ;;  %v1132_v17 = vand.u32 2147483648, %v3371_v53 }
 0x146   : > { %v2358_v48 = vpop.eup %2357  ;;  %2361 = vrcp.f32 %v3382_v15  ;;  %v3403_v32 = vadd.f32 1.0, %v2356_v52  ;;  %v1805_v33 = vand.u32 2147483648, %v3382_v15  ;;  %v3409_v9 = vadd.f32 %v3142_v27, %v618_v42 }
 0x147   : > { %v1249_v61 = vpack.c.bf16 %v895_v28, %v895_v28  ;;  %v1556_v63 = vsub.f32 1.0, %v1555_v54  ;;  %v3406_v20 = vadd.f32 1.0, %v2358_v48  ;;  %2363 = vpow2.f32 %v715_v62 }
 0x148   : > { %vm1560_vm15 = vweird.f32 %v2354_v3  ;;  %v1803_v29 = vand.u32 2147483647, %v3382_v15  ;;  %2365 = vrcp.f32 %v3403_v32  ;;  %vm1126_vm1 = vweird.f32 %v3371_v53 }
 0x149   : > { %v2360_v25 = vpop.eup %2359  ;;  %1282 = vst.msk [vmem:[%s2705_s14 + $0x20] sm:$0xf] %vm1273_vm5, %v1249_v61  ;;  %v1557_v21 = vmul.f32 %v2354_v3, %v1556_v63  ;;  %vm3417_vm2 = vcmp.eq.f32.partialorder %v1130_v10, 8.507059e+37  ;;  %v1388_v4 = vmul.f32 1.442695, %v1331_v60  ;;  %v1133_v59 = vor.u32 1.1754944e-38, %v1132_v17  ;;  %vm1561_vm4 = vmor %vm1559_vm14, %vm1560_vm15 }
 0x14a   : > { %v1122_v43 = vmul.f32 %v2360_v25, %v3371_v53  ;;  %vm1799_vm3 = vweird.f32 %v3382_v15  ;;  %2367 = vrcp.f32 %v3406_v20  ;;  %v1806_v26 = vor.u32 1.1754944e-38, %v1805_v33 }
 0x14b   : > { %v1558_v14 = vadd.f32 %v2354_v3, %v1557_v21  ;;  %v905_v1 = vand.u32 2147483647, %v3403_v32  ;;  %v907_v22 = vand.u32 2147483648, %v3403_v32  ;;  %vm1127_vm6 = vweird.f32 %v2360_v25 }
 0x14c   : > { %v2362_v49 = vpop.eup %2361  ;;  %v1123_v31 = vsub.f32 1.0, %v1122_v43  ;;  %vm3428_vm7 = vcmp.eq.f32.partialorder %v1803_v29, 8.507059e+37  ;;  %v1578_v56 = vand.u32 2147483647, %v3406_v20  ;;  %v1580_v35 = vand.u32 2147483648, %v3406_v20  ;;  %vm1128_vm12 = vmor %vm1126_vm1, %vm1127_vm6 }
 0x14d   : > { %v1562_v36 = vsel %vm1561_vm4, %v2354_v3, %v1558_v14  ;;  %v1795_v57 = vmul.f32 %v2362_v49, %v3382_v15  ;;  %v2364_v24 = vpop.eup %2363  ;;  %2369 = vpow2.f32 %v1388_v4  ;;  %vm901_vm8 = vweird.f32 %v3403_v32 }
 0x14e   : > { %v1567_v55 = vsel %vm3386_vm0, %v1566_v5, %v1562_v36  ;;  %v1124_v47 = vmul.f32 %v2360_v25, %v1123_v31  ;;  %v2366_v44 = vpop.eup %2365  ;;  %v3438_v39 = vadd.f32 1.0, %v2364_v24  ;;  %vm1800_vm9 = vweird.f32 %v2362_v49 }
 0x14f   : > { %v1568_v45 = vmul.f32 %v1567_v55, %v3208_v6  ;;  %v1796_v51 = vsub.f32 1.0, %v1795_v57  ;;  %v897_v0 = vmul.f32 %v2366_v44, %v3403_v32  ;;  %vm3441_vm10 = vcmp.eq.f32.partialorder %v905_v1, 8.507059e+37  ;;  %vm1801_vm15 = vmor %vm1799_vm3, %vm1800_vm9  ;;  %v479_v57 = vpop.f32.mrf.mxu0 }
 0x150   : > { %v1125_v38 = vadd.f32 %v2360_v25, %v1124_v47  ;;  %v908_v11 = vor.u32 1.1754944e-38, %v907_v22  ;;  %vm1574_vm11 = vweird.f32 %v3406_v20  ;;  %v2368_v46 = vpop.eup %2367  ;;  %2371 = vrcp.f32 %v3438_v39 }
 0x151   : > { %v1922_v12 = vpack.c.bf16 %v1568_v45, %v1568_v45  ;;  %v1797_v6 = vmul.f32 %v2362_v49, %v1796_v51  ;;  %v643_v3 = vsub.f32 0.0, %v3392_v7  ;;  %v898_v5 = vsub.f32 1.0, %v897_v0  ;;  %v519_v0 = vpop.f32.mrf.mxu2 }
 0x152   : > { %v1129_v19 = vsel %vm1128_vm12, %v2360_v25, %v1125_v38  ;;  %v1570_v62 = vmul.f32 %v2368_v46, %v3406_v20  ;;  %vm3452_vm13 = vcmp.eq.f32.partialorder %v1578_v56, 8.507059e+37  ;;  %v1581_v28 = vor.u32 1.1754944e-38, %v1580_v35 }
 0x153   : > { %1954 = vst.msk [vmem:[%s2717_s17 + $0x20] sm:$0xf] %vm1273_vm5, %v1922_v12  ;;  %v1134_v53 = vsel %vm3417_vm2, %v1133_v59, %v1129_v19  ;;  %v1798_v54 = vadd.f32 %v2362_v49, %v1797_v6  ;;  %vm902_vm14 = vweird.f32 %v2366_v44  ;;  %vm1575_vm0 = vweird.f32 %v2368_v46  ;;  %v2370_v58 = vpop.eup %2369 }
 0x154   : > { %v1135_v60 = vmul.f32 %v1134_v53, %v3229_v41  ;;  %v899_v42 = vmul.f32 %v2366_v44, %v898_v5  ;;  %v1571_v48 = vsub.f32 1.0, %v1570_v62  ;;  %v1145_v10 = vand.u32 2147483647, %v3438_v39  ;;  %vm903_vm1 = vmor %vm901_vm8, %vm902_vm14 }
 0x155   : > { %v1802_v61 = vsel %vm1801_vm15, %v2362_v49, %v1798_v54  ;;  %v1147_v63 = vand.u32 2147483648, %v3438_v39  ;;  %v3466_v17 = vadd.f32 1.0, %v2370_v58  ;;  %v685_v33 = vmul.f32 1.442695, %v643_v3  ;;  %vm1576_vm4 = vmor %vm1574_vm11, %vm1575_vm0 }
 0x156   : > { %v1265_v25 = vpack.c.bf16 %v1135_v60, %v1135_v60  ;;  %v1807_v21 = vsel %vm3428_vm7, %v1806_v26, %v1802_v61  ;;  %v900_v41 = vadd.f32 %v2366_v44, %v899_v42  ;;  %v1572_v29 = vmul.f32 %v2368_v46, %v1571_v48  ;;  %v2372_v43 = vpop.eup %2371 }
 0x157   : > { %v1808_v15 = vmul.f32 %v1807_v21, %v3333_v50  ;;  %vm1141_vm2 = vweird.f32 %v3438_v39  ;;  %2373 = vrcp.f32 %v3466_v17  ;;  %v1316_v8 = vsub.f32 0.0, %v3397_v23 }
 0x158   : > { %1298 = vst.msk [vmem:[%s2705_s14 + $0x60] sm:$0xf] %vm1273_vm5, %v1265_v25  ;;  %v904_v4 = vsel %vm903_vm1, %v2366_v44, %v900_v41  ;;  %v1573_v14 = vadd.f32 %v2368_v46, %v1572_v29  ;;  %v1137_v59 = vmul.f32 %v2372_v43, %v3438_v39  ;;  %vm3480_vm3 = vcmp.eq.f32.partialorder %v1145_v10, 8.507059e+37 }
 0x159   : > { %v1938_v50 = vpack.c.bf16 %v1808_v15, %v1808_v15  ;;  %v909_v32 = vsel %vm3441_vm10, %v908_v11, %v904_v4  ;;  %v1148_v31 = vor.u32 1.1754944e-38, %v1147_v63  ;;  %v1818_v26 = vand.u32 2147483647, %v3466_v17 }
 0x15a   : > { %v910_v1 = vmul.f32 %v909_v32, %v3336_v16  ;;  %v1577_v22 = vsel %vm1576_vm4, %v2368_v46, %v1573_v14  ;;  %v1138_v36 = vsub.f32 1.0, %v1137_v59  ;;  %2375 = vpow2.f32 %v685_v33  ;;  %v620_v33 = vpop.f32.mrf.mxu3 }
 0x15b   : > { %1970 = vst.msk [vmem:[%s2717_s17 + $0x60] sm:$0xf] %vm1273_vm5, %v1938_v50  ;;  %v1582_v56 = vsel %vm3452_vm13, %v1581_v28, %v1577_v22  ;;  %vm1142_vm6 = vweird.f32 %v2372_v43  ;;  %v1358_v24 = vmul.f32 1.442695, %v1316_v8  ;;  %v659_v20 = vsub.f32 0.0, %v3400_v18 }
 0x15c   : > { %v1250_v55 = vpack.c.bf16 %v910_v1, %v910_v1  ;;  %v1583_v47 = vmul.f32 %v1582_v56, %v3339_v40  ;;  %v1139_v35 = vmul.f32 %v2372_v43, %v1138_v36  ;;  %v1332_v16 = vsub.f32 0.0, %v3409_v9  ;;  %vm1143_vm7 = vmor %vm1141_vm2, %vm1142_vm6 }
 0x15d   : > { %v2374_v44 = vpop.eup %2373  ;;  %2377 = vpow2.f32 %v1358_v24  ;;  %v717_v45 = vmul.f32 1.442695, %v659_v20  ;;  %v3499_v51 = vadd.f32 %v3152_v30, %v479_v57  ;;  %v3502_v38 = vadd.f32 %v3142_v27, %v580_v13 }
 0x15e   : > { %1283 = vst.msk [vmem:[%s2705_s14 + $0x24] sm:$0xf] %vm1273_vm5, %v1250_v55  ;;  %v1923_v2 = vpack.c.bf16 %v1583_v47, %v1583_v47  ;;  %v1140_v11 = vadd.f32 %v2372_v43, %v1139_v35  ;;  %v1810_v40 = vmul.f32 %v2374_v44, %v3466_v17  ;;  %v1820_v46 = vand.u32 2147483648, %v3466_v17 }
 0x15f   : > { %2379 = vpow2.f32 %v717_v45  ;;  %v1390_v12 = vmul.f32 1.442695, %v1332_v16  ;;  %v644_v6 = vsub.f32 0.0, %v3499_v51  ;;  %v1317_v3 = vsub.f32 0.0, %v3502_v38 }
 0x160   : > { %v2376_v19 = vpop.eup %2375  ;;  %1955 = vst.msk [vmem:[%s2717_s17 + $0x24] sm:$0xf] %vm1273_vm5, %v1923_v2  ;;  %v1144_v5 = vsel %vm1143_vm7, %v2372_v43, %v1140_v11  ;;  %v1811_v62 = vsub.f32 1.0, %v1810_v40  ;;  %vm1815_vm8 = vweird.f32 %v2374_v44  ;;  %v3516_v52 = vadd.f32 %v3152_v30, %v519_v0 }
 0x161   : > { %v1149_v28 = vsel %vm3480_vm3, %v1148_v31, %v1144_v5  ;;  %v3520_v39 = vadd.f32 1.0, %v2376_v19  ;;  %2381 = vpow2.f32 %v1390_v12  ;;  %v687_v53 = vmul.f32 1.442695, %v644_v6  ;;  %v3662_v6 = vld [vmem:[%s4015_s4] ss:$0 sm:$0xff] }
 0x162   : > { %v1150_v54 = vmul.f32 %v1149_v28, %v3365_v34  ;;  %v1812_v58 = vmul.f32 %v2374_v44, %v1811_v62  ;;  %v1360_v60 = vmul.f32 1.442695, %v1317_v3  ;;  %v660_v42 = vsub.f32 0.0, %v3516_v52 }
 0x163   : > { %v2378_v48 = vpop.eup %2377  ;;  %vm1814_vm9 = vweird.f32 %v3466_v17  ;;  %2383 = vrcp.f32 %v3520_v39  ;;  %vm1819_vm11 = vcmp.eq.f32.partialorder %v1818_v26, 8.507059e+37  ;;  %v1821_v34 = vor.u32 1.1754944e-38, %v1820_v46 }
 0x164   : > { %v1266_v30 = vpack.c.bf16 %v1150_v54, %v1150_v54  ;;  %v1813_v10 = vadd.f32 %v2374_v44, %v1812_v58  ;;  %v3526_v61 = vadd.f32 1.0, %v2378_v48  ;;  %2385 = vpow2.f32 %v687_v53  ;;  %vm1816_vm10 = vmor %vm1814_vm9, %vm1815_vm8 }
 0x165   : > { %v2380_v63 = vpop.eup %2379  ;;  %2387 = vpow2.f32 %v1360_v60  ;;  %v920_v21 = vand.u32 2147483647, %v3520_v39  ;;  %v719_v17 = vmul.f32 1.442695, %v660_v42  ;;  %v922_v43 = vand.u32 2147483648, %v3520_v39 }
 0x166   : > { %1299 = vst.msk [vmem:[%s2705_s14 + $0x64] sm:$0xf] %vm1273_vm5, %v1266_v30  ;;  %v1817_v25 = vsel %vm1816_vm10, %v2374_v44, %v1813_v10  ;;  %2389 = vrcp.f32 %v3526_v61  ;;  %v3534_v15 = vadd.f32 1.0, %v2380_v63  ;;  %v3540_v14 = vadd.f32 %v3142_v27, %v620_v33 }
 0x167   : > { %v2382_v41 = vpop.eup %2381  ;;  %v1822_v29 = vsel %vm1819_vm11, %v1821_v34, %v1817_v25  ;;  %vm916_vm12 = vweird.f32 %v3520_v39  ;;  %v1593_v49 = vand.u32 2147483647, %v3526_v61  ;;  %v1595_v50 = vand.u32 2147483648, %v3526_v61 }
 0x168   : > { %v1823_v8 = vmul.f32 %v1822_v29, %v3375_v37  ;;  %v3537_v4 = vadd.f32 1.0, %v2382_v41  ;;  %2391 = vrcp.f32 %v3534_v15  ;;  %vm3547_vm13 = vcmp.eq.f32.partialorder %v920_v21, 8.507059e+37 }
 0x169   : > { %v2384_v59 = vpop.eup %2383  ;;  %2393 = vpow2.f32 %v719_v17  ;;  %v923_v1 = vor.u32 1.1754944e-38, %v922_v43  ;;  %vm1589_vm14 = vweird.f32 %v3526_v61  ;;  %v1160_v22 = vand.u32 2147483647, %v3534_v15 }
 0x16a   : > { %v2386_v32 = vpop.eup %2385  ;;  %v1939_v31 = vpack.c.bf16 %v1823_v8, %v1823_v8  ;;  %v912_v26 = vmul.f32 %v2384_v59, %v3520_v39  ;;  %2395 = vrcp.f32 %v3537_v4  ;;  %v1162_v13 = vand.u32 2147483648, %v3534_v15 }
 0x16b   : > { %v2388_v27 = vpop.eup %2387  ;;  %v3557_v56 = vadd.f32 1.0, %v2386_v32  ;;  %v1333_v24 = vsub.f32 0.0, %v3540_v14  ;;  %vm3561_vm0 = vcmp.eq.f32.partialorder %v1593_v49, 8.507059e+37  ;;  %v1596_v47 = vor.u32 1.1754944e-38, %v1595_v50  ;;  %v583_v50 = vpop.f32.mrf.mxu1 }
 0x16c   : > { %v2390_v36 = vpop.eup %2389  ;;  %1971 = vst.msk [vmem:[%s2717_s17 + $0x64] sm:$0xf] %vm1273_vm5, %v1939_v31  ;;  %v913_v57 = vsub.f32 1.0, %v912_v26  ;;  %v1835_v35 = vand.u32 2147483648, %v3537_v4  ;;  %v3566_v16 = vadd.f32 1.0, %v2388_v27  ;;  %vm917_vm15 = vweird.f32 %v2384_v59  ;;  %v522_v27 = vpop.f32.mrf.mxu2 }
 0x16d   : > { %v1585_v20 = vmul.f32 %v2390_v36, %v3526_v61  ;;  %v1833_v45 = vand.u32 2147483647, %v3537_v4  ;;  %2397 = vrcp.f32 %v3557_v56  ;;  %vm1156_vm1 = vweird.f32 %v3534_v15  ;;  %vm918_vm4 = vmor %vm916_vm12, %vm917_vm15  ;;  %v482_v61 = vpop.f32.mrf.mxu0 }
 0x16e   : > { %v914_v44 = vmul.f32 %v2384_v59, %v913_v57  ;;  %v2392_v0 = vpop.eup %2391  ;;  %v937_v11 = vand.u32 2147483648, %v3557_v56  ;;  %2399 = vrcp.f32 %v3566_v16  ;;  %vm3574_vm2 = vcmp.eq.f32.partialorder %v1160_v22, 8.507059e+37 }
 0x16f   : > { %v1586_v2 = vsub.f32 1.0, %v1585_v20  ;;  %v2394_v40 = vpop.eup %2393  ;;  %v1152_v12 = vmul.f32 %v2392_v0, %v3534_v15  ;;  %v1163_v3 = vor.u32 1.1754944e-38, %v1162_v13  ;;  %vm1829_vm3 = vweird.f32 %v3537_v4 }
 0x170   : > { %v915_v46 = vadd.f32 %v2384_v59, %v914_v44  ;;  %v2396_v19 = vpop.eup %2395  ;;  %vm1590_vm6 = vweird.f32 %v2390_v36  ;;  %v1836_v62 = vor.u32 1.1754944e-38, %v1835_v35  ;;  %v935_v28 = vand.u32 2147483647, %v3557_v56 }
 0x171   : > { %v1587_v5 = vmul.f32 %v2390_v36, %v1586_v2  ;;  %v1153_v54 = vsub.f32 1.0, %v1152_v12  ;;  %vm1157_vm7 = vweird.f32 %v2392_v0  ;;  %v1825_v58 = vmul.f32 %v2396_v19, %v3537_v4  ;;  %vm1591_vm10 = vmor %vm1589_vm14, %vm1590_vm6 }
 0x172   : > { %v919_v53 = vsel %vm918_vm4, %v2384_v59, %v915_v46  ;;  %vm3584_vm8 = vcmp.eq.f32.partialorder %v1833_v45, 8.507059e+37  ;;  %vm931_vm9 = vweird.f32 %v3557_v56  ;;  %v938_v39 = vor.u32 1.1754944e-38, %v937_v11  ;;  %vm1158_vm14 = vmor %vm1156_vm1, %vm1157_vm7  ;;  %v3646_v46 = vld [vmem:[%s4013_s2] ss:$0 sm:$0xff] }
 0x173   : > { %v924_v42 = vsel %vm3547_vm13, %v923_v1, %v919_v53  ;;  %v1588_v48 = vadd.f32 %v2390_v36, %v1587_v5  ;;  %v1608_v30 = vand.u32 2147483647, %v3566_v16  ;;  %v2398_v10 = vpop.eup %2397  ;;  %v1154_v34 = vmul.f32 %v2392_v0, %v1153_v54  ;;  %v623_v5 = vpop.f32.mrf.mxu3 }
 0x174   : > { %v925_v63 = vmul.f32 %v924_v42, %v3392_v7  ;;  %v1826_v33 = vsub.f32 1.0, %v1825_v58  ;;  %v3596_v25 = vadd.f32 1.0, %v2394_v40  ;;  %v3598_v21 = vpop.eup %2399  ;;  %vm1830_vm11 = vweird.f32 %v2396_v19 }
 0x175   : > { %v1592_v17 = vsel %vm1591_vm10, %v2390_v36, %v1588_v48  ;;  %v927_v41 = vmul.f32 %v2398_v10, %v3557_v56  ;;  %vm3601_vm12 = vcmp.eq.f32.partialorder %v935_v28, 8.507059e+37  ;;  %vm1604_vm13 = vweird.f32 %v3566_v16  ;;  %vm1831_vm1 = vmor %vm1829_vm3, %vm1830_vm11  ;;  %v585_v48 = vpop.f32.mrf.mxu1 }
 0x176   : > { %v1610_v7 = vand.u32 2147483648, %v3566_v16  ;;  %v1251_v43 = vpack.c.bf16 %v925_v63, %v925_v63  ;;  %v1597_v8 = vsel %vm3561_vm0, %v1596_v47, %v1592_v17  ;;  %v1155_v59 = vadd.f32 %v2392_v0, %v1154_v34  ;;  %v524_v63 = vpop.f32.mrf.mxu2 }
 0x177   : > { %v1827_v49 = vmul.f32 %v2396_v19, %v1826_v33  ;;  %v1598_v32 = vmul.f32 %v1597_v8, %v3397_v23  ;;  %v928_v31 = vsub.f32 1.0, %v927_v41  ;;  %v1600_v26 = vmul.f32 %v3598_v21, %v3566_v16  ;;  %v484_v16 = vpop.f32.mrf.mxu0 }
 0x178   : > { %vm3615_vm15 = vcmp.eq.f32.partialorder %v1608_v30, 8.507059e+37  ;;  %1284 = vst.msk [vmem:[%s2705_s14 + $0x28] sm:$0xf] %vm1273_vm5, %v1251_v43  ;;  %v1159_v1 = vsel %vm1158_vm14, %v2392_v0, %v1155_v59  ;;  %vm932_vm0 = vweird.f32 %v2398_v10  ;;  %2401 = vrcp.f32 %v3596_v25 }
 0x179   : > { %v1828_v22 = vadd.f32 %v2396_v19, %v1827_v49  ;;  %v1924_v23 = vpack.c.bf16 %v1598_v32, %v1598_v32  ;;  %v1164_v15 = vsel %vm3574_vm2, %v1163_v3, %v1159_v1  ;;  %v929_v36 = vmul.f32 %v2398_v10, %v928_v31  ;;  %vm933_vm2 = vmor %vm931_vm9, %vm932_vm0 }
 0x17a   : > { %v1601_v57 = vsub.f32 1.0, %v1600_v26  ;;  %v1165_v13 = vmul.f32 %v1164_v15, %v3400_v18  ;;  %vm1605_vm4 = vweird.f32 %v3598_v21  ;;  %v1611_v55 = vor.u32 1.1754944e-38, %v1610_v7 }
 0x17b   : > { %v1832_v20 = vsel %vm1831_vm1, %v2396_v19, %v1828_v22  ;;  %1956 = vst.msk [vmem:[%s2717_s17 + $0x28] sm:$0xf] %vm1273_vm5, %v1924_v23  ;;  %v930_v35 = vadd.f32 %v2398_v10, %v929_v36  ;;  %v1392_v4 = vmul.f32 1.442695, %v1333_v24  ;;  %v1175_v18 = vand.u32 2147483647, %v3596_v25  ;;  %vm1606_vm3 = vmor %vm1604_vm13, %vm1605_vm4  ;;  %v625_v15 = vpop.f32.mrf.mxu3 }
 0x17c   : > { %v1837_v47 = vsel %vm3584_vm8, %v1836_v62, %v1832_v20  ;;  %v1602_v44 = vmul.f32 %v3598_v21, %v1601_v57  ;;  %v1267_v45 = vpack.c.bf16 %v1165_v13, %v1165_v13  ;;  %v1177_v2 = vand.u32 2147483648, %v3596_v25 }
 0x17d   : > { %v1838_v0 = vmul.f32 %v1837_v47, %v3409_v9  ;;  %v934_v11 = vsel %vm933_vm2, %v2398_v10, %v930_v35  ;;  %2403 = vpow2.f32 %v1392_v4  ;;  %v3649_v9 = vadd.f32 %v3646_v46, %v482_v61  ;;  %v588_v35 = vpop.f32.mrf.mxu1 }
 0x17e   : > { %v1603_v40 = vadd.f32 %v3598_v21, %v1602_v44  ;;  %v2402_v24 = vpop.eup %2401  ;;  %1300 = vst.msk [vmem:[%s2705_s14 + $0x68] sm:$0xf] %vm1273_vm5, %v1267_v45  ;;  %v939_v12 = vsel %vm3601_vm12, %v938_v39, %v934_v11  ;;  %v3665_v3 = vadd.f32 %v3662_v6, %v583_v50  ;;  %v3668_v19 = vadd.f32 %v3646_v46, %v522_v27  ;;  %v527_v44 = vpop.f32.mrf.mxu2 }
 0x17f   : > { %v1940_v56 = vpack.c.bf16 %v1838_v0, %v1838_v0  ;;  %v940_v62 = vmul.f32 %v939_v12, %v3499_v51  ;;  %v1167_v53 = vmul.f32 %v2402_v24, %v3596_v25  ;;  %vm1172_vm6 = vweird.f32 %v2402_v24  ;;  %v487_v57 = vpop.f32.mrf.mxu0 }
 0x180   : > { %v1607_v28 = vsel %vm1606_vm3, %v3598_v21, %v1603_v40  ;;  %v645_v58 = vsub.f32 0.0, %v3649_v9  ;;  %v1318_v60 = vsub.f32 0.0, %v3665_v3  ;;  %v661_v42 = vsub.f32 0.0, %v3668_v19 }
 0x181   : > { %1972 = vst.msk [vmem:[%s2717_s17 + $0x68] sm:$0xf] %vm1273_vm5, %v1940_v56  ;;  %v1612_v54 = vsel %vm3615_vm15, %v1611_v55, %v1607_v28  ;;  %v1252_v51 = vpack.c.bf16 %v940_v62, %v940_v62  ;;  %v1168_v30 = vsub.f32 1.0, %v1167_v53  ;;  %v3682_v10 = vadd.f32 %v3662_v6, %v623_v5 }
 0x182   : > { %v1613_v39 = vmul.f32 %v1612_v54, %v3502_v38  ;;  %v689_v34 = vmul.f32 1.442695, %v645_v58  ;;  %v1362_v33 = vmul.f32 1.442695, %v1318_v60  ;;  %v721_v21 = vmul.f32 1.442695, %v661_v42 }
 0x183   : > { %v3685_v17 = vadd.f32 %v3646_v46, %v484_v16  ;;  %v2404_v41 = vpop.eup %2403  ;;  %1285 = vst.msk [vmem:[%s2705_s14 + $0x2c] sm:$0xf] %vm1273_vm5, %v1252_v51  ;;  %v1169_v7 = vmul.f32 %v2402_v24, %v1168_v30  ;;  %v1334_v61 = vsub.f32 0.0, %v3682_v10  ;;  %v3691_v38 = vadd.f32 %v3662_v6, %v585_v48 }
 0x184   : > { %v1925_v29 = vpack.c.bf16 %v1613_v39, %v1613_v39  ;;  %vm1171_vm7 = vweird.f32 %v3596_v25  ;;  %v3694_v43 = vadd.f32 1.0, %v2404_v41  ;;  %2405 = vpow2.f32 %v689_v34 }
 0x185   : > { %v646_v8 = vsub.f32 0.0, %v3685_v17  ;;  %v1170_v59 = vadd.f32 %v2402_v24, %v1169_v7  ;;  %2407 = vpow2.f32 %v1362_v33  ;;  %v1394_v49 = vmul.f32 1.442695, %v1334_v61  ;;  %vm1173_vm8 = vmor %vm1171_vm7, %vm1172_vm6 }
 0x186   : > { %1957 = vst.msk [vmem:[%s2717_s17 + $0x2c] sm:$0xf] %vm1273_vm5, %v1925_v29  ;;  %v1319_v50 = vsub.f32 0.0, %v3691_v38  ;;  %vm1176_vm9 = vcmp.eq.f32.partialorder %v1175_v18, 8.507059e+37  ;;  %v1178_v32 = vor.u32 1.1754944e-38, %v1177_v2  ;;  %2409 = vrcp.f32 %v3694_v43 }
 0x187   : > { %v1174_v31 = vsel %vm1173_vm8, %v2402_v24, %v1170_v59  ;;  %2411 = vpow2.f32 %v721_v21  ;;  %v691_v25 = vmul.f32 1.442695, %v646_v8  ;;  %v3703_v26 = vadd.f32 %v3646_v46, %v524_v63 }
 0x188   : > { %v1179_v37 = vsel %vm1176_vm9, %v1178_v32, %v1174_v31  ;;  %2413 = vpow2.f32 %v1394_v49  ;;  %v1364_v27 = vmul.f32 1.442695, %v1319_v50  ;;  %v1848_v22 = vand.u32 2147483647, %v3694_v43 }
 0x189   : > { %v1180_v1 = vmul.f32 %v1179_v37, %v3516_v52  ;;  %v1850_v23 = vand.u32 2147483648, %v3694_v43  ;;  %2415 = vpow2.f32 %v691_v25  ;;  %v662_v47 = vsub.f32 0.0, %v3703_v26 }
 0x18a   : > { %v2406_v36 = vpop.eup %2405  ;;  %vm1844_vm10 = vweird.f32 %v3694_v43  ;;  %2417 = vpow2.f32 %v1364_v27  ;;  %v3715_v45 = vadd.f32 %v3662_v6, %v625_v15  ;;  %vm3720_vm11 = vcmp.eq.f32.partialorder %v1848_v22, 8.507059e+37 }
 0x18b   : > { %v2408_v13 = vpop.eup %2407  ;;  %v1268_v20 = vpack.c.bf16 %v1180_v1, %v1180_v1  ;;  %v3708_v55 = vadd.f32 1.0, %v2406_v36  ;;  %v1851_v11 = vor.u32 1.1754944e-38, %v1850_v23  ;;  %v3727_v24 = vadd.f32 %v3646_v46, %v487_v57 }
 0x18c   : > { %v2410_v4 = vpop.eup %2409  ;;  %v3712_v52 = vadd.f32 1.0, %v2408_v13  ;;  %v3730_v56 = vadd.f32 %v3662_v6, %v588_v35  ;;  %v3733_v12 = vadd.f32 %v3646_v46, %v527_v44  ;;  %v723_v16 = vmul.f32 1.442695, %v662_v47 }
 0x18d   : > { %v2412_v0 = vpop.eup %2411  ;;  %1301 = vst.msk [vmem:[%s2705_s14 + $0x6c] sm:$0xf] %vm1273_vm5, %v1268_v20  ;;  %v1840_v18 = vmul.f32 %v2410_v4, %v3694_v43  ;;  %2419 = vrcp.f32 %v3708_v55  ;;  %v952_v28 = vand.u32 2147483648, %v3708_v55  ;;  %v950_v54 = vand.u32 2147483647, %v3708_v55 }
 0x18e   : > { %v2414_v40 = vpop.eup %2413  ;;  %2421 = vrcp.f32 %v3712_v52  ;;  %v3736_v53 = vadd.f32 1.0, %v2412_v0  ;;  %v1625_v58 = vand.u32 2147483648, %v3712_v52  ;;  %v1335_v42 = vsub.f32 0.0, %v3715_v45 }
 0x18f   : > { %v2416_v5 = vpop.eup %2415  ;;  %v1841_v62 = vsub.f32 1.0, %v1840_v18  ;;  %v3740_v60 = vadd.f32 1.0, %v2414_v40  ;;  %vm1845_vm12 = vweird.f32 %v2410_v4  ;;  %v1623_v51 = vand.u32 2147483647, %v3712_v52 }
 0x190   : > { %2423 = vrcp.f32 %v3736_v53  ;;  %v2418_v39 = vpop.eup %2417  ;;  %v3746_v30 = vadd.f32 1.0, %v2416_v5  ;;  %v647_v63 = vsub.f32 0.0, %v3727_v24  ;;  %v1320_v34 = vsub.f32 0.0, %v3730_v56  ;;  %vm1846_vm15 = vmor %vm1844_vm10, %vm1845_vm12 }
 0x191   : > { %v1842_v48 = vmul.f32 %v2410_v4, %v1841_v62  ;;  %2425 = vrcp.f32 %v3740_v60  ;;  %vm946_vm13 = vweird.f32 %v3708_v55  ;;  %v953_v41 = vor.u32 1.1754944e-38, %v952_v28 }
 0x192   : > { %vm1619_vm14 = vweird.f32 %v3712_v52  ;;  %vm3755_vm0 = vcmp.eq.f32.partialorder %v950_v54, 8.507059e+37  ;;  %v1626_v8 = vor.u32 1.1754944e-38, %v1625_v58  ;;  %v1190_v59 = vand.u32 2147483647, %v3736_v53 }
 0x193   : > { %v2420_v33 = vpop.eup %2419  ;;  %v1843_v21 = vadd.f32 %v2410_v4, %v1842_v48  ;;  %v1192_v49 = vand.u32 2147483648, %v3736_v53  ;;  %vm3762_vm1 = vcmp.eq.f32.partialorder %v1623_v51, 8.507059e+37  ;;  %v1863_v43 = vand.u32 2147483647, %v3740_v60 }
 0x194   : > { %v2422_v29 = vpop.eup %2421  ;;  %v942_v7 = vmul.f32 %v2420_v33, %v3708_v55  ;;  %v1865_v25 = vand.u32 2147483648, %v3740_v60  ;;  %vm1186_vm4 = vweird.f32 %v3736_v53  ;;  %2427 = vrcp.f32 %v3746_v30 }
 0x195   : > { %v1847_v50 = vsel %vm1846_vm15, %v2410_v4, %v1843_v21  ;;  %v1615_v32 = vmul.f32 %v2422_v29, %v3712_v52  ;;  %vm947_vm2 = vweird.f32 %v2420_v33  ;;  %vm1859_vm3 = vweird.f32 %v3740_v60 }
 0x196   : > { %v1852_v37 = vsel %vm3720_vm11, %v1851_v11, %v1847_v50  ;;  %v943_v27 = vsub.f32 1.0, %v942_v7  ;;  %v2424_v1 = vpop.eup %2423  ;;  %vm1620_vm6 = vweird.f32 %v2422_v29  ;;  %vm3775_vm7 = vcmp.eq.f32.partialorder %v1190_v59, 8.507059e+37  ;;  %vm948_vm10 = vmor %vm946_vm13, %vm947_vm2 }
 0x197   : > { %v1853_v22 = vmul.f32 %v1852_v37, %v3540_v14  ;;  %v1616_v23 = vsub.f32 1.0, %v1615_v32  ;;  %v2426_v15 = vpop.eup %2425  ;;  %v1182_v57 = vmul.f32 %v2424_v1, %v3736_v53  ;;  %v1193_v20 = vor.u32 1.1754944e-38, %v1192_v49  ;;  %vm1621_vm11 = vmor %vm1619_vm14, %vm1620_vm6  ;;  %v628_v37 = vpop.f32.mrf.mxu3 }
 0x198   : > { %v944_v36 = vmul.f32 %v2420_v33, %v943_v27  ;;  %v1855_v44 = vmul.f32 %v2426_v15, %v3740_v60  ;;  %vm3780_vm8 = vcmp.eq.f32.partialorder %v1863_v43, 8.507059e+37  ;;  %v1866_v4 = vor.u32 1.1754944e-38, %v1865_v25 }
 0x199   : > { %v1941_v47 = vpack.c.bf16 %v1853_v22, %v1853_v22  ;;  %v1617_v35 = vmul.f32 %v2422_v29, %v1616_v23  ;;  %v1183_v18 = vsub.f32 1.0, %v1182_v57  ;;  %vm1187_vm9 = vweird.f32 %v2424_v1 }
 0x19a   : > { %v945_v0 = vadd.f32 %v2420_v33, %v944_v36  ;;  %v965_v2 = vand.u32 2147483647, %v3746_v30  ;;  %v1856_v40 = vsub.f32 1.0, %v1855_v44  ;;  %v3790_v5 = vadd.f32 1.0, %v2418_v39  ;;  %v2428_v62 = vpop.eup %2427  ;;  %vm1188_vm13 = vmor %vm1186_vm4, %vm1187_vm9  ;;  %v489_v36 = vpop.f32.mrf.mxu0 }
 0x19b   : > { %1973 = vst.msk [vmem:[%s2717_s17 + $0x6c] sm:$0xf] %vm1273_vm5, %v1941_v47  ;;  %v1618_v11 = vadd.f32 %v2422_v29, %v1617_v35  ;;  %2429 = vpow2.f32 %v723_v16  ;;  %v1184_v54 = vmul.f32 %v2424_v1, %v1183_v18  ;;  %vm1860_vm12 = vweird.f32 %v2426_v15 }
 0x19c   : > { %v949_v28 = vsel %vm948_vm10, %v2420_v33, %v945_v0  ;;  %v967_v58 = vand.u32 2147483648, %v3746_v30  ;;  %v1857_v51 = vmul.f32 %v2426_v15, %v1856_v40  ;;  %v957_v21 = vmul.f32 %v2428_v62, %v3746_v30  ;;  %vm1861_vm14 = vmor %vm1859_vm3, %vm1860_vm12 }
 0x19d   : > { %v954_v48 = vsel %vm3755_vm0, %v953_v41, %v949_v28  ;;  %v1622_v55 = vsel %vm1621_vm11, %v2422_v29, %v1618_v11  ;;  %v1185_v33 = vadd.f32 %v2424_v1, %v1184_v54  ;;  %v1396_v52 = vmul.f32 1.442695, %v1335_v42 }
 0x19e   : > { %v955_v39 = vmul.f32 %v954_v48, %v3649_v9  ;;  %v1627_v16 = vsel %vm3762_vm1, %v1626_v8, %v1622_v55  ;;  %v1858_v41 = vadd.f32 %v2426_v15, %v1857_v51  ;;  %v958_v29 = vsub.f32 1.0, %v957_v21  ;;  %v529_v48 = vpop.f32.mrf.mxu2 }
 0x19f   : > { %v1628_v7 = vmul.f32 %v1627_v16, %v3665_v3  ;;  %2431 = vrcp.f32 %v3790_v5  ;;  %v1189_v61 = vsel %vm1188_vm13, %v2424_v1, %v1185_v33  ;;  %vm962_vm15 = vweird.f32 %v2428_v62 }
 0x1a0   : > { %v1253_v9 = vpack.c.bf16 %v955_v39, %v955_v39  ;;  %v693_v42 = vmul.f32 1.442695, %v647_v63  ;;  %v1194_v53 = vsel %vm3775_vm7, %v1193_v20, %v1189_v61  ;;  %v1862_v59 = vsel %vm1861_vm14, %v2426_v15, %v1858_v41  ;;  %v590_v20 = vpop.f32.mrf.mxu1  ;;  %v630_v61 = vpop.f32.mrf.mxu3 }
 0x1a1   : > { %v2430_v3 = vpop.eup %2429  ;;  %v1926_v8 = vpack.c.bf16 %v1628_v7, %v1628_v7  ;;  %v959_v49 = vmul.f32 %v2428_v62, %v958_v29  ;;  %v1195_v50 = vmul.f32 %v1194_v53, %v3668_v19  ;;  %v1867_v32 = vsel %vm3780_vm8, %v1866_v4, %v1862_v59 }
 0x1a2   : > { %1286 = vst.msk [vmem:[%s2705_s14 + $0x30] sm:$0xf] %vm1273_vm5, %v1253_v9  ;;  %vm961_vm0 = vweird.f32 %v3746_v30  ;;  %v663_v60 = vsub.f32 0.0, %v3733_v12  ;;  %v1868_v63 = vmul.f32 %v1867_v32, %v3682_v10  ;;  %v3826_v43 = vadd.f32 1.0, %v2430_v3 }
 0x1a3   : > { %1958 = vst.msk [vmem:[%s2717_s17 + $0x30] sm:$0xf] %vm1273_vm5, %v1926_v8  ;;  %v960_v31 = vadd.f32 %v2428_v62, %v959_v49  ;;  %2433 = vpow2.f32 %v1396_v52  ;;  %v1269_v25 = vpack.c.bf16 %v1195_v50, %v1195_v50  ;;  %vm963_vm1 = vmor %vm961_vm0, %vm962_vm15  ;;  %v968_v19 = vor.u32 1.1754944e-38, %v967_v58 }
 0x1a4   : > { %2435 = vpow2.f32 %v693_v42  ;;  %v1366_v30 = vmul.f32 1.442695, %v1320_v34  ;;  %v1942_v1 = vpack.c.bf16 %v1868_v63, %v1868_v63  ;;  %vm966_vm4 = vcmp.eq.f32.partialorder %v965_v2, 8.507059e+37 }
 0x1a5   : > { %v2432_v27 = vpop.eup %2431  ;;  %v964_v22 = vsel %vm963_vm1, %v2428_v62, %v960_v31  ;;  %2437 = vrcp.f32 %v3826_v43  ;;  %1302 = vst.msk [vmem:[%s2705_s14 + $0x70] sm:$0xf] %vm1273_vm5, %v1269_v25  ;;  %v1638_v15 = vand.u32 2147483647, %v3790_v5  ;;  %v1640_v34 = vand.u32 2147483648, %v3790_v5 }
 0x1a6   : > { %v969_v10 = vsel %vm966_vm4, %v968_v19, %v964_v22  ;;  %v1630_v23 = vmul.f32 %v2432_v27, %v3790_v5  ;;  %1974 = vst.msk [vmem:[%s2717_s17 + $0x70] sm:$0xf] %vm1273_vm5, %v1942_v1  ;;  %2439 = vpow2.f32 %v1366_v30  ;;  %v725_v13 = vmul.f32 1.442695, %v663_v60 }
 0x1a7   : > { %v970_v57 = vmul.f32 %v969_v10, %v3685_v17  ;;  %vm1634_vm2 = vweird.f32 %v3790_v5  ;;  %v1205_v35 = vand.u32 2147483647, %v3826_v43  ;;  %v1207_v44 = vand.u32 2147483648, %v3826_v43 }
 0x1a8   : > { %v1631_v47 = vsub.f32 1.0, %v1630_v23  ;;  %2441 = vpow2.f32 %v725_v13  ;;  %v3844_v0 = vadd.f32 %v3662_v6, %v628_v37  ;;  %v3847_v17 = vadd.f32 %v3646_v46, %v489_v36 }
 0x1a9   : > { %v2434_v14 = vpop.eup %2433  ;;  %v1254_v4 = vpack.c.bf16 %v970_v57, %v970_v57  ;;  %vm1635_vm3 = vweird.f32 %v2432_v27  ;;  %v3852_v40 = vadd.f32 %v3662_v6, %v590_v20  ;;  %vm3856_vm6 = vcmp.eq.f32.partialorder %v1638_v15, 8.507059e+37 }
 0x1aa   : > { %v2436_v18 = vpop.eup %2435  ;;  %v1632_v2 = vmul.f32 %v2432_v27, %v1631_v47  ;;  %v3849_v11 = vadd.f32 1.0, %v2434_v14  ;;  %v1641_v54 = vor.u32 1.1754944e-38, %v1640_v34  ;;  %vm1201_vm7 = vweird.f32 %v3826_v43  ;;  %vm1636_vm9 = vmor %vm1634_vm2, %vm1635_vm3 }
 0x1ab   : > { %v2438_v62 = vpop.eup %2437  ;;  %1287 = vst.msk [vmem:[%s2705_s14 + $0x34] sm:$0xf] %vm1273_vm5, %v1254_v4  ;;  %v3861_v58 = vadd.f32 1.0, %v2436_v18  ;;  %vm3864_vm8 = vcmp.eq.f32.partialorder %v1205_v35, 8.507059e+37  ;;  %v1208_v16 = vor.u32 1.1754944e-38, %v1207_v44  ;;  %v1336_v33 = vsub.f32 0.0, %v3844_v0 }
 0x1ac   : > { %v1633_v55 = vadd.f32 %v2432_v27, %v1632_v2  ;;  %v1197_v51 = vmul.f32 %v2438_v62, %v3826_v43  ;;  %2443 = vrcp.f32 %v3849_v11  ;;  %v2440_v39 = vpop.eup %2439  ;;  %v648_v52 = vsub.f32 0.0, %v3847_v17 }
 0x1ad   : > { %2445 = vrcp.f32 %v3861_v58  ;;  %v1321_v29 = vsub.f32 0.0, %v3852_v40  ;;  %v3877_v9 = vadd.f32 %v3646_v46, %v529_v48  ;;  %vm1202_vm10 = vweird.f32 %v2438_v62 }
 0x1ae   : > { %v1637_v7 = vsel %vm1636_vm9, %v2432_v27, %v1633_v55  ;;  %v1198_v41 = vsub.f32 1.0, %v1197_v51  ;;  %v2442_v42 = vpop.eup %2441  ;;  %v1878_v3 = vand.u32 2147483647, %v3849_v11  ;;  %v1880_v8 = vand.u32 2147483648, %v3849_v11  ;;  %vm1203_vm13 = vmor %vm1201_vm7, %vm1202_vm10 }
 0x1af   : > { %v1642_v5 = vsel %vm3856_vm6, %v1641_v54, %v1637_v7  ;;  %v980_v49 = vand.u32 2147483647, %v3861_v58  ;;  %v3885_v50 = vadd.f32 1.0, %v2440_v39  ;;  %vm1874_vm11 = vweird.f32 %v3849_v11 }
 0x1b0   : > { %v1643_v53 = vmul.f32 %v1642_v5, %v3691_v38  ;;  %v1199_v59 = vmul.f32 %v2438_v62, %v1198_v41  ;;  %v982_v46 = vand.u32 2147483648, %v3861_v58  ;;  %v3889_v32 = vadd.f32 1.0, %v2442_v42 }
 0x1b1   : > { %v3892_v60 = vadd.f32 %v3662_v6, %v630_v61  ;;  %vm976_vm12 = vweird.f32 %v3861_v58  ;;  %2447 = vrcp.f32 %v3885_v50  ;;  %vm3900_vm14 = vcmp.eq.f32.partialorder %v1878_v3, 8.507059e+37 }
 0x1b2   : > { %v2444_v63 = vpop.eup %2443  ;;  %v1927_v31 = vpack.c.bf16 %v1643_v53, %v1643_v53  ;;  %v1200_v25 = vadd.f32 %v2438_v62, %v1199_v59  ;;  %v1881_v6 = vor.u32 1.1754944e-38, %v1880_v8  ;;  %v1398_v37 = vmul.f32 1.442695, %v1336_v33 }
 0x1b3   : > { %v2446_v38 = vpop.eup %2445  ;;  %v1870_v19 = vmul.f32 %v2444_v63, %v3849_v11  ;;  %vm3907_vm15 = vcmp.eq.f32.partialorder %v980_v49, 8.507059e+37  ;;  %2449 = vrcp.f32 %v3889_v32  ;;  %v695_v43 = vmul.f32 1.442695, %v648_v52 }
 0x1b4   : > { %1959 = vst.msk [vmem:[%s2717_s17 + $0x34] sm:$0xf] %vm1273_vm5, %v1927_v31  ;;  %v1204_v27 = vsel %vm1203_vm13, %v2438_v62, %v1200_v25  ;;  %v972_v1 = vmul.f32 %v2446_v38, %v3861_v58  ;;  %v983_v15 = vor.u32 1.1754944e-38, %v982_v46  ;;  %v1653_v36 = vand.u32 2147483647, %v3885_v50 }
 0x1b5   : > { %v1209_v10 = vsel %vm3864_vm8, %v1208_v16, %v1204_v27  ;;  %v1871_v23 = vsub.f32 1.0, %v1870_v19  ;;  %vm1875_vm0 = vweird.f32 %v2444_v63  ;;  %vm1649_vm1 = vweird.f32 %v3885_v50 }
 0x1b6   : > { %v1210_v57 = vmul.f32 %v1209_v10, %v3703_v26  ;;  %v973_v34 = vsub.f32 1.0, %v972_v1  ;;  %v1655_v20 = vand.u32 2147483648, %v3885_v50  ;;  %2451 = vpow2.f32 %v1398_v37  ;;  %vm1876_vm3 = vmor %vm1874_vm11, %vm1875_vm0 }
 0x1b7   : > { %v1872_v13 = vmul.f32 %v2444_v63, %v1871_v23  ;;  %v1368_v47 = vmul.f32 1.442695, %v1321_v29  ;;  %v2448_v35 = vpop.eup %2447  ;;  %vm977_vm4 = vweird.f32 %v2446_v38  ;;  %2453 = vpow2.f32 %v695_v43 }
 0x1b8   : > { %v1270_v44 = vpack.c.bf16 %v1210_v57, %v1210_v57  ;;  %v974_v14 = vmul.f32 %v2446_v38, %v973_v34  ;;  %v1645_v18 = vmul.f32 %v2448_v35, %v3885_v50  ;;  %vm3919_vm2 = vcmp.eq.f32.partialorder %v1653_v36, 8.507059e+37  ;;  %vm978_vm7 = vmor %vm976_vm12, %vm977_vm4 }
 0x1b9   : > { %v1873_v4 = vadd.f32 %v2444_v63, %v1872_v13  ;;  %v1220_v2 = vand.u32 2147483647, %v3889_v32  ;;  %v2450_v62 = vpop.eup %2449  ;;  %vm1650_vm6 = vweird.f32 %v2448_v35  ;;  %v1222_v54 = vand.u32 2147483648, %v3889_v32 }
 0x1ba   : > { %1303 = vst.msk [vmem:[%s2705_s14 + $0x74] sm:$0xf] %vm1273_vm5, %v1270_v44  ;;  %v975_v28 = vadd.f32 %v2446_v38, %v974_v14  ;;  %v664_v48 = vsub.f32 0.0, %v3877_v9  ;;  %v1646_v51 = vsub.f32 1.0, %v1645_v18  ;;  %v1212_v21 = vmul.f32 %v2450_v62, %v3889_v32  ;;  %vm1651_vm9 = vmor %vm1649_vm1, %vm1650_vm6 }
 0x1bb   : > { %v1877_v55 = vsel %vm1876_vm3, %v2444_v63, %v1873_v4  ;;  %2455 = vpow2.f32 %v1368_v47  ;;  %v1337_v33 = vsub.f32 0.0, %v3892_v60  ;;  %vm1217_vm8 = vweird.f32 %v2450_v62 }
 0x1bc   : > { %v1882_v39 = vsel %vm3900_vm14, %v1881_v6, %v1877_v55  ;;  %v979_v16 = vsel %vm978_vm7, %v2446_v38, %v975_v28  ;;  %v727_v11 = vmul.f32 1.442695, %v664_v48  ;;  %v2452_v52 = vpop.eup %2451  ;;  %v1647_v29 = vmul.f32 %v2448_v35, %v1646_v51 }
 0x1bd   : > { %v1883_v7 = vmul.f32 %v1882_v39, %v3715_v45  ;;  %v984_v41 = vsel %vm3907_vm15, %v983_v15, %v979_v16  ;;  %v1213_v58 = vsub.f32 1.0, %v1212_v21  ;;  %v2454_v61 = vpop.eup %2453  ;;  %v1432_v5 = vadd.f32 1.0, %v2452_v52 }
 0x1be   : > { %v985_v42 = vmul.f32 %v984_v41, %v3727_v24  ;;  %2457 = vpow2.f32 %v727_v11  ;;  %v1648_v8 = vadd.f32 %v2448_v35, %v1647_v29  ;;  %v3941_v59 = vadd.f32 1.0, %v2454_v61 }
 0x1bf   : > { %v1943_v3 = vpack.c.bf16 %v1883_v7, %v1883_v7  ;;  %v1214_v53 = vmul.f32 %v2450_v62, %v1213_v58  ;;  %v1656_v45 = vor.u32 1.1754944e-38, %v1655_v20  ;;  %2459 = vrcp.f32 %v1432_v5 }
 0x1c0   : > { %v1255_v49 = vpack.c.bf16 %v985_v42, %v985_v42  ;;  %v1400_v46 = vmul.f32 1.442695, %v1337_v33  ;;  %v1652_v24 = vsel %vm1651_vm9, %v2448_v35, %v1648_v8  ;;  %vm1216_vm10 = vweird.f32 %v3889_v32 }
 0x1c1   : > { %v2456_v63 = vpop.eup %2455  ;;  %1975 = vst.msk [vmem:[%s2717_s17 + $0x74] sm:$0xf] %vm1273_vm5, %v1943_v3  ;;  %v1215_v31 = vadd.f32 %v2450_v62, %v1214_v53  ;;  %2461 = vrcp.f32 %v3941_v59  ;;  %v1657_v25 = vsel %vm3919_vm2, %v1656_v45, %v1652_v24  ;;  %vm1218_vm11 = vmor %vm1216_vm10, %vm1217_vm8  ;;  %v1223_v50 = vor.u32 1.1754944e-38, %v1222_v54 }
 0x1c2   : > { %1288 = vst.msk [vmem:[%s2705_s14 + $0x38] sm:$0xf] %vm1273_vm5, %v1255_v49  ;;  %v1658_v38 = vmul.f32 %v1657_v25, %v3730_v56  ;;  %vm1221_vm12 = vcmp.eq.f32.partialorder %v1220_v2, 8.507059e+37  ;;  %v3956_v37 = vadd.f32 1.0, %v2456_v63  ;;  %2463 = vpow2.f32 %v1400_v46 }
 0x1c3   : > { %v1219_v19 = vsel %vm1218_vm11, %v2450_v62, %v1215_v31  ;;  %v1893_v23 = vand.u32 2147483647, %v1432_v5  ;;  %v1895_v57 = vand.u32 2147483648, %v1432_v5  ;;  %v995_v13 = vand.u32 2147483647, %v3941_v59 }
 0x1c4   : > { %v2458_v30 = vpop.eup %2457  ;;  %v1224_v6 = vsel %vm1221_vm12, %v1223_v50, %v1219_v19  ;;  %v1928_v32 = vpack.c.bf16 %v1658_v38, %v1658_v38  ;;  %2465 = vrcp.f32 %v3956_v37  ;;  %v997_v20 = vand.u32 2147483648, %v3941_v59 }
 0x1c5   : > { %v1225_v27 = vmul.f32 %v1224_v6, %v3733_v12  ;;  %v3959_v1 = vadd.f32 1.0, %v2458_v30  ;;  %v2460_v22 = vpop.eup %2459  ;;  %vm1889_vm13 = vweird.f32 %v1432_v5  ;;  %vm3972_vm15 = vcmp.eq.f32.partialorder %v1893_v23, 8.507059e+37 }
 0x1c6   : > { %1960 = vst.msk [vmem:[%s2717_s17 + $0x38] sm:$0xf] %vm1273_vm5, %v1928_v32  ;;  %v1885_v10 = vmul.f32 %v2460_v22, %v1432_v5  ;;  %vm1890_vm14 = vweird.f32 %v2460_v22  ;;  %vm991_vm0 = vweird.f32 %v3941_v59  ;;  %v1896_v2 = vor.u32 1.1754944e-38, %v1895_v57 }
 0x1c7   : > { %v2462_v43 = vpop.eup %2461  ;;  %v1271_v56 = vpack.c.bf16 %v1225_v27, %v1225_v27  ;;  %2467 = vrcp.f32 %v3959_v1  ;;  %vm1891_vm4 = vmor %vm1889_vm13, %vm1890_vm14  ;;  %vm996_vm2 = vcmp.eq.f32.partialorder %v995_v13, 8.507059e+37  ;;  %v998_v54 = vor.u32 1.1754944e-38, %v997_v20 }
 0x1c8   : > { %v987_v15 = vmul.f32 %v2462_v43, %v3941_v59  ;;  %v1886_v36 = vsub.f32 1.0, %v1885_v10  ;;  %v2464_v12 = vpop.eup %2463  ;;  %vm992_vm1 = vweird.f32 %v2462_v43  ;;  %v1668_v21 = vand.u32 2147483647, %v3956_v37 }
 0x1c9   : > { %1304 = vst.msk [vmem:[%s2705_s14 + $0x78] sm:$0xf] %vm1273_vm5, %v1271_v56  ;;  %v3970_v35 = vadd.f32 1.0, %v2464_v12  ;;  %vm993_vm3 = vmor %vm991_vm0, %vm992_vm1  ;;  %v1670_v39 = vand.u32 2147483648, %v3956_v37  ;;  %v1237_v52 = vand.u32 2147483648, %v3959_v1  ;;  %vm1664_vm8 = vweird.f32 %v3956_v37 }
 0x1ca   : > { %v988_v34 = vsub.f32 1.0, %v987_v15  ;;  %v1887_v47 = vmul.f32 %v2460_v22, %v1886_v36  ;;  %v2466_v44 = vpop.eup %2465  ;;  %v1235_v42 = vand.u32 2147483647, %v3959_v1  ;;  %vm1231_vm10 = vweird.f32 %v3959_v1 }
 0x1cb   : > { %v1660_v62 = vmul.f32 %v2466_v44, %v3956_v37  ;;  %2469 = vrcp.f32 %v3970_v35  ;;  %vm1665_vm6 = vweird.f32 %v2466_v44  ;;  %v1671_v53 = vor.u32 1.1754944e-38, %v1670_v39 }
 0x1cc   : > { %v989_v4 = vmul.f32 %v2462_v43, %v988_v34  ;;  %v1888_v26 = vadd.f32 %v2460_v22, %v1887_v47  ;;  %vm1666_vm9 = vmor %vm1664_vm8, %vm1665_vm6  ;;  %vm1669_vm11 = vcmp.eq.f32.partialorder %v1668_v21, 8.507059e+37  ;;  %v1238_v45 = vor.u32 1.1754944e-38, %v1237_v52 }
 0x1cd   : > { %v2468_v18 = vpop.eup %2467  ;;  %v1661_v51 = vsub.f32 1.0, %v1660_v62  ;;  %vm1236_vm13 = vcmp.eq.f32.partialorder %v1235_v42, 8.507059e+37  ;;  %v1910_v50 = vand.u32 2147483648, %v3970_v35  ;;  %v1908_v30 = vand.u32 2147483647, %v3970_v35 }
 0x1ce   : > { %v990_v28 = vadd.f32 %v2462_v43, %v989_v4  ;;  %v1227_v48 = vmul.f32 %v2468_v18, %v3959_v1  ;;  %v1892_v55 = vsel %vm1891_vm4, %v2460_v22, %v1888_v26  ;;  %vm1232_vm7 = vweird.f32 %v2468_v18 }
 0x1cf   : > { %v1897_v16 = vsel %vm3972_vm15, %v1896_v2, %v1892_v55  ;;  %v1662_v29 = vmul.f32 %v2466_v44, %v1661_v51  ;;  %vm1233_vm12 = vmor %vm1231_vm10, %vm1232_vm7  ;;  %vm1904_vm15 = vweird.f32 %v3970_v35  ;;  %v1911_v27 = vor.u32 1.1754944e-38, %v1910_v50 }
 0x1d0   : > { %v994_v11 = vsel %vm993_vm3, %v2462_v43, %v990_v28  ;;  %v1228_v33 = vsub.f32 1.0, %v1227_v48  ;;  %v1898_v7 = vmul.f32 %v1897_v16, %v3844_v0  ;;  %vm1909_vm1 = vcmp.eq.f32.partialorder %v1908_v30, 8.507059e+37 }
 0x1d1   : > { %v999_v41 = vsel %vm996_vm2, %v998_v54, %v994_v11  ;;  %v2470_v5 = vpop.eup %2469  ;;  %v1663_v8 = vadd.f32 %v2466_v44, %v1662_v29 }
 0x1d2   : > { %v1000_v58 = vmul.f32 %v999_v41, %v3847_v17  ;;  %v1229_v61 = vmul.f32 %v2468_v18, %v1228_v33  ;;  %v1944_v3 = vpack.c.bf16 %v1898_v7, %v1898_v7  ;;  %v1900_v49 = vmul.f32 %v2470_v5, %v3970_v35 }
 0x1d3   : > { %v1667_v17 = vsel %vm1666_vm9, %v2466_v44, %v1663_v8  ;;  %vm1905_vm14 = vweird.f32 %v2470_v5 }
 0x1d4   : > { %v1256_v59 = vpack.c.bf16 %v1000_v58, %v1000_v58  ;;  %v1230_v0 = vadd.f32 %v2468_v18, %v1229_v61  ;;  %1976 = vst.msk [vmem:[%s2717_s17 + $0x78] sm:$0xf] %vm1273_vm5, %v1944_v3  ;;  %v1672_v46 = vsel %vm1669_vm11, %v1671_v53, %v1667_v17  ;;  %v1901_v24 = vsub.f32 1.0, %v1900_v49  ;;  %vm1906_vm0 = vmor %vm1904_vm15, %vm1905_vm14 }
 0x1d5   : > { %v1673_v31 = vmul.f32 %v1672_v46, %v3852_v40 }
 0x1d6   : > { %1289 = vst.msk [vmem:[%s2705_s14 + $0x3c] sm:$0xf] %vm1273_vm5, %v1256_v59  ;;  %v1234_v63 = vsel %vm1233_vm12, %v2468_v18, %v1230_v0  ;;  %v1902_v19 = vmul.f32 %v2470_v5, %v1901_v24 }
 0x1d7   : > { %v1239_v25 = vsel %vm1236_vm13, %v1238_v45, %v1234_v63  ;;  %v1929_v6 = vpack.c.bf16 %v1673_v31, %v1673_v31 }
 0x1d8   : > { %v1240_v38 = vmul.f32 %v1239_v25, %v3877_v9  ;;  %v1903_v32 = vadd.f32 %v2470_v5, %v1902_v19 }
 0x1d9   : > { %1961 = vst.msk [vmem:[%s2717_s17 + $0x3c] sm:$0xf] %vm1273_vm5, %v1929_v6 }
 0x1da   : > { %v1272_v37 = vpack.c.bf16 %v1240_v38, %v1240_v38  ;;  %v1907_v40 = vsel %vm1906_vm0, %v2470_v5, %v1903_v32 }
 0x1db   : > { %v1912_v1 = vsel %vm1909_vm1, %v1911_v27, %v1907_v40 }
 0x1dc   : > { %1305 = vst.msk [vmem:[%s2705_s14 + $0x7c] sm:$0xf] %vm1273_vm5, %v1272_v37  ;;  %v1913_v9 = vmul.f32 %v1912_v1, %v3892_v60 }
 0x1de   : > { %v1945_v22 = vpack.c.bf16 %v1913_v9, %v1913_v9 }
 0x1e0   : > { %1977 = vst.msk [vmem:[%s2717_s17 + $0x7c] sm:$0xf] %vm1273_vm5, %v1945_v22 }
 0x1e1 PF: > { %s17_s21 = sadd.s32 1, %s2481_s21  }
 0x1e2   : > { %p14_p4 = scmp.ge.s32.totalorder %s17_s21, 4  }
 0x1e4   :  { %16 = sbr.rel (!%p14_p4) target bundleno = 1 (0x1), region = 82 }

// kernel: csp_layer_forward.3
= control target key start
LH: loop header
LB: loop body
LE: loop exit
PB: predicated region body
PF: predicated region fallthrough
CT: control target
= control target key end

     0   :  { %s4223_s17 = smov 0   ;;  %s4225_s18 = smov 0   ;;  %s5645_s0 = inlined_call_operand.vmem [shape: bf16[2,16,16,8], index: 0, kind: input, shape index: {}, may-alias: {0,1,2}]   ;;  %s5646_s1 = inlined_call_operand.vmem [shape: bf16[2,16,16,8], index: 1, kind: input, shape index: {}, may-alias: {0,1,2}]   ;;  %s5647_s2 = inlined_call_operand.vmem [shape: bf16[2,16,16,8], index: 2, kind: input, shape index: {}, may-alias: {0,1,2}]   ;;  %s5648_s3 = inlined_call_operand.vmem [shape: bf16[2,16,16,8], index: 3, kind: input, shape index: {}]   ;;  %s5649_s4 = inlined_call_operand.vmem [shape: bf16[8,8], index: 4, kind: input, shape index: {}]   ;;  %s5650_s5 = inlined_call_operand.vmem [shape: f32[1,8], index: 5, kind: input, shape index: {}]   ;;  %s5651_s6 = inlined_call_operand.vmem [shape: bf16[3,24,8], index: 6, kind: input, shape index: {}]   ;;  %s5652_s7 = inlined_call_operand.vmem [shape: f32[1,8], index: 7, kind: input, shape index: {}]   ;;  %s5653_s8 = inlined_call_operand.vmem [shape: bf16[8,16], index: 8, kind: input, shape index: {}]   ;;  %s5654_s9 = inlined_call_operand.vmem [shape: bf16[8,16], index: 9, kind: input, shape index: {}]   ;;  %s5655_s10 = inlined_call_operand.vmem [shape: f32[1,16], index: 10, kind: input, shape index: {}]   ;;  %s5656_s11 = inlined_call_operand.vmem [shape: f32[2,16,16,16], index: 11, kind: output, shape index: {}]  }
   0x1   :  { %5659 = sst [smem:[#allocation7_spill]] %s5645_s0  ;;  %s4227_s19 = smov 0  }
   0x2   :  { %5660 = sst [smem:[#allocation8_spill]] %s5648_s3  ;;  %s4229_s20 = smov 0  }
   0x3   :  { %s4231_s21 = smov 0  }
   0x4 LB: > { %5661 = sst [smem:[#allocation3_spill]] %s4152_s20  ;;  %s30_s22 = sadd.s32 1, %s4148_s19  ;;  %s4156_s21 = sphi %s4231_s21, %s21_s21   ;;  %s4152_s20 = sphi %s4229_s20, %s5697_s20   ;;  %s4148_s19 = sphi %s4227_s19, %s5699_s19   ;;  %s4144_s18 = sphi %s4225_s18, %s5695_s18   ;;  %s4140_s17 = sphi %s4223_s17, %s5698_s17  }
   0x5   : > { %s33_s23 = sadd.s32 1, %s4152_s20  ;;  %p31_p0 = scmp.ge.s32.totalorder %s30_s22, 2 }
   0x6   : > { %p3407_p1 = scmp.ge.s32.totalorder %s4156_s21, 1  ;;  %p441_p2 = scmp.lt.s32.totalorder %s4156_s21, 5 }
   0x7   : > { %s5701_s22 = smov (%p31_p0, %s30_s22), 0  ;;  %s5703_s23 = smov (!%p31_p0, %s33_s23), %s4152_s20 }
   0x8   : > { %5662 = sst [smem:[#allocation4_spill]] %s5701_s22  ;;  %p442_p3 = pnand %p3407_p1, %p441_p2 }
   0x9   : > { %p35_p4 = scmp.ge.s32.totalorder %s5703_s23, 2 }
   0xa   : > { %445 = sbr.rel (%p442_p3) target bundleno = 1271 (0x4f7), region = 64 }
   0xb   : > { %s5705_s23 = smov (%p35_p4, %s5703_s23), 0 }
   0xc   : > { %5663 = sst [smem:[#allocation5_spill]] %s5705_s23 }
   0xf   : > { %v613_v0 = vld [vmem:[%s5649_s4] sm:$0xf]  ;;  %vm683_vm0 = vcmask 1043456   ;;  %s3408_s26 = sshll.u32 %s4140_s17, 3  ;;  %p528_p5 = scmp.lt.s32.totalorder %s4144_s18, 1  ;;  %vm658_vm1 = vcmask 64512  }
  0x10   : > { %v685_v1 = vsel %vm683_vm0, %v613_v0, 0  ;;  %p530_p6 = scmp.lt.s32.totalorder %s3408_s26, 15  ;;  %s3413_s27 = sadd.s32 4294967295, %s3408_s26  ;;  %v4347_v18 = vld [vmem:[%s5650_s5] ss:$0 sm:$0xff] }
  0x11   : > { %694 = vmatpush.bf16.msra.mxu0 %v685_v1  ;;  %3606 = vmatpush.bf16.msra.mxu1 %v685_v1  ;;  %s5707_s18 = smov (!%p528_p5, %s4144_s18), 1  ;;  %p540_p7 = scmp.gt.s32.totalorder %s3413_s27, 0 }
  0x12   : > { %3607 = vmatpush.bf16.msra.mxu2 %v685_v1  ;;  %3608 = vmatpush.bf16.msra.mxu3 %v685_v1  ;;  %s531_s28 = scalar_select %p530_p6, %s3408_s26, 15 }
  0x13   : > { %s4260_s29 = sshll.u32 %s5707_s18, 5  ;;  %p3414_p8 = scmp.lt.s32.totalorder %s3413_s27, 15 }
  0x14   : > { %s3409_s30 = sshll.u32 %s531_s28, 1  ;;  %s556_s13 = sadd.s32 8, %s3408_s26 }
  0x15   : > { %s4263_s12 = sadd.s32 %s4260_s29, %s3409_s30  ;;  %p4266_p9 = scmp.lt.s32.totalorder %s556_s13, 15 }
  0x16   : > { %s3411_s14 = sshll.u32 %s4263_s12, 2  ;;  %s5665_s0 = sld [smem:[#allocation7_spill]] }
  0x17   : > { %s5666_s3 = sld [smem:[#allocation8_spill]]  ;;  %s5709_s13 = smov (!%p4266_p9, %s556_s13), 15 }
  0x18   : > { %s541_s28 = scalar_select %p540_p7, %s3413_s27, 0 }
  0x19   : > { %s5713_s13 = smov (!%p4266_p9, %s5709_s13), 15  ;;  %s3436_s27 = sshll.u32 %s4263_s12, 3 }
  0x1a   : > { %s5711_s28 = smov (!%p3414_p8, %s541_s28), 15  ;;  %s4334_s20 = scalar_lea.vmem %s5656_s11, %s3436_s27 }
  0x1b   : > { %s3419_s23 = sshll.u32 %s5711_s28, 1  ;;  %p3477_p10 = scmp.eq.s32.totalorder %s4140_s17, 0 }
  0x1c   : > { %s4273_s25 = scalar_lea.vmem %s5665_s0, %s3411_s14  ;;  %s548_s30 = sadd.s32 %s3419_s23, %s4260_s29 }
  0x1d   : > { %s4278_s26 = scalar_lea.vmem %s5666_s3, %s3411_s14  ;;  %v4281_v2 = vld [vmem:[%s4273_s25] sm:$0xff]   ;;  %v4285_v4 = vld [vmem:[%s4273_s25 + $0x8] sm:$0xff]   ;;  %v4290_v5 = vld [vmem:[%s4273_s25 + $0x10] sm:$0xff]   ;;  %s3426_s14 = sshll.u32 %s5713_s13, 1 }
  0x1e   : > { %v3585_v3 = vld [vmem:[%s4273_s25] sm:$0xff]  ;;  %v4293_v6 = vld [vmem:[%s4273_s25 + $0x18] sm:$0xff]   ;;  %v4300_v8 = vld [vmem:[%s4273_s25 + $0x28] sm:$0xff]   ;;  %s3421_s16 = sshll.u32 %s548_s30, 2  ;;  %s565_s24 = sadd.s32 %s3426_s14, %s4260_s29 }
  0x1f   : > { %v4296_v7 = vld [vmem:[%s4273_s25 + $0x20] sm:$0xff]   ;;  %v4303_v9 = vld [vmem:[%s4273_s25 + $0x30] sm:$0xff]   ;;  %v4306_v10 = vld [vmem:[%s4273_s25 + $0x38] sm:$0xff]   ;;  %3469 = vmatmul.msk.bf16.vlgmr.msra.gmra.mxu0 %vm658_vm1, %v3585_v3  ;;  %s4323_s0 = scalar_lea.vmem %s5646_s1, %s3421_s16  ;;  %s4325_s3 = sshll.u32 %s565_s24, 2 }
  0x20   : > { %5667 = vst [vmem:[#allocation6_spill] sm:$0xff] %v4306_v10  ;;  %v3587_v11 = vld [vmem:[%s4273_s25 + $0x10] sm:$0xff]  ;;  %v3589_v12 = vld [vmem:[%s4273_s25 + $0x20] sm:$0xff]  ;;  %s567_s13 = scalar_lea.vmem %s5647_s2, %s4325_s3  ;;  %v3586_v14 = vld [vmem:[%s4273_s25 + $0x8] sm:$0xff] }
  0x21   : > { %v3591_v13 = vld [vmem:[%s4273_s25 + $0x30] sm:$0xff]  ;;  %3471 = vmatmul.msk.bf16.vlgmr.msra.gmra.mxu1 %vm658_vm1, %v3587_v11  ;;  %3473 = vmatmul.msk.bf16.vlgmr.msra.gmra.mxu2 %vm658_vm1, %v3589_v12  ;;  %v3588_v15 = vld [vmem:[%s4273_s25 + $0x18] sm:$0xff]  ;;  %v3590_v16 = vld [vmem:[%s4273_s25 + $0x28] sm:$0xff] }
  0x22   : > { %3475 = vmatmul.msk.bf16.vlgmr.msra.gmra.mxu3 %vm658_vm1, %v3591_v13  ;;  %v3592_v17 = vld [vmem:[%s4273_s25 + $0x38] sm:$0xff] }
  0x2f   : > { %3470 = vmatmul.msk.bf16.gmra.mxu0 %vm658_vm1, %v3586_v14 }
  0x31   : > { %3472 = vmatmul.msk.bf16.gmra.mxu1 %vm658_vm1, %v3588_v15  ;;  %3474 = vmatmul.msk.bf16.gmra.mxu2 %vm658_vm1, %v3590_v16 }
  0x32   : > { %3476 = vmatmul.msk.bf16.gmra.mxu3 %vm658_vm1, %v3592_v17 }
  0x9c   : > { %v696_v19 = vpop.f32.mrf.mxu0 }
  0x9d   : > { %v4350_v20 = vadd.f32 %v4347_v18, %v696_v19 }
  0x9e   : > { %v706_v22 = vpop.f32.mrf.mxu1 }
  0x9f   : > { %v736_v21 = vsub.f32 0.0, %v4350_v20  ;;  %v4354_v23 = vadd.f32 %v4347_v18, %v706_v22 }
  0xa1   : > { %v752_v24 = vmul.f32 1.442695, %v736_v21  ;;  %v740_v25 = vsub.f32 0.0, %v4354_v23 }
  0xa3   : > { %3660 = vpow2.f32 %v752_v24  ;;  %v760_v26 = vmul.f32 1.442695, %v740_v25 }
  0xa4   : > { %v698_v27 = vpop.f32.mrf.mxu0  ;;  %v716_v28 = vpop.f32.mrf.mxu2 }
  0xa5   : > { %v4358_v29 = vadd.f32 %v4347_v18, %v698_v27  ;;  %3662 = vpow2.f32 %v760_v26  ;;  %v4361_v30 = vadd.f32 %v4347_v18, %v716_v28  ;;  %v726_v31 = vpop.f32.mrf.mxu3 }
  0xa6   : > { %v4364_v32 = vadd.f32 %v4347_v18, %v726_v31  ;;  %v708_v34 = vpop.f32.mrf.mxu1 }
  0xa7   : > { %v737_v33 = vsub.f32 0.0, %v4358_v29  ;;  %v744_v35 = vsub.f32 0.0, %v4361_v30  ;;  %v4369_v36 = vadd.f32 %v4347_v18, %v708_v34 }
  0xa8   : > { %v748_v38 = vsub.f32 0.0, %v4364_v32 }
  0xa9   : > { %v3661_v37 = vpop.eup %3660  ;;  %v754_v39 = vmul.f32 1.442695, %v737_v33  ;;  %v768_v41 = vmul.f32 1.442695, %v744_v35  ;;  %v741_v42 = vsub.f32 0.0, %v4369_v36 }
  0xaa   : > { %v784_v40 = vadd.f32 1.0, %v3661_v37  ;;  %v776_v43 = vmul.f32 1.442695, %v748_v38 }
  0xab   : > { %3664 = vpow2.f32 %v754_v39  ;;  %v3663_v44 = vpop.eup %3662  ;;  %v762_v48 = vmul.f32 1.442695, %v741_v42 }
  0xac   : > { %3666 = vrcp.f32 %v784_v40  ;;  %v4373_v45 = vadd.f32 1.0, %v3663_v44  ;;  %v718_v46 = vpop.f32.mrf.mxu2  ;;  %v701_v47 = vpop.f32.mrf.mxu0  ;;  %v809_v50 = vand.u32 2147483647, %v784_v40  ;;  %vm805_vm2 = vweird.f32 %v784_v40 }
  0xad   : > { %3668 = vpow2.f32 %v768_v41  ;;  %v4376_v49 = vadd.f32 %v4347_v18, %v718_v46  ;;  %v4381_v52 = vadd.f32 %v4347_v18, %v701_v47  ;;  %v728_v54 = vpop.f32.mrf.mxu3  ;;  %v811_v56 = vand.u32 2147483648, %v784_v40 }
  0xae   : > { %3670 = vpow2.f32 %v776_v43  ;;  %v711_v59 = vpop.f32.mrf.mxu1  ;;  %vm4385_vm3 = vcmp.eq.f32.partialorder %v809_v50, 8.507059e+37  ;;  %v869_v63 = vand.u32 2147483647, %v4373_v45  ;;  %v871_v0 = vand.u32 2147483648, %v4373_v45 }
  0xaf   : > { %3672 = vrcp.f32 %v4373_v45  ;;  %v745_v51 = vsub.f32 0.0, %v4376_v49  ;;  %v4395_v11 = vadd.f32 %v4347_v18, %v728_v54  ;;  %v738_v12 = vsub.f32 0.0, %v4381_v52 }
  0xb0   : > { %3674 = vpow2.f32 %v762_v48  ;;  %v4401_v16 = vadd.f32 %v4347_v18, %v711_v59  ;;  %v812_v17 = vor.u32 1.1754944e-38, %v811_v56  ;;  %vm865_vm4 = vweird.f32 %v4373_v45 }
  0xb1   : > { %v3665_v53 = vpop.eup %3664  ;;  %v770_v58 = vmul.f32 1.442695, %v745_v51  ;;  %vm4406_vm6 = vcmp.eq.f32.partialorder %v869_v63, 8.507059e+37  ;;  %v872_v26 = vor.u32 1.1754944e-38, %v871_v0  ;;  %v749_v27 = vsub.f32 0.0, %v4395_v11 }
  0xb2   : > { %v3667_v55 = vpop.eup %3666  ;;  %v4383_v57 = vadd.f32 1.0, %v3665_v53  ;;  %v756_v28 = vmul.f32 1.442695, %v738_v12  ;;  %v742_v34 = vsub.f32 0.0, %v4401_v16 }
  0xb3   : > { %v3669_v60 = vpop.eup %3668  ;;  %v801_v61 = vmul.f32 %v3667_v55, %v784_v40  ;;  %vm806_vm5 = vweird.f32 %v3667_v55 }
  0xb4   : > { %v3671_v1 = vpop.eup %3670  ;;  %v4391_v3 = vadd.f32 1.0, %v3669_v60  ;;  %3676 = vrcp.f32 %v4383_v57  ;;  %vm820_vm7 = vweird.f32 %v4383_v57  ;;  %v824_v33 = vand.u32 2147483647, %v4383_v57  ;;  %vm807_vm8 = vmor %vm805_vm2, %vm806_vm5 }
  0xb5   : > { %v3673_v13 = vpop.eup %3672  ;;  %v802_v14 = vsub.f32 1.0, %v801_v61  ;;  %v4398_v15 = vadd.f32 1.0, %v3671_v1  ;;  %3678 = vpow2.f32 %v770_v58  ;;  %v826_v39 = vand.u32 2147483648, %v4383_v57 }
  0xb6   : > { %v861_v19 = vmul.f32 %v3673_v13, %v4373_v45  ;;  %3680 = vrcp.f32 %v4391_v3  ;;  %v3675_v24 = vpop.eup %3674  ;;  %vm866_vm9 = vweird.f32 %v3673_v13  ;;  %v929_v38 = vand.u32 2147483647, %v4391_v3 }
  0xb7   : > { %v803_v21 = vmul.f32 %v3667_v55, %v802_v14  ;;  %3682 = vrcp.f32 %v4398_v15  ;;  %vm925_vm10 = vweird.f32 %v4391_v3  ;;  %v931_v43 = vand.u32 2147483648, %v4391_v3  ;;  %vm867_vm12 = vmor %vm865_vm4, %vm866_vm9 }
  0xb8   : > { %v862_v25 = vsub.f32 1.0, %v861_v19  ;;  %v4421_v46 = vadd.f32 1.0, %v3675_v24  ;;  %vm985_vm11 = vweird.f32 %v4398_v15  ;;  %v989_v50 = vand.u32 2147483647, %v4398_v15 }
  0xb9   : > { %v804_v31 = vadd.f32 %v3667_v55, %v803_v21  ;;  %v991_v51 = vand.u32 2147483648, %v4398_v15  ;;  %v778_v45 = vmul.f32 1.442695, %v749_v27  ;;  %vm4441_vm14 = vcmp.eq.f32.partialorder %v929_v38, 8.507059e+37 }
  0xba   : > { %v3677_v35 = vpop.eup %3676  ;;  %v863_v37 = vmul.f32 %v3673_v13, %v862_v25  ;;  %3684 = vrcp.f32 %v4421_v46  ;;  %v932_v1 = vor.u32 1.1754944e-38, %v931_v43  ;;  %vm825_vm4 = vcmp.eq.f32.partialorder %v824_v33, 8.507059e+37 }
  0xbb   : > { %v3679_v41 = vpop.eup %3678  ;;  %v808_v42 = vsel %vm807_vm8, %v3667_v55, %v804_v31  ;;  %v816_v44 = vmul.f32 %v3677_v35, %v4383_v57  ;;  %vm821_vm13 = vweird.f32 %v3677_v35  ;;  %vm4450_vm5 = vcmp.eq.f32.partialorder %v989_v50, 8.507059e+37  ;;  %v721_v31 = vpop.f32.mrf.mxu2 }
  0xbc   : > { %v3681_v47 = vpop.eup %3680  ;;  %v813_v40 = vsel %vm4385_vm3, %v812_v17, %v808_v42  ;;  %v864_v48 = vadd.f32 %v3673_v13, %v863_v37  ;;  %v4433_v58 = vadd.f32 1.0, %v3679_v41  ;;  %vm822_vm3 = vmor %vm820_vm7, %vm821_vm13  ;;  %vm880_vm8 = vweird.f32 %v4421_v46 }
  0xbd   : > { %v3683_v53 = vpop.eup %3682  ;;  %v814_v54 = vmul.f32 %v813_v40, %v4350_v20  ;;  %v921_v55 = vmul.f32 %v3681_v47, %v4391_v3  ;;  %v817_v56 = vsub.f32 1.0, %v816_v44  ;;  %vm926_vm15 = vweird.f32 %v3681_v47 }
  0xbe   : > { %v868_v59 = vsel %vm867_vm12, %v3673_v13, %v864_v48  ;;  %v981_v60 = vmul.f32 %v3683_v53, %v4398_v15  ;;  %3686 = vrcp.f32 %v4433_v58  ;;  %vm986_vm2 = vweird.f32 %v3683_v53 }
  0xbf   : > { %1062 = vst.msk [vmem:[#allocation2 + $0x19] sm:$0xff] %vm658_vm1, %v814_v54  ;;  %v873_v20 = vsel %vm4406_vm6, %v872_v26, %v868_v59  ;;  %v922_v61 = vsub.f32 1.0, %v921_v55  ;;  %v818_v62 = vmul.f32 %v3677_v35, %v817_v56  ;;  %3688 = vpow2.f32 %v778_v45  ;;  %vm927_vm6 = vmor %vm925_vm10, %vm926_vm15  ;;  %v703_v45 = vpop.f32.mrf.mxu0 }
  0xc0   : > { %v874_v63 = vmul.f32 %v873_v20, %v4354_v23  ;;  %v982_v12 = vsub.f32 1.0, %v981_v60  ;;  %v827_v23 = vor.u32 1.1754944e-38, %v826_v39  ;;  %v3685_v24 = vpop.eup %3684  ;;  %v992_v26 = vor.u32 1.1754944e-38, %v991_v51  ;;  %vm987_vm7 = vmor %vm985_vm11, %vm986_vm2  ;;  %v731_v39 = vpop.f32.mrf.mxu3 }
  0xc1   : > { %v923_v13 = vmul.f32 %v3681_v47, %v922_v61  ;;  %v819_v14 = vadd.f32 %v3677_v35, %v818_v62  ;;  %3690 = vpow2.f32 %v756_v28  ;;  %v876_v37 = vmul.f32 %v3685_v24, %v4421_v46 }
  0xc2   : > { %1066 = vst.msk [vmem:[#allocation2 + $0x49] sm:$0xff] %vm658_vm1, %v874_v63  ;;  %v983_v17 = vmul.f32 %v3683_v53, %v982_v12  ;;  %v886_v38 = vand.u32 2147483648, %v4421_v46  ;;  %v764_v28 = vmul.f32 1.442695, %v742_v34  ;;  %v4472_v43 = vadd.f32 %v4347_v18, %v721_v31  ;;  %v713_v63 = vpop.f32.mrf.mxu1 }
  0xc3   : > { %v924_v19 = vadd.f32 %v3681_v47, %v923_v13  ;;  %v823_v22 = vsel %vm822_vm3, %v3677_v35, %v819_v14  ;;  %v877_v42 = vsub.f32 1.0, %v876_v37  ;;  %vm881_vm9 = vweird.f32 %v3685_v24  ;;  %v723_v14 = vpop.f32.mrf.mxu2 }
  0xc4   : > { %v984_v25 = vadd.f32 %v3683_v53, %v983_v17  ;;  %v828_v27 = vsel %vm825_vm4, %v827_v23, %v823_v22  ;;  %v3687_v41 = vpop.eup %3686  ;;  %3692 = vpow2.f32 %v764_v28  ;;  %v746_v48 = vsub.f32 0.0, %v4472_v43  ;;  %vm882_vm11 = vmor %vm880_vm8, %vm881_vm9 }
  0xc5   : > { %v928_v57 = vsel %vm927_vm6, %v3681_v47, %v924_v19  ;;  %v829_v33 = vmul.f32 %v828_v27, %v4358_v29  ;;  %v884_v47 = vand.u32 2147483647, %v4421_v46  ;;  %v936_v40 = vmul.f32 %v3687_v41, %v4433_v58  ;;  %v3689_v34 = vpop.eup %3688 }
  0xc6   : > { %v933_v3 = vsel %vm4441_vm14, %v932_v1, %v928_v57  ;;  %v988_v35 = vsel %vm987_vm7, %v3683_v53, %v984_v25  ;;  %v4480_v50 = vadd.f32 %v4347_v18, %v731_v39  ;;  %v946_v54 = vand.u32 2147483648, %v4433_v58 }
  0xc7   : > { %v934_v15 = vmul.f32 %v933_v3, %v4361_v30  ;;  %v993_v29 = vsel %vm4450_vm5, %v992_v26, %v988_v35  ;;  %1063 = vst.msk [vmem:[#allocation2 + $0x21] sm:$0xff] %vm658_vm1, %v829_v33  ;;  %v878_v30 = vmul.f32 %v3685_v24, %v877_v42  ;;  %v3691_v51 = vpop.eup %3690  ;;  %v937_v53 = vsub.f32 1.0, %v936_v40 }
  0xc8   : > { %v994_v44 = vmul.f32 %v993_v29, %v4364_v32  ;;  %v944_v32 = vand.u32 2147483647, %v4433_v58  ;;  %v4485_v55 = vadd.f32 1.0, %v3689_v34  ;;  %v887_v59 = vor.u32 1.1754944e-38, %v886_v38 }
  0xc9   : > { %1070 = vst.msk [vmem:[#allocation2 + $0x79] sm:$0xff] %vm658_vm1, %v934_v15  ;;  %v879_v56 = vadd.f32 %v3685_v24, %v878_v30  ;;  %vm941_vm10 = vweird.f32 %v3687_v41  ;;  %v4487_v60 = vadd.f32 1.0, %v3691_v51  ;;  %v938_v20 = vmul.f32 %v3687_v41, %v937_v53  ;;  %v733_v51 = vpop.f32.mrf.mxu3 }
  0xca   : > { %1074 = vst.msk [vmem:[#allocation2 + $0xa9] sm:$0xff] %vm658_vm1, %v994_v44  ;;  %3694 = vrcp.f32 %v4485_v55  ;;  %v772_v61 = vmul.f32 1.442695, %v746_v48  ;;  %v750_v62 = vsub.f32 0.0, %v4480_v50  ;;  %vm885_vm12 = vcmp.eq.f32.partialorder %v884_v47, 8.507059e+37  ;;  %v3693_v1 = vpop.eup %3692 }
  0xcb   : > { %v883_v0 = vsel %vm882_vm11, %v3685_v24, %v879_v56  ;;  %vm940_vm13 = vweird.f32 %v4433_v58  ;;  %3696 = vrcp.f32 %v4487_v60  ;;  %v939_v13 = vadd.f32 %v3687_v41, %v938_v20 }
  0xcc   : > { %v888_v12 = vsel %vm885_vm12, %v887_v59, %v883_v0  ;;  %vm945_vm14 = vcmp.eq.f32.partialorder %v944_v32, 8.507059e+37  ;;  %v947_v46 = vor.u32 1.1754944e-38, %v946_v54  ;;  %vm942_vm15 = vmor %vm940_vm13, %vm941_vm10  ;;  %v4497_v23 = vadd.f32 1.0, %v3693_v1 }
  0xcd   : > { %v889_v17 = vmul.f32 %v888_v12, %v4369_v36  ;;  %v4500_v19 = vadd.f32 %v4347_v18, %v703_v45  ;;  %v4503_v21 = vadd.f32 %v4347_v18, %v713_v63  ;;  %v943_v58 = vsel %vm942_vm15, %v3687_v41, %v939_v13 }
  0xce   : > { %v1004_v22 = vand.u32 2147483647, %v4485_v55  ;;  %3698 = vpow2.f32 %v772_v61  ;;  %v780_v24 = vmul.f32 1.442695, %v750_v62  ;;  %v948_v25 = vsel %vm945_vm14, %v947_v46, %v943_v58 }
  0xcf   : > { %1067 = vst.msk [vmem:[#allocation2 + $0x51] sm:$0xff] %vm658_vm1, %v889_v17  ;;  %3700 = vrcp.f32 %v4497_v23  ;;  %v4509_v36 = vadd.f32 %v4347_v18, %v723_v14  ;;  %v949_v27 = vmul.f32 %v948_v25, %v4376_v49  ;;  %v1006_v31 = vand.u32 2147483648, %v4485_v55 }
  0xd0   : > { %v3695_v26 = vpop.eup %3694  ;;  %v839_v57 = vand.u32 2147483647, %v4487_v60  ;;  %3702 = vpow2.f32 %v780_v24  ;;  %vm1000_vm2 = vweird.f32 %v4485_v55  ;;  %v739_v3 = vsub.f32 0.0, %v4500_v19 }
  0xd1   : > { %v3697_v33 = vpop.eup %3696  ;;  %v996_v37 = vmul.f32 %v3695_v26, %v4485_v55  ;;  %v743_v35 = vsub.f32 0.0, %v4503_v21  ;;  %1071 = vst.msk [vmem:[#allocation2 + $0x81] sm:$0xff] %vm658_vm1, %v949_v27  ;;  %vm4519_vm3 = vcmp.eq.f32.partialorder %v1004_v22, 8.507059e+37  ;;  %vm835_vm4 = vweird.f32 %v4487_v60 }
  0xd2   : > { %v831_v49 = vmul.f32 %v3697_v33, %v4487_v60  ;;  %v841_v28 = vand.u32 2147483648, %v4487_v60  ;;  %v758_v41 = vmul.f32 1.442695, %v739_v3  ;;  %v747_v29 = vsub.f32 0.0, %v4509_v36 }
  0xd3   : > { %v997_v39 = vsub.f32 1.0, %v996_v37  ;;  %v766_v15 = vmul.f32 1.442695, %v743_v35  ;;  %vm1001_vm5 = vweird.f32 %v3695_v26  ;;  %v1007_v44 = vor.u32 1.1754944e-38, %v1006_v31 }
  0xd4   : > { %v3699_v42 = vpop.eup %3698  ;;  %v832_v47 = vsub.f32 1.0, %v831_v49  ;;  %vm4527_vm6 = vcmp.eq.f32.partialorder %v839_v57, 8.507059e+37  ;;  %vm836_vm7 = vweird.f32 %v3697_v33  ;;  %3704 = vpow2.f32 %v758_v41  ;;  %vm1002_vm9 = vmor %vm1000_vm2, %vm1001_vm5 }
  0xd5   : > { %v3701_v34 = vpop.eup %3700  ;;  %v998_v30 = vmul.f32 %v3695_v26, %v997_v39  ;;  %v4531_v48 = vadd.f32 1.0, %v3699_v42  ;;  %3706 = vpow2.f32 %v766_v15  ;;  %v774_v56 = vmul.f32 1.442695, %v747_v29  ;;  %vm837_vm10 = vmor %vm835_vm4, %vm836_vm7 }
  0xd6   : > { %v3703_v53 = vpop.eup %3702  ;;  %v833_v32 = vmul.f32 %v3697_v33, %v832_v47  ;;  %v891_v54 = vmul.f32 %v3701_v34, %v4497_v23  ;;  %v842_v20 = vor.u32 1.1754944e-38, %v841_v28  ;;  %vm895_vm8 = vweird.f32 %v4497_v23 }
  0xd7   : > { %v999_v59 = vadd.f32 %v3695_v26, %v998_v30  ;;  %3708 = vrcp.f32 %v4531_v48  ;;  %v4539_v45 = vadd.f32 1.0, %v3703_v53  ;;  %v4542_v63 = vadd.f32 %v4347_v18, %v733_v51 }
  0xd8   : > { %v834_v61 = vadd.f32 %v3697_v33, %v833_v32  ;;  %v892_v62 = vsub.f32 1.0, %v891_v54  ;;  %vm896_vm11 = vweird.f32 %v3701_v34  ;;  %v899_v1 = vand.u32 2147483647, %v4497_v23 }
  0xd9   : > { %v1003_v0 = vsel %vm1002_vm9, %v3695_v26, %v999_v59  ;;  %v901_v12 = vand.u32 2147483648, %v4497_v23  ;;  %3710 = vpow2.f32 %v774_v56  ;;  %v751_v24 = vsub.f32 0.0, %v4542_v63  ;;  %vm897_vm12 = vmor %vm895_vm8, %vm896_vm11 }
  0xda   : > { %v1008_v55 = vsel %vm4519_vm3, %v1007_v44, %v1003_v0  ;;  %v838_v13 = vsel %vm837_vm10, %v3697_v33, %v834_v61  ;;  %v893_v46 = vmul.f32 %v3701_v34, %v892_v62  ;;  %v3705_v14 = vpop.eup %3704  ;;  %3712 = vrcp.f32 %v4539_v45 }
  0xdb   : > { %v1009_v18 = vmul.f32 %v1008_v55, %v4395_v11  ;;  %v843_v17 = vsel %vm4527_vm6, %v842_v20, %v838_v13  ;;  %v3707_v60 = vpop.eup %3706  ;;  %v902_v26 = vor.u32 1.1754944e-38, %v901_v12  ;;  %v4561_v11 = vadd.f32 1.0, %v3705_v14 }
  0xdc   : > { %v844_v58 = vmul.f32 %v843_v17, %v4381_v52  ;;  %v894_v22 = vadd.f32 %v3701_v34, %v893_v46  ;;  %v4563_v27 = vadd.f32 1.0, %v3707_v60  ;;  %vm900_vm13 = vcmp.eq.f32.partialorder %v899_v1, 8.507059e+37 }
  0xdd   : > { %v3709_v25 = vpop.eup %3708  ;;  %1075 = vst.msk [vmem:[#allocation2 + $0xb1] sm:$0xff] %vm658_vm1, %v1009_v18  ;;  %v959_v33 = vand.u32 2147483647, %v4531_v48  ;;  %3714 = vrcp.f32 %v4561_v11  ;;  %v961_v35 = vand.u32 2147483648, %v4531_v48  ;;  %v782_v38 = vmul.f32 1.442695, %v751_v24 }
  0xde   : > { %1064 = vst.msk [vmem:[#allocation2 + $0x31] sm:$0xff] %vm658_vm1, %v844_v58  ;;  %v898_v31 = vsel %vm897_vm12, %v3701_v34, %v894_v22  ;;  %v951_v52 = vmul.f32 %v3709_v25, %v4531_v48  ;;  %3716 = vrcp.f32 %v4563_v27  ;;  %vm956_vm14 = vweird.f32 %v3709_v25 }
  0xdf   : > { %v903_v57 = vsel %vm900_vm13, %v902_v26, %v898_v31  ;;  %v3711_v37 = vpop.eup %3710  ;;  %vm955_vm15 = vweird.f32 %v4531_v48  ;;  %vm4575_vm2 = vcmp.eq.f32.partialorder %v959_v33, 8.507059e+37  ;;  %v962_v42 = vor.u32 1.1754944e-38, %v961_v35 }
  0xe0   : > { %v904_v23 = vmul.f32 %v903_v57, %v4401_v16  ;;  %v952_v3 = vsub.f32 1.0, %v951_v52  ;;  %v3713_v49 = vpop.eup %3712  ;;  %v1019_v16 = vand.u32 2147483647, %v4539_v45  ;;  %v4580_v15 = vadd.f32 1.0, %v3711_v37  ;;  %vm957_vm3 = vmor %vm955_vm15, %vm956_vm14 }
  0xe1   : > { %v1011_v39 = vmul.f32 %v3713_v49, %v4539_v45  ;;  %3718 = vpow2.f32 %v782_v38  ;;  %vm1015_vm4 = vweird.f32 %v4539_v45  ;;  %v1021_v40 = vand.u32 2147483648, %v4539_v45 }
  0xe2   : > { %1068 = vst.msk [vmem:[#allocation2 + $0x61] sm:$0xff] %vm658_vm1, %v904_v23  ;;  %v953_v28 = vmul.f32 %v3709_v25, %v952_v3  ;;  %3720 = vrcp.f32 %v4580_v15  ;;  %vm1040_vm5 = vcmask 57344   ;;  %vm1016_vm6 = vweird.f32 %v3713_v49 }
  0xe3   : > { %v1012_v44 = vsub.f32 1.0, %v1011_v39  ;;  %v3715_v47 = vpop.eup %3714  ;;  %vm4588_vm7 = vcmp.eq.f32.partialorder %v1019_v16, 8.507059e+37  ;;  %v854_v54 = vand.u32 2147483647, %v4561_v11  ;;  %v4158_v62 = vmov 0.0   ;;  %vm1017_vm8 = vmor %vm1015_vm4, %vm1016_vm6 }
  0xe4   : > { %v954_v29 = vadd.f32 %v3709_v25, %v953_v28  ;;  %v846_v48 = vmul.f32 %v3715_v47, %v4561_v11  ;;  %v3717_v51 = vpop.eup %3716  ;;  %1041 = vst.msk [vmem:[#allocation2] sm:$0x1] %vm1040_vm5, %v4158_v62  ;;  %v1022_v0 = vor.u32 1.1754944e-38, %v1021_v40  ;;  %vm850_vm9 = vweird.f32 %v4561_v11 }
  0xe5   : > { %v1013_v30 = vmul.f32 %v3713_v49, %v1012_v44  ;;  %v906_v61 = vmul.f32 %v3717_v51, %v4563_v27  ;;  %v856_v1 = vand.u32 2147483648, %v4561_v11  ;;  %v914_v12 = vand.u32 2147483647, %v4563_v27  ;;  %1042 = vst.msk [vmem:[#allocation2 + $0x18] sm:$0x1] %vm1040_vm5, %v4158_v62 }
  0xe6   : > { %v958_v34 = vsel %vm957_vm3, %v3709_v25, %v954_v29  ;;  %v847_v20 = vsub.f32 1.0, %v846_v48  ;;  %vm851_vm10 = vweird.f32 %v3715_v47  ;;  %vm911_vm11 = vweird.f32 %v3717_v51  ;;  %1043 = vst.msk [vmem:[#allocation2 + $0x30] sm:$0x1] %vm1040_vm5, %v4158_v62 }
  0xe7   : > { %v963_v53 = vsel %vm4575_vm2, %v962_v42, %v958_v34  ;;  %v1014_v59 = vadd.f32 %v3713_v49, %v1013_v30  ;;  %v907_v46 = vsub.f32 1.0, %v906_v61  ;;  %v916_v18 = vand.u32 2147483648, %v4563_v27  ;;  %1044 = vst.msk [vmem:[#allocation2 + $0x48] sm:$0x1] %vm1040_vm5, %v4158_v62  ;;  %vm852_vm12 = vmor %vm850_vm9, %vm851_vm10 }
  0xe8   : > { %v964_v56 = vmul.f32 %v963_v53, %v4472_v43  ;;  %v3719_v43 = vpop.eup %3718  ;;  %v848_v13 = vmul.f32 %v3715_v47, %v847_v20  ;;  %vm855_vm13 = vcmp.eq.f32.partialorder %v854_v54, 8.507059e+37  ;;  %v857_v25 = vor.u32 1.1754944e-38, %v856_v1  ;;  %1045 = vst.msk [vmem:[#allocation2 + $0x60] sm:$0x1] %vm1040_vm5, %v4158_v62 }
  0xe9   : > { %v1018_v55 = vsel %vm1017_vm8, %v3713_v49, %v1014_v59  ;;  %v3721_v14 = vpop.eup %3720  ;;  %v4608_v17 = vadd.f32 1.0, %v3719_v43  ;;  %v908_v22 = vmul.f32 %v3717_v51, %v907_v46  ;;  %vm910_vm14 = vweird.f32 %v4563_v27  ;;  %1046 = vst.msk [vmem:[#allocation2 + $0x78] sm:$0x1] %vm1040_vm5, %v4158_v62 }
  0xea   : > { %1072 = vst.msk [vmem:[#allocation2 + $0x91] sm:$0xff] %vm658_vm1, %v964_v56  ;;  %v1023_v45 = vsel %vm4588_vm7, %v1022_v0, %v1018_v55  ;;  %v849_v58 = vadd.f32 %v3715_v47, %v848_v13  ;;  %v966_v24 = vmul.f32 %v3721_v14, %v4580_v15  ;;  %vm915_vm15 = vcmp.eq.f32.partialorder %v914_v12, 8.507059e+37  ;;  %vm912_vm2 = vmor %vm910_vm14, %vm911_vm11 }
  0xeb   : > { %v1024_v60 = vmul.f32 %v1023_v45, %v4480_v50  ;;  %3722 = vrcp.f32 %v4608_v17  ;;  %v909_v26 = vadd.f32 %v3717_v51, %v908_v22  ;;  %v917_v11 = vor.u32 1.1754944e-38, %v916_v18  ;;  %1047 = vst.msk [vmem:[#allocation2 + $0x90] sm:$0x1] %vm1040_vm5, %v4158_v62 }
  0xec   : > { %v853_v50 = vsel %vm852_vm12, %v3715_v47, %v849_v58  ;;  %v967_v31 = vsub.f32 1.0, %v966_v24  ;;  %v974_v57 = vand.u32 2147483647, %v4580_v15  ;;  %v976_v33 = vand.u32 2147483648, %v4580_v15  ;;  %1048 = vst.msk [vmem:[#allocation2 + $0xa8] sm:$0x1] %vm1040_vm5, %v4158_v62 }
  0xed   : > { %1076 = vst.msk [vmem:[#allocation2 + $0xc1] sm:$0xff] %vm658_vm1, %v1024_v60  ;;  %v858_v52 = vsel %vm855_vm13, %v857_v25, %v853_v50  ;;  %v913_v37 = vsel %vm912_vm2, %v3717_v51, %v909_v26  ;;  %vm971_vm3 = vweird.f32 %v3721_v14  ;;  %vm970_vm4 = vweird.f32 %v4580_v15 }
  0xee   : > { %v859_v27 = vmul.f32 %v858_v52, %v4500_v19  ;;  %v968_v23 = vmul.f32 %v3721_v14, %v967_v31  ;;  %v918_v3 = vsel %vm915_vm15, %v917_v11, %v913_v37  ;;  %vm972_vm6 = vmor %vm970_vm4, %vm971_vm3  ;;  %v977_v19 = vor.u32 1.1754944e-38, %v976_v33  ;;  %1049 = vst.msk [vmem:[#allocation2 + $0xc0] sm:$0x1] %vm1040_vm5, %v4158_v62 }
  0xef   : > { %v919_v35 = vmul.f32 %v918_v3, %v4503_v21  ;;  %vm975_vm7 = vcmp.eq.f32.partialorder %v974_v57, 8.507059e+37  ;;  %1050 = vst.msk [vmem:[#allocation2 + $0xd8] sm:$0x1] %vm1040_vm5, %v4158_v62  ;;  %v1036_v15 = vand.u32 2147483648, %v4608_v17  ;;  %v1034_v42 = vand.u32 2147483647, %v4608_v17 }
  0xf0   : > { %1065 = vst.msk [vmem:[#allocation2 + $0x39] sm:$0xff] %vm658_vm1, %v859_v27  ;;  %v969_v38 = vadd.f32 %v3721_v14, %v968_v23  ;;  %vm1030_vm9 = vweird.f32 %v4608_v17 }
  0xf1   : > { %v3723_v49 = vpop.eup %3722  ;;  %1069 = vst.msk [vmem:[#allocation2 + $0x69] sm:$0xff] %vm658_vm1, %v919_v35  ;;  %vm1035_vm11 = vcmp.eq.f32.partialorder %v1034_v42, 8.507059e+37 }
  0xf2   : > { %v973_v28 = vsel %vm972_vm6, %v3721_v14, %v969_v38  ;;  %v1026_v39 = vmul.f32 %v3723_v49, %v4608_v17  ;;  %1051 = vst.msk [vmem:[#allocation2 + $0x11] sm:$0x1] %vm1040_vm5, %v4158_v62  ;;  %vm1031_vm8 = vweird.f32 %v3723_v49 }
  0xf3   : > { %v978_v41 = vsel %vm975_vm7, %v977_v19, %v973_v28  ;;  %1052 = vst.msk [vmem:[#allocation2 + $0x29] sm:$0x1] %vm1040_vm5, %v4158_v62  ;;  %vm1032_vm10 = vmor %vm1030_vm9, %vm1031_vm8 }
  0xf4   : > { %v979_v21 = vmul.f32 %v978_v41, %v4509_v36  ;;  %v1027_v16 = vsub.f32 1.0, %v1026_v39  ;;  %1053 = vst.msk [vmem:[#allocation2 + $0x41] sm:$0x1] %vm1040_vm5, %v4158_v62  ;;  %v1037_v36 = vor.u32 1.1754944e-38, %v1036_v15 }
  0xf5   : > { %1054 = vst.msk [vmem:[#allocation2 + $0x59] sm:$0x1] %vm1040_vm5, %v4158_v62 }
  0xf6   : > { %1073 = vst.msk [vmem:[#allocation2 + $0x99] sm:$0xff] %vm658_vm1, %v979_v21  ;;  %v1028_v29 = vmul.f32 %v3723_v49, %v1027_v16 }
  0xf7   : > { %1055 = vst.msk [vmem:[#allocation2 + $0x71] sm:$0x1] %vm1040_vm5, %v4158_v62 }
  0xf8   : > { %v1029_v44 = vadd.f32 %v3723_v49, %v1028_v29  ;;  %1056 = vst.msk [vmem:[#allocation2 + $0x89] sm:$0x1] %vm1040_vm5, %v4158_v62 }
  0xf9   : > { %1057 = vst.msk [vmem:[#allocation2 + $0xa1] sm:$0x1] %vm1040_vm5, %v4158_v62 }
  0xfa   : > { %v1033_v47 = vsel %vm1032_vm10, %v3723_v49, %v1029_v44  ;;  %1058 = vst.msk [vmem:[#allocation2 + $0xb9] sm:$0x1] %vm1040_vm5, %v4158_v62  ;;  %1081 = sbr.rel (%p3477_p10) target bundleno = 429 (0x1ad), region = 68 }
  0xfb   : > { %v1038_v40 = vsel %vm1035_vm11, %v1037_v36, %v1033_v47  ;;  %1059 = vst.msk [vmem:[#allocation2 + $0xd1] sm:$0x1] %vm1040_vm5, %v4158_v62 }
  0xfc   : > { %v1039_v34 = vmul.f32 %v1038_v40, %v4542_v63  ;;  %1060 = vst.msk [vmem:[#allocation2 + $0xe9] sm:$0x1] %vm1040_vm5, %v4158_v62 }
  0xfe   : > { %1077 = vst.msk [vmem:[#allocation2 + $0xc9] sm:$0xff] %vm658_vm1, %v1039_v34 }
  0xff   : > { %v1084_v30 = vld [vmem:[%s5649_s4] sm:$0xf] }
 0x100   : > { %v1098_v63 = vsel %vm683_vm0, %v1084_v30, 0  ;;  %v3593_v48 = vld [vmem:[%s4323_s0] sm:$0xff] }
 0x101   : > { %1107 = vmatpush.bf16.msra.mxu0 %v1098_v63  ;;  %v3724_v51 = vld [vmem:[%s5650_s5] ss:$0 sm:$0xff] }
 0x104   : > { %3482 = vmatmul.msk.bf16.vlgmr.msra.gmra.mxu0 %vm658_vm1, %v3593_v48 }
 0x181   : > { %v1109_v53 = vpop.f32.mrf.mxu0 }
 0x182   : > { %v1110_v32 = vadd.f32 %v3724_v51, %v1109_v53 }
 0x184   : > { %v1114_v54 = vsub.f32 0.0, %v1110_v32 }
 0x186   : > { %v1116_v56 = vmul.f32 1.442695, %v1114_v54 }
 0x188   : > { %3725 = vpow2.f32 %v1116_v56 }
 0x189   : > { %v1111_v59 = vpop.f32.mrf.mxu0 }
 0x18a   : > { %v1112_v20 = vadd.f32 %v3724_v51, %v1111_v59 }
 0x18c   : > { %v1115_v61 = vsub.f32 0.0, %v1112_v20 }
 0x18e   : > { %v3726_v62 = vpop.eup %3725  ;;  %v1118_v0 = vmul.f32 1.442695, %v1115_v61 }
 0x18f   : > { %v1120_v1 = vadd.f32 1.0, %v3726_v62 }
 0x190   : > { %3727 = vpow2.f32 %v1118_v0 }
 0x191   : > { %3729 = vrcp.f32 %v1120_v1  ;;  %v1133_v14 = vand.u32 2147483648, %v1120_v1  ;;  %v1131_v18 = vand.u32 2147483647, %v1120_v1  ;;  %vm1127_vm12 = vweird.f32 %v1120_v1 }
 0x193   : > { %v1134_v58 = vor.u32 1.1754944e-38, %v1133_v14  ;;  %vm1132_vm14 = vcmp.eq.f32.partialorder %v1131_v18, 8.507059e+37 }
 0x196   : > { %v3728_v12 = vpop.eup %3727 }
 0x197   : > { %v3730_v43 = vpop.eup %3729  ;;  %v1121_v55 = vadd.f32 1.0, %v3728_v12 }
 0x198   : > { %v1123_v13 = vmul.f32 %v3730_v43, %v1120_v1  ;;  %vm1128_vm5 = vweird.f32 %v3730_v43 }
 0x199   : > { %3731 = vrcp.f32 %v1121_v55  ;;  %vm1129_vm13 = vmor %vm1127_vm12, %vm1128_vm5  ;;  %v1148_v31 = vand.u32 2147483648, %v1121_v55  ;;  %v1146_v11 = vand.u32 2147483647, %v1121_v55  ;;  %vm1142_vm2 = vweird.f32 %v1121_v55 }
 0x19a   : > { %v1124_v46 = vsub.f32 1.0, %v1123_v13 }
 0x19b   : > { %v1149_v33 = vor.u32 1.1754944e-38, %v1148_v31  ;;  %vm1147_vm4 = vcmp.eq.f32.partialorder %v1146_v11, 8.507059e+37 }
 0x19c   : > { %v1125_v45 = vmul.f32 %v3730_v43, %v1124_v46 }
 0x19e   : > { %v1126_v17 = vadd.f32 %v3730_v43, %v1125_v45 }
 0x19f   : > { %v3732_v60 = vpop.eup %3731 }
 0x1a0   : > { %v1130_v22 = vsel %vm1129_vm13, %v3730_v43, %v1126_v17  ;;  %v1138_v24 = vmul.f32 %v3732_v60, %v1121_v55  ;;  %vm1143_vm15 = vweird.f32 %v3732_v60 }
 0x1a1   : > { %v1135_v25 = vsel %vm1132_vm14, %v1134_v58, %v1130_v22  ;;  %vm1144_vm3 = vmor %vm1142_vm2, %vm1143_vm15 }
 0x1a2   : > { %v1136_v50 = vmul.f32 %v1135_v25, %v1110_v32  ;;  %v1139_v26 = vsub.f32 1.0, %v1138_v24 }
 0x1a4   : > { %1152 = vst.msk [vmem:[#allocation2 + $0x1] sm:$0xff] %vm658_vm1, %v1136_v50  ;;  %v1140_v52 = vmul.f32 %v3732_v60, %v1139_v26 }
 0x1a6   : > { %v1141_v57 = vadd.f32 %v3732_v60, %v1140_v52 }
 0x1a8   : > { %v1145_v27 = vsel %vm1144_vm3, %v3732_v60, %v1141_v57 }
 0x1a9   : > { %v1150_v37 = vsel %vm1147_vm4, %v1149_v33, %v1145_v27 }
 0x1aa   : > { %v1151_v23 = vmul.f32 %v1150_v37, %v1112_v20 }
 0x1ac   : > { %1153 = vst.msk [vmem:[#allocation2 + $0x9] sm:$0xff] %vm658_vm1, %v1151_v23 }
 0x1ad PF: > { %p3483_p11 = scmp.ne.s32.totalorder %s4140_s17, 0 }
 0x1af   : > { %1156 = sbr.rel (%p3483_p11) target bundleno = 439 (0x1b7), region = 72 }
 0x1b4   : > { %v4159_v3 = vmov 0.0  }
 0x1b5   : > { %1157 = vst.msk [vmem:[#allocation2 + $0x1] sm:$0xff] %vm658_vm1, %v4159_v3 }
 0x1b6   : > { %1158 = vst.msk [vmem:[#allocation2 + $0x9] sm:$0xff] %vm658_vm1, %v4159_v3 }
 0x1b7 PF: > { %p3484_p12 = scmp.eq.s32.totalorder %s4140_s17, 1 }
 0x1b9   : > { %1162 = sbr.rel (%p3484_p12) target bundleno = 620 (0x26c), region = 76 }
 0x1be   : > { %v1165_v35 = vld [vmem:[%s5649_s4] sm:$0xf] }
 0x1bf   : > { %v1179_v38 = vsel %vm683_vm0, %v1165_v35, 0  ;;  %v3594_v49 = vld [vmem:[%s567_s13] sm:$0xff] }
 0x1c0   : > { %1188 = vmatpush.bf16.msra.mxu0 %v1179_v38  ;;  %v3733_v19 = vld [vmem:[%s5650_s5] ss:$0 sm:$0xff] }
 0x1c3   : > { %3489 = vmatmul.msk.bf16.vlgmr.msra.gmra.mxu0 %vm658_vm1, %v3594_v49 }
 0x240   : > { %v1190_v28 = vpop.f32.mrf.mxu0 }
 0x241   : > { %v1191_v39 = vadd.f32 %v3733_v19, %v1190_v28 }
 0x243   : > { %v1195_v41 = vsub.f32 0.0, %v1191_v39 }
 0x245   : > { %v1197_v21 = vmul.f32 1.442695, %v1195_v41 }
 0x247   : > { %3734 = vpow2.f32 %v1197_v21 }
 0x248   : > { %v1192_v16 = vpop.f32.mrf.mxu0 }
 0x249   : > { %v1193_v15 = vadd.f32 %v3733_v19, %v1192_v16 }
 0x24b   : > { %v1196_v29 = vsub.f32 0.0, %v1193_v15 }
 0x24d   : > { %v3735_v42 = vpop.eup %3734  ;;  %v1199_v44 = vmul.f32 1.442695, %v1196_v29 }
 0x24e   : > { %v1201_v36 = vadd.f32 1.0, %v3735_v42 }
 0x24f   : > { %3736 = vpow2.f32 %v1199_v44 }
 0x250   : > { %3738 = vrcp.f32 %v1201_v36  ;;  %v1214_v48 = vand.u32 2147483648, %v1201_v36  ;;  %v1212_v53 = vand.u32 2147483647, %v1201_v36  ;;  %vm1208_vm7 = vweird.f32 %v1201_v36 }
 0x252   : > { %v1215_v56 = vor.u32 1.1754944e-38, %v1214_v48  ;;  %vm1213_vm9 = vcmp.eq.f32.partialorder %v1212_v53, 8.507059e+37 }
 0x255   : > { %v3737_v47 = vpop.eup %3736 }
 0x256   : > { %v3739_v40 = vpop.eup %3738  ;;  %v1202_v34 = vadd.f32 1.0, %v3737_v47 }
 0x257   : > { %v1204_v30 = vmul.f32 %v3739_v40, %v1201_v36  ;;  %vm1209_vm6 = vweird.f32 %v3739_v40 }
 0x258   : > { %3740 = vrcp.f32 %v1202_v34  ;;  %vm1210_vm8 = vmor %vm1208_vm7, %vm1209_vm6  ;;  %v1229_v1 = vand.u32 2147483648, %v1202_v34  ;;  %v1227_v43 = vand.u32 2147483647, %v1202_v34  ;;  %vm1223_vm11 = vweird.f32 %v1202_v34 }
 0x259   : > { %v1205_v63 = vsub.f32 1.0, %v1204_v30 }
 0x25a   : > { %v1230_v13 = vor.u32 1.1754944e-38, %v1229_v1  ;;  %vm1228_vm12 = vcmp.eq.f32.partialorder %v1227_v43, 8.507059e+37 }
 0x25b   : > { %v1206_v51 = vmul.f32 %v3739_v40, %v1205_v63 }
 0x25d   : > { %v1207_v32 = vadd.f32 %v3739_v40, %v1206_v51 }
 0x25e   : > { %v3741_v54 = vpop.eup %3740 }
 0x25f   : > { %v1211_v59 = vsel %vm1210_vm8, %v3739_v40, %v1207_v32  ;;  %v1219_v20 = vmul.f32 %v3741_v54, %v1202_v34  ;;  %vm1224_vm10 = vweird.f32 %v3741_v54 }
 0x260   : > { %v1216_v61 = vsel %vm1213_vm9, %v1215_v56, %v1211_v59  ;;  %vm1225_vm5 = vmor %vm1223_vm11, %vm1224_vm10 }
 0x261   : > { %v1217_v62 = vmul.f32 %v1216_v61, %v1191_v39  ;;  %v1220_v0 = vsub.f32 1.0, %v1219_v20 }
 0x263   : > { %1234 = vst.msk [vmem:[#allocation2 + $0xd9] sm:$0xff] %vm658_vm1, %v1217_v62  ;;  %v1221_v12 = vmul.f32 %v3741_v54, %v1220_v0 }
 0x265   : > { %v1222_v55 = vadd.f32 %v3741_v54, %v1221_v12 }
 0x267   : > { %v1226_v46 = vsel %vm1225_vm5, %v3741_v54, %v1222_v55 }
 0x268   : > { %v1231_v14 = vsel %vm1228_vm12, %v1230_v13, %v1226_v46 }
 0x269   : > { %v1232_v45 = vmul.f32 %v1231_v14, %v1193_v15 }
 0x26b   : > { %1235 = vst.msk [vmem:[#allocation2 + $0xe1] sm:$0xff] %vm658_vm1, %v1232_v45 }
 0x26c PF: > { %p3490_p13 = scmp.ne.s32.totalorder %s4140_s17, 1 }
 0x26e   : > { %1238 = sbr.rel (%p3490_p13) target bundleno = 630 (0x276), region = 80 }
 0x273   : > { %v4160_v18 = vmov 0.0  }
 0x274   : > { %1240 = vst.msk [vmem:[#allocation2 + $0xd9] sm:$0xff] %vm658_vm1, %v4160_v18 }
 0x275   : > { %1241 = vst.msk [vmem:[#allocation2 + $0xe1] sm:$0xff] %vm658_vm1, %v4160_v18 }
 0x276 PF: > { %vm1290_vm13 = vcmask 1046528   ;;  %v4703_v17 = vld [vmem:[#allocation2 + $0xc0] sm:$0xff]  ;;  %v4705_v60 = vld [vmem:[#allocation2 + $0xc8] sm:$0xff]  ;;  %v1535_v58 = vld [vmem:[#allocation2 + $0xd0] sm:$0x3]  ;;  %vm1379_vm14 = vcmask 1045504  }
 0x277   : > { %v1595_v22 = vrot.slane %v4703_v17, 1  ;;  %v4709_v24 = vrot.slane %v4705_v60, 1  ;;  %v1598_v25 = vrot.slane %v1535_v58, 1  ;;  %v4711_v50 = vld [vmem:[#allocation2 + $0xa8] sm:$0xff]  ;;  %v4713_v26 = vld [vmem:[#allocation2 + $0xb0] sm:$0xff]  ;;  %v1686_v31 = vrot.slane %v1535_v58, 2 }
 0x278   : > { %v1532_v52 = vld [vmem:[#allocation2 + $0xb8] sm:$0x3]  ;;  %v1590_v11 = vrot.slane %v4711_v50, 1  ;;  %v4717_v57 = vrot.slane %v4713_v26, 1  ;;  %v1683_v35 = vrot.slane %v4703_v17, 2  ;;  %v4732_v38 = vrot.slane %v4705_v60, 2 }
 0x279   : > { %v4721_v33 = vsel %vm1290_vm13, %v1595_v22, %v4709_v24  ;;  %v1599_v27 = vsel %vm1290_vm13, %v4709_v24, %v1598_v25  ;;  %v1593_v37 = vrot.slane %v1532_v52, 1  ;;  %v1681_v19 = vrot.slane %v1532_v52, 2  ;;  %s4161_s3 = smov 8   ;;  %v4742_v21 = vld [vmem:[#allocation2 + $0x90] sm:$0xff]  ;;  %v4744_v16 = vld [vmem:[#allocation2 + $0x98] sm:$0xff]  ;;  %s4162_s17 = smov 16  }
 0x27a   : > { %v3752_v23 = vpack.i.bf16 %v1599_v27, %v4721_v33  ;;  %v4728_v3 = vsel %vm1290_vm13, %v1590_v11, %v4717_v57  ;;  %v1678_v28 = vrot.slane %v4711_v50, 2  ;;  %v4738_v39 = vrot.slane %v4713_v26, 2  ;;  %v4752_v42 = vld [vmem:[#allocation2 + $0x30] sm:$0xff]  ;;  %v1529_v44 = vld [vmem:[#allocation2 + $0xa0] sm:$0x3]  ;;  %v4755_v36 = vld [vmem:[#allocation2 + $0x38] sm:$0xff] }
 0x27b   : > { %v1594_v49 = vsel %vm1290_vm13, %v4717_v57, %v1593_v37  ;;  %v4748_v15 = vsel %vm1379_vm14, %v1683_v35, %v4732_v38  ;;  %v1687_v29 = vsel %vm1379_vm14, %v4732_v38, %v1686_v31  ;;  %v1954_v47 = vld [vmem:[#allocation2 + $0x40] sm:$0x3]  ;;  %v1585_v30 = vrot.slane %v4742_v21, 1  ;;  %v4799_v45 = vld [vmem:[#allocation2 + $0x8] sm:$0xff]  ;;  %v1244_v18 = vld [vmem:[#allocation2 + $0x10] sm:$0x3] }
 0x27c   : > { %3753 = vrot.lane.b32.xlu1 %v3752_v23, %s4161_s3  ;;  %v3742_v41 = vpack.i.bf16 %v1594_v49, %v4728_v3  ;;  %v4759_v40 = vsel %vm1379_vm14, %v1678_v28, %v4738_v39  ;;  %v1682_v34 = vsel %vm1379_vm14, %v4738_v39, %v1681_v19  ;;  %v4765_v63 = vrot.slane %v4744_v16, 1  ;;  %v4797_v14 = vld [vmem:[#allocation2] sm:$0xff]  ;;  %v4814_v11 = vld [vmem:[#allocation2 + $0x18] sm:$0xff]  ;;  %v1514_v37 = vld [vmem:[#allocation2 + $0x28] sm:$0x3] }
 0x27d   : > { %v3757_v48 = vpack.i.bf16 %v1687_v29, %v4748_v15  ;;  %v1588_v51 = vrot.slane %v1529_v44, 1  ;;  %v2088_v53 = vrot.slane %v4752_v42, 2  ;;  %v4770_v32 = vrot.slane %v4755_v36, 2  ;;  %v4816_v27 = vld [vmem:[#allocation2 + $0x20] sm:$0xff] }
 0x27e   : > { %3743 = vrot.lane.b32.xlu0 %v3742_v41, %s4161_s3  ;;  %v2091_v54 = vrot.slane %v1954_v47, 2  ;;  %v4774_v56 = vsel %vm1290_vm13, %v1585_v30, %v4765_v63  ;;  %v3747_v59 = vpack.i.bf16 %v1682_v34, %v4759_v40  ;;  %v1676_v61 = vrot.slane %v1529_v44, 2 }
 0x27f   : > { %v1589_v20 = vsel %vm1290_vm13, %v4765_v63, %v1588_v51  ;;  %v2000_v62 = vrot.slane %v4752_v42, 1  ;;  %v4781_v0 = vrot.slane %v4755_v36, 1  ;;  %v2003_v1 = vrot.slane %v1954_v47, 1 }
 0x280   : > { %v3762_v12 = vpack.i.bf16 %v1589_v20, %v4774_v56  ;;  %v1673_v43 = vrot.slane %v4742_v21, 2  ;;  %v4787_v55 = vrot.slane %v4744_v16, 2  ;;  %v4791_v13 = vsel %vm1379_vm14, %v2088_v53, %v4770_v32  ;;  %v4831_v53 = vld [vmem:[#allocation2 + $0x48] sm:$0xff] }
 0x281   : > { %v2092_v46 = vsel %vm1379_vm14, %v4770_v32, %v2091_v54  ;;  %v4809_v25 = vsel %vm1290_vm13, %v2000_v62, %v4781_v0  ;;  %v2004_v31 = vsel %vm1290_vm13, %v4781_v0, %v2003_v1  ;;  %v1380_v23 = vrot.slane %v4797_v14, 2  ;;  %v4833_v54 = vld [vmem:[#allocation2 + $0x50] sm:$0xff] }
 0x282   : > { %3763 = vrot.lane.b32.xlu2 %v3762_v12, %s4161_s3  ;;  %v4803_v58 = vsel %vm1379_vm14, %v1673_v43, %v4787_v55  ;;  %v1677_v22 = vsel %vm1379_vm14, %v4787_v55, %v1676_v61  ;;  %v3777_v52 = vpack.i.bf16 %v2092_v46, %v4791_v13  ;;  %v1381_v35 = vrot.slane %v4799_v45, 2 }
 0x283   : > { %v1383_v49 = vrot.slane %v1244_v18, 2  ;;  %v3767_v19 = vpack.i.bf16 %v1677_v22, %v4803_v58  ;;  %v3772_v28 = vpack.i.bf16 %v2004_v31, %v4809_v25  ;;  %v1291_v41 = vrot.slane %v4797_v14, 1 }
 0x284   : > { %3758 = vrot.lane.b32.xlu1 %v3757_v48, %s4162_s17  ;;  %v1292_v29 = vrot.slane %v4799_v45, 1  ;;  %v1560_v44 = vrot.slane %v4814_v11, 1  ;;  %v1561_v47 = vrot.slane %v4816_v27, 1  ;;  %v1563_v34 = vrot.slane %v1514_v37, 1 }
 0x285   : > { %v1294_v30 = vrot.slane %v1244_v18, 1  ;;  %v1382_v48 = vsel %vm1379_vm14, %v1380_v23, %v1381_v35  ;;  %v1384_v51 = vsel %vm1379_vm14, %v1381_v35, %v1383_v49  ;;  %v2093_v43 = vrot.slane %v4831_v53, 2 }
 0x286   : > { %3748 = vrot.lane.b32.xlu0 %v3747_v59, %s4162_s17  ;;  %v1957_v59 = vld [vmem:[#allocation2 + $0x58] sm:$0x3]  ;;  %v1293_v20 = vsel %vm1290_vm13, %v1291_v41, %v1292_v29  ;;  %v1562_v62 = vsel %vm1290_vm13, %v1560_v44, %v1561_v47  ;;  %v1564_v1 = vsel %vm1290_vm13, %v1561_v47, %v1563_v34  ;;  %v3792_v12 = vpack.i.bf16 %v1384_v51, %v1382_v48  ;;  %v1517_v51 = vld [vmem:[#allocation2 + $0x40] sm:$0x3] }
 0x287   : > { %v1295_v61 = vsel %vm1290_vm13, %v1292_v29, %v1294_v30  ;;  %v4841_v46 = vrot.slane %v4833_v54, 2  ;;  %v2096_v18 = vrot.slane %v1957_v59, 2  ;;  %v3787_v31 = vpack.i.bf16 %v1564_v1, %v1562_v62 }
 0x288   : > { %v3782_v22 = vpack.i.bf16 %v1295_v61, %v1293_v20  ;;  %v2005_v23 = vrot.slane %v4831_v53, 1  ;;  %v4845_v35 = vrot.slane %v4833_v54, 1  ;;  %v2008_v49 = vrot.slane %v1957_v59, 1 }
 0x289   : > { %v4852_v41 = vsel %vm1379_vm14, %v2093_v43, %v4841_v46  ;;  %v2097_v29 = vsel %vm1379_vm14, %v4841_v46, %v2096_v18  ;;  %v1568_v43 = vrot.slane %v1517_v51, 1  ;;  %vm1484_vm15 = vcmask 130048  }
 0x28a   : > { %3768 = vrot.lane.b32.xlu2 %v3767_v19, %s4162_s17  ;;  %v1385_v19 = vrot.slane %v4814_v11, 2  ;;  %v4861_v34 = vsel %vm1290_vm13, %v2005_v23, %v4845_v35  ;;  %v2009_v30 = vsel %vm1290_vm13, %v4845_v35, %v2008_v49  ;;  %v3807_v48 = vpack.i.bf16 %v2097_v29, %v4852_v41 }
 0x28b   : > { %v3802_v1 = vpack.i.bf16 %v2009_v30, %v4861_v34  ;;  %v1569_v49 = vsel %vm1290_vm13, %v4781_v0, %v1568_v43  ;;  %vm1789_vm2 = vcmask 195584  }
 0x28c   : > { %3778 = vrot.lane.b32.xlu1 %v3777_v52, %s4162_s17  ;;  %v1651_v52 = vrot.slane %v1514_v37, 2  ;;  %v1247_v37 = vld [vmem:[#allocation2 + $0x28] sm:$0x3]  ;;  %v3817_v30 = vpack.i.bf16 %v1569_v49, %v4809_v25 }
 0x28d   : > { %v1388_v20 = vrot.slane %v1247_v37, 2 }
 0x28e   : > { %3773 = vrot.lane.b32.xlu0 %v3772_v28, %s4161_s3  ;;  %v1386_v28 = vrot.slane %v4816_v27, 2 }
 0x290   : > { %v1652_v44 = vsel %vm1379_vm14, %v1386_v28, %v1651_v52  ;;  %v1387_v59 = vsel %vm1379_vm14, %v1385_v19, %v1386_v28  ;;  %v1389_v18 = vsel %vm1379_vm14, %v1386_v28, %v1388_v20  ;;  %v1960_v52 = vld [vmem:[#allocation2 + $0x70] sm:$0x3] }
 0x291   : > { %v3797_v61 = vpack.i.bf16 %v1652_v44, %v1387_v59  ;;  %v3822_v19 = vpack.i.bf16 %v1389_v18, %v1387_v59  ;;  %v2101_v28 = vrot.slane %v1960_v52, 2 }
 0x292   : > { %3783 = vrot.lane.b32.xlu2 %v3782_v22, %s4161_s3  ;;  %v4872_v22 = vld [vmem:[#allocation2 + $0x60] sm:$0xff] }
 0x293   : > { %v2098_v29 = vrot.slane %v4872_v22, 2  ;;  %v2010_v20 = vrot.slane %v4872_v22, 1 }
 0x294   : > { %3793 = vrot.lane.b32.xlu1 %v3792_v12, %s4162_s17  ;;  %v1299_v12 = vrot.slane %v1247_v37, 1 }
 0x296   : > { %3788 = vrot.lane.b32.xlu0 %v3787_v31, %s4161_s3  ;;  %v4874_v31 = vld [vmem:[#allocation2 + $0x68] sm:$0xff]  ;;  %v1300_v23 = vsel %vm1290_vm13, %v1561_v47, %v1299_v12  ;;  %v2013_v47 = vrot.slane %v1960_v52, 1  ;;  %v1520_v52 = vld [vmem:[#allocation2 + $0x58] sm:$0x3] }
 0x297   : > { %v4881_v37 = vrot.slane %v4874_v31, 2  ;;  %v3812_v44 = vpack.i.bf16 %v1300_v23, %v1562_v62  ;;  %v1250_v62 = vld [vmem:[#allocation2 + $0x40] sm:$0x3] }
 0x298   : > { %v1393_v23 = vrot.slane %v1250_v62, 2 }
 0x299   : > { %v4891_v59 = vsel %vm1379_vm14, %v2098_v29, %v4881_v37  ;;  %v1304_v29 = vrot.slane %v1250_v62, 1 }
 0x29a   : > { %3798 = vrot.lane.b32.xlu2 %v3797_v61, %s4162_s17  ;;  %v4886_v61 = vrot.slane %v4874_v31, 1 }
 0x29c   : > { %3808 = vrot.lane.b32.xlu1 %v3807_v48, %s4162_s17  ;;  %v1656_v48 = vrot.slane %v1517_v51, 2  ;;  %v4901_v12 = vsel %vm1290_vm13, %v2010_v20, %v4886_v61  ;;  %v2014_v43 = vsel %vm1290_vm13, %v4886_v61, %v2013_v47  ;;  %v1963_v20 = vld [vmem:[#allocation2 + $0x88] sm:$0x3]  ;;  %v1305_v47 = vsel %vm1290_vm13, %v4781_v0, %v1304_v29 }
 0x29d   : > { %v2018_v29 = vrot.slane %v1963_v20, 1 }
 0x29e   : > { %3803 = vrot.lane.b32.xlu0 %v3802_v1, %s4161_s3  ;;  %v2102_v1 = vsel %vm1379_vm14, %v4881_v37, %v2101_v28  ;;  %v1657_v51 = vsel %vm1379_vm14, %v4770_v32, %v1656_v48  ;;  %v1573_v28 = vrot.slane %v1520_v52, 1  ;;  %v4915_v48 = vld [vmem:[#allocation2 + $0x80] sm:$0xff] }
 0x29f   : > { %v3837_v18 = vpack.i.bf16 %v2102_v1, %v4891_v59  ;;  %v3827_v49 = vpack.i.bf16 %v1657_v51, %v4791_v13  ;;  %v4930_v0 = vrot.slane %v4915_v48, 1 }
 0x2a0   : > { %v1574_v1 = vsel %vm1290_vm13, %v4845_v35, %v1573_v28 }
 0x2a2   : > { %3813 = vrot.lane.b32.xlu2 %v3812_v44, %s4161_s3  ;;  %v1394_v44 = vsel %vm1379_vm14, %v4770_v32, %v1393_v23  ;;  %v4924_v32 = vrot.slane %v4915_v48, 2  ;;  %v3847_v23 = vpack.i.bf16 %v1574_v1, %v4861_v34  ;;  %v1523_v1 = vld [vmem:[#allocation2 + $0x70] sm:$0x3] }
 0x2a3   : > { %v3852_v62 = vpack.i.bf16 %v1394_v44, %v4791_v13  ;;  %v1666_v10 = vrot.slane %v1523_v1, 2 }
 0x2a4   : > { %3823 = vrot.lane.b32.xlu1 %v3822_v19, %s4162_s17  ;;  %v3832_v19 = vpack.i.bf16 %v2014_v43, %v4901_v12  ;;  %v2106_v43 = vrot.slane %v1963_v20, 2  ;;  %v2019_v20 = vsel %vm1290_vm13, %v4930_v0, %v2018_v29 }
 0x2a6   : > { %3818 = vrot.lane.b32.xlu0 %v3817_v30, %s4161_s3  ;;  %v4913_v30 = vld [vmem:[#allocation2 + $0x78] sm:$0xff]  ;;  %v2107_v28 = vsel %vm1379_vm14, %v4924_v32, %v2106_v43 }
 0x2a7   : > { %v2103_v51 = vrot.slane %v4913_v30, 2 }
 0x2a9   : > { %v4935_v13 = vsel %vm1379_vm14, %v2103_v51, %v4924_v32 }
 0x2aa   : > { %3828 = vrot.lane.b32.xlu2 %v3827_v49, %s4162_s17  ;;  %v1661_v49 = vrot.slane %v1520_v52, 2 }
 0x2ac   : > { %3838 = vrot.lane.b32.xlu1 %v3837_v18, %s4162_s17  ;;  %v3842_v18 = vpack.i.bf16 %v1305_v47, %v4809_v25  ;;  %v1253_v25 = vld [vmem:[#allocation2 + $0x58] sm:$0x3]  ;;  %v1662_v52 = vsel %vm1379_vm14, %v4841_v46, %v1661_v49  ;;  %v3867_v47 = vpack.i.bf16 %v2107_v28, %v4935_v13 }
 0x2ad   : > { %v3857_v51 = vpack.i.bf16 %v1662_v52, %v4852_v41 }
 0x2ae   : > { %3833 = vrot.lane.b32.xlu0 %v3832_v19, %s4161_s3  ;;  %v2015_v19 = vrot.slane %v4913_v30, 1 }
 0x2b0   : > { %v4945_v44 = vsel %vm1290_vm13, %v2015_v19, %v4930_v0  ;;  %v1966_v19 = vld [vmem:[#allocation2 + $0xa0] sm:$0x3] }
 0x2b1   : > { %v3862_v43 = vpack.i.bf16 %v2019_v20, %v4945_v44 }
 0x2b2   : > { %3843 = vrot.lane.b32.xlu2 %v3842_v18, %s4161_s3  ;;  %v1309_v18 = vrot.slane %v1253_v25, 1 }
 0x2b4   : > { %3853 = vrot.lane.b32.xlu1 %v3852_v62, %s4162_s17  ;;  %v1398_v62 = vrot.slane %v1253_v25, 2  ;;  %v1310_v29 = vsel %vm1290_vm13, %v4845_v35, %v1309_v18  ;;  %v2111_v25 = vrot.slane %v1966_v19, 2  ;;  %v1256_v35 = vld [vmem:[#allocation2 + $0x70] sm:$0x3] }
 0x2b5   : > { %v3872_v20 = vpack.i.bf16 %v1310_v29, %v4861_v34 }
 0x2b6   : > { %3848 = vrot.lane.b32.xlu0 %v3847_v23, %s4161_s3  ;;  %v1578_v23 = vrot.slane %v1523_v1, 1  ;;  %v1399_v49 = vsel %vm1379_vm14, %v4841_v46, %v1398_v62  ;;  %v2023_v46 = vrot.slane %v1966_v19, 1  ;;  %v2112_v62 = vsel %vm1379_vm14, %v4787_v55, %v2111_v25  ;;  %v1526_v1 = vld [vmem:[#allocation2 + $0x88] sm:$0x3]  ;;  %v1969_v25 = vld [vmem:[#allocation2 + $0xb8] sm:$0x3] }
 0x2b7   : > { %v3882_v52 = vpack.i.bf16 %v1399_v49, %v4852_v41  ;;  %v1667_v41 = vsel %vm1379_vm14, %v4881_v37, %v1666_v10  ;;  %v1314_v49 = vrot.slane %v1256_v35, 1  ;;  %v1583_v19 = vrot.slane %v1526_v1, 1 }
 0x2b8   : > { %v1579_v28 = vsel %vm1290_vm13, %v4886_v61, %v1578_v23  ;;  %v2024_v34 = vsel %vm1290_vm13, %v4765_v63, %v2023_v46  ;;  %v3887_v18 = vpack.i.bf16 %v1667_v41, %v4891_v59  ;;  %v2028_v41 = vrot.slane %v1969_v25, 1 }
 0x2b9   : > { %v3892_v23 = vpack.i.bf16 %v2024_v34, %v4774_v56  ;;  %v1315_v10 = vsel %vm1290_vm13, %v4886_v61, %v1314_v49 }
 0x2ba   : > { %3858 = vrot.lane.b32.xlu2 %v3857_v51, %s4162_s17  ;;  %v3897_v51 = vpack.i.bf16 %v2112_v62, %v4803_v58  ;;  %v1671_v62 = vrot.slane %v1526_v1, 2  ;;  %v2029_v1 = vsel %vm1290_vm13, %v4717_v57, %v2028_v41 }
 0x2bc   : > { %3868 = vrot.lane.b32.xlu1 %v3867_v47, %s4162_s17  ;;  %v3877_v47 = vpack.i.bf16 %v1579_v28, %v4901_v12  ;;  %v1584_v28 = vsel %vm1290_vm13, %v4930_v0, %v1583_v19  ;;  %v3596_v19 = vld [vmem:[%s5651_s6 + $0xc] sm:$0xff] }
 0x2bd   : > { %v3907_v46 = vpack.i.bf16 %v1584_v28, %v4945_v44 }
 0x2be   : > { %3863 = vrot.lane.b32.xlu0 %v3862_v43, %s4161_s3  ;;  %v1403_v43 = vrot.slane %v1256_v35, 2 }
 0x2c0   : > { %v1404_v29 = vsel %vm1379_vm14, %v4881_v37, %v1403_v43  ;;  %v3493_v37 = vld [vmem:[%s5651_s6 + $0x14] sm:$0xf]  ;;  %v1259_v43 = vld [vmem:[#allocation2 + $0x88] sm:$0x3] }
 0x2c1   : > { %v1785_v35 = vunpack.c.l.b16 %v3493_v37  ;;  %v1408_v28 = vrot.slane %v1259_v43, 2 }
 0x2c2   : > { %3873 = vrot.lane.b32.xlu2 %v3872_v20, %s4161_s3  ;;  %v2116_v20 = vrot.slane %v1969_v25, 2  ;;  %v1262_v25 = vld [vmem:[#allocation2 + $0xa0] sm:$0x3] }
 0x2c3   : > { %v1787_v61 = vpack.c.b16 %v1785_v35, %v1785_v35  ;;  %v1409_v37 = vsel %vm1379_vm14, %v4924_v32, %v1408_v28 }
 0x2c4   : > { %3883 = vrot.lane.b32.xlu1 %v3882_v52, %s4162_s17  ;;  %v3912_v52 = vpack.i.bf16 %v1404_v29, %v4891_v59  ;;  %v2117_v34 = vsel %vm1379_vm14, %v4738_v39, %v2116_v20  ;;  %v4996_v59 = vld [vmem:[#allocation2 + $0xd0] sm:$0x3]  ;;  %v3922_v29 = vpack.i.bf16 %v2029_v1, %v4728_v3 }
 0x2c6   : > { %3878 = vrot.lane.b32.xlu0 %v3877_v47, %s4161_s3  ;;  %v3902_v47 = vpack.i.bf16 %v1315_v10, %v4901_v12  ;;  %v1672_v12 = vsel %vm1379_vm14, %v4924_v32, %v1671_v62  ;;  %v1319_v10 = vrot.slane %v1259_v43, 1  ;;  %v1324_v43 = vrot.slane %v1262_v25, 1 }
 0x2c7   : > { %v3917_v49 = vpack.i.bf16 %v1672_v12, %v4935_v13 }
 0x2c8   : > { %v1320_v20 = vsel %vm1290_vm13, %v4930_v0, %v1319_v10  ;;  %v3937_v0 = vpack.i.bf16 %v1409_v37, %v4935_v13 }
 0x2c9   : > { %v3932_v41 = vpack.i.bf16 %v1320_v20, %v4945_v44 }
 0x2ca   : > { %3888 = vrot.lane.b32.xlu2 %v3887_v18, %s4162_s17  ;;  %v3927_v18 = vpack.i.bf16 %v2117_v34, %v4759_v40  ;;  %v1511_v34 = vld [vmem:[%s5651_s6 + $0x8] sm:$0xf] }
 0x2cb   : > { %v1871_v12 = vunpack.c.l.b16 %v1511_v34 }
 0x2cc   : > { %3898 = vrot.lane.b32.xlu1 %v3897_v51, %s4162_s17  ;;  %v1815_v51 = vsel %vm683_vm0, %v1787_v61, 0 }
 0x2cd   : > { %3609 = vmatpush.bf16.msra.mxu1 %v1815_v51  ;;  %3610 = vmatpush.bf16.msra.mxu2 %v1815_v51 }
 0x2ce   : > { %3893 = vrot.lane.b32.xlu0 %v3892_v23, %s4161_s3  ;;  %1823 = vmatpush.bf16.msra.mxu0 %v1815_v51  ;;  %v2033_v23 = vrot.slane %v4996_v59, 1 }
 0x2d1   : > { %3611 = vmatpush.bf16.msra.mxu1 %v3596_v19  ;;  %3612 = vmatpush.bf16.msra.mxu2 %v3596_v19 }
 0x2d2   : > { %3903 = vrot.lane.b32.xlu2 %v3902_v47, %s4161_s3  ;;  %1824 = vmatpush.bf16.msra.mxu0 %v3596_v19  ;;  %v3520_v47 = vld [vmem:[%s5651_s6 + $0x20] sm:$0xf]  ;;  %v1325_v19 = vsel %vm1290_vm13, %v4765_v63, %v1324_v43 }
 0x2d3   : > { %v2225_v62 = vunpack.c.l.b16 %v3520_v47 }
 0x2d4   : > { %3913 = vrot.lane.b32.xlu1 %v3912_v52, %s4162_s17  ;;  %v2034_v52 = vsel %vm1290_vm13, %v4709_v24, %v2033_v23  ;;  %v1413_v24 = vrot.slane %v1262_v25, 2  ;;  %v3595_v25 = vld [vmem:[%s5651_s6] sm:$0xff] }
 0x2d5   : > { %v3942_v35 = vpack.i.bf16 %v2034_v52, %v4721_v33  ;;  %v2227_v61 = vpack.c.b16 %v2225_v62, %v2225_v62  ;;  %v1873_v33 = vpack.c.b16 %v1871_v12, %v1871_v12  ;;  %v1975_v62 = vld [vmem:[#allocation2 + $0xe8] sm:$0x3] }
 0x2d6   : > { %3908 = vrot.lane.b32.xlu0 %v3907_v46, %s4161_s3  ;;  %v1414_v44 = vsel %vm1379_vm14, %v4787_v55, %v1413_v24 }
 0x2d7   : > { %v2254_v32 = vsel %vm683_vm0, %v2227_v61, 0  ;;  %v1900_v13 = vsel %vm683_vm0, %v1873_v33, 0  ;;  %v3957_v55 = vpack.i.bf16 %v1414_v44, %v4803_v58 }
 0x2d8   : > { %2262 = vmatpush.bf16.msrb.mxu2 %v2254_v32  ;;  %1908 = vmatpush.bf16.msrb.mxu1 %v1900_v13  ;;  %v2038_v32 = vrot.slane %v1975_v62, 1 }
 0x2da   : > { %3918 = vrot.lane.b32.xlu2 %v3917_v49, %s4162_s17 }
 0x2dc   : > { %3928 = vrot.lane.b32.xlu1 %v3927_v18, %s4162_s17  ;;  %v3764_v46 = vpop.permute.xlu2 %3763  ;;  %v5034_v18 = vld [vmem:[#allocation2 + $0xb8] sm:$0x3]  ;;  %1909 = vmatpush.bf16.msrb.mxu1 %v3595_v25 }
 0x2dd   : > { %v3766_v51 = vunpack.i.h.bf16 %v3764_v46  ;;  %v3765_v1 = vunpack.i.l.bf16 %v3764_v46  ;;  %v1329_v52 = vrot.slane %v5034_v18, 1  ;;  %v5061_v46 = vld [vmem:[#allocation2 + $0xe0] sm:$0xff]  ;;  %v1418_v25 = vrot.slane %v5034_v18, 2 }
 0x2de   : > { %3923 = vrot.lane.b32.xlu0 %v3922_v29, %s4161_s3  ;;  %v2124_v24 = vrot.slane %v5061_v46, 2  ;;  %v2036_v43 = vrot.slane %v5061_v46, 1 }
 0x2df   : > { %v1747_v23 = vsel %vm658_vm1, %v4744_v16, %v3766_v51  ;;  %v1746_v49 = vsel %vm658_vm1, %v4742_v21, %v3765_v1  ;;  %v2121_v16 = vrot.slane %v4996_v59, 2  ;;  %v3952_v21 = vpack.i.bf16 %v1325_v19, %v4774_v56  ;;  %v5059_v56 = vld [vmem:[#allocation2 + $0xd8] sm:$0xff] }
 0x2e0   : > { %v1330_v59 = vsel %vm1290_vm13, %v4717_v57, %v1329_v52  ;;  %v2035_v1 = vrot.slane %v5059_v56, 1  ;;  %v2039_v44 = vsel %vm1290_vm13, %v2036_v43, %v2038_v32 }
 0x2e1   : > { %v2122_v58 = vsel %vm1379_vm14, %v4732_v38, %v2121_v16  ;;  %v3597_v38 = vld [vmem:[%s5651_s6 + $0x18] sm:$0xff]  ;;  %v3972_v34 = vpack.i.bf16 %v1330_v59, %v4728_v3 }
 0x2e2   : > { %3933 = vrot.lane.b32.xlu2 %v3932_v41, %s4161_s3  ;;  %v3947_v37 = vpack.i.bf16 %v2122_v58, %v4748_v15  ;;  %v2123_v15 = vrot.slane %v5059_v56, 2  ;;  %v2126_v41 = vrot.slane %v1975_v62, 2  ;;  %2263 = vmatpush.bf16.msrb.mxu2 %v3597_v38  ;;  %v2037_v33 = vsel %vm1290_vm13, %v2035_v1, %v2036_v43 }
 0x2e4   : > { %3943 = vrot.lane.b32.xlu1 %v3942_v35, %s4161_s3  ;;  %v3769_v29 = vpop.permute.xlu2 %3768  ;;  %v2127_v12 = vsel %vm1379_vm14, %v2124_v24, %v2126_v41 }
 0x2e5   : > { %v3771_v10 = vunpack.i.h.bf16 %v3769_v29  ;;  %v3770_v28 = vunpack.i.l.bf16 %v3769_v29 }
 0x2e6   : > { %3938 = vrot.lane.b32.xlu0 %v3937_v0, %s4162_s17  ;;  %v2125_v0 = vsel %vm1379_vm14, %v2123_v15, %v2124_v24 }
 0x2e7   : > { %v1762_v20 = vsel %vm1484_vm15, %v1746_v49, %v3770_v28  ;;  %v1763_v63 = vsel %vm1484_vm15, %v1747_v23, %v3771_v10  ;;  %v3967_v51 = vpack.i.bf16 %v2127_v12, %v2125_v0  ;;  %v3962_v49 = vpack.i.bf16 %v2039_v44, %v2037_v33 }
 0x2e8   : > { %v1773_v47 = vpack.c.bf16 %v1763_v63, %v1762_v20  ;;  %v1419_v63 = vsel %vm1379_vm14, %v4738_v39, %v1418_v25 }
 0x2ea   : > { %3503 = vmatmul.msk.bf16.vlgmr.msra.gmra.mxu1 %vm1789_vm2, %v1773_v47  ;;  %3948 = vrot.lane.b32.xlu2 %v3947_v37, %s4162_s17  ;;  %v3977_v47 = vpack.i.bf16 %v1419_v63, %v4759_v40 }
 0x2ec   : > { %3958 = vrot.lane.b32.xlu1 %v3957_v55, %s4162_s17  ;;  %v3784_v57 = vpop.permute.xlu2 %3783 }
 0x2ed   : > { %v3786_v18 = vunpack.i.h.bf16 %v3784_v57  ;;  %v3785_v62 = vunpack.i.l.bf16 %v3784_v57 }
 0x2ee   : > { %v3754_v35 = vpop.permute.xlu1 %3753  ;;  %3953 = vrot.lane.b32.xlu0 %v3952_v21, %s4161_s3 }
 0x2ef   : > { %v3755_v59 = vunpack.i.l.bf16 %v3754_v35  ;;  %v1469_v40 = vsel %vm658_vm1, %v4799_v45, %v3786_v18  ;;  %v1468_v41 = vsel %vm658_vm1, %v4797_v14, %v3785_v62 }
 0x2f0   : > { %v3744_v61 = vpop.permute.xlu0 %3743 }
 0x2f1   : > { %v3746_v13 = vunpack.i.h.bf16 %v3744_v61  ;;  %v3745_v23 = vunpack.i.l.bf16 %v3744_v61  ;;  %v1750_v39 = vsel %vm658_vm1, %v4703_v17, %v3755_v59 }
 0x2f2   : > { %3963 = vrot.lane.b32.xlu2 %v3962_v49, %s4161_s3 }
 0x2f3   : > { %v1749_v28 = vsel %vm658_vm1, %v4713_v26, %v3746_v13  ;;  %v1748_v52 = vsel %vm658_vm1, %v4711_v50, %v3745_v23  ;;  %v3756_v50 = vunpack.i.h.bf16 %v3754_v35 }
 0x2f4   : > { %3973 = vrot.lane.b32.xlu1 %v3972_v34, %s4161_s3  ;;  %v3799_v19 = vpop.permute.xlu2 %3798 }
 0x2f5   : > { %v1751_v24 = vsel %vm658_vm1, %v4705_v60, %v3756_v50  ;;  %v3801_v12 = vunpack.i.h.bf16 %v3799_v19  ;;  %v3800_v57 = vunpack.i.l.bf16 %v3799_v19 }
 0x2f6   : > { %v3759_v3 = vpop.permute.xlu1 %3758  ;;  %3968 = vrot.lane.b32.xlu0 %v3967_v51, %s4162_s17 }
 0x2f7   : > { %v3761_v38 = vunpack.i.h.bf16 %v3759_v3  ;;  %v3760_v15 = vunpack.i.l.bf16 %v3759_v3 }
 0x2f8   : > { %v3749_v29 = vpop.permute.xlu0 %3748 }
 0x2f9   : > { %v3751_v55 = vunpack.i.h.bf16 %v3749_v29  ;;  %v3750_v10 = vunpack.i.l.bf16 %v3749_v29  ;;  %v1766_v51 = vsel %vm1484_vm15, %v1750_v39, %v3760_v15  ;;  %v1767_v1 = vsel %vm1484_vm15, %v1751_v24, %v3761_v38 }
 0x2fa   : > { %3978 = vrot.lane.b32.xlu2 %v3977_v47, %s4162_s17  ;;  %v1775_v13 = vpack.c.bf16 %v1767_v1, %v1766_v51 }
 0x2fb   : > { %v1764_v16 = vsel %vm1484_vm15, %v1748_v52, %v3750_v10  ;;  %v1765_v21 = vsel %vm1484_vm15, %v1749_v28, %v3751_v55 }
 0x2fc   : > { %v1774_v20 = vpack.c.bf16 %v1765_v21, %v1764_v16  ;;  %v3814_v37 = vpop.permute.xlu2 %3813 }
 0x2fd   : > { %v3816_v28 = vunpack.i.h.bf16 %v3814_v37  ;;  %v3815_v52 = vunpack.i.l.bf16 %v3814_v37 }
 0x2fe   : > { %3504 = vmatmul.msk.bf16.vlgmr.msra.gmra.mxu2 %vm1789_vm2, %v1774_v20  ;;  %v3779_v58 = vpop.permute.xlu1 %3778 }
 0x2ff   : > { %v3781_v16 = vunpack.i.h.bf16 %v3779_v58  ;;  %v3780_v21 = vunpack.i.l.bf16 %v3779_v58  ;;  %v1471_v47 = vsel %vm658_vm1, %v4816_v27, %v3816_v28  ;;  %v1470_v50 = vsel %vm658_vm1, %v4814_v11, %v3815_v52 }
 0x300   : > { %v3774_v26 = vpop.permute.xlu0 %3773 }
 0x301   : > { %v3776_v55 = vunpack.i.h.bf16 %v3774_v26  ;;  %v3775_v10 = vunpack.i.l.bf16 %v3774_v26 }
 0x303   : > { %v2177_v20 = vsel %vm658_vm1, %v4755_v36, %v3776_v55  ;;  %v2176_v63 = vsel %vm658_vm1, %v4752_v42, %v3775_v10 }
 0x304   : > { %v3829_v45 = vpop.permute.xlu2 %3828  ;;  %v2193_v37 = vsel %vm1484_vm15, %v2177_v20, %v3781_v16  ;;  %v2192_v62 = vsel %vm1484_vm15, %v2176_v63, %v3780_v21 }
 0x305   : > { %v3831_v38 = vunpack.i.h.bf16 %v3829_v45  ;;  %v3830_v15 = vunpack.i.l.bf16 %v3829_v45 }
 0x306   : > { %v3794_v61 = vpop.permute.xlu1 %3793 }
 0x307   : > { %v3796_v34 = vunpack.i.h.bf16 %v3794_v61  ;;  %v3795_v0 = vunpack.i.l.bf16 %v3794_v61 }
 0x308   : > { %v3789_v35 = vpop.permute.xlu0 %3788 }
 0x309   : > { %v3791_v60 = vunpack.i.h.bf16 %v3789_v35  ;;  %v3790_v43 = vunpack.i.l.bf16 %v3789_v35  ;;  %v1485_v17 = vsel %vm1484_vm15, %v1468_v41, %v3795_v0  ;;  %v1486_v32 = vsel %vm1484_vm15, %v1469_v40, %v3796_v34 }
 0x30a   : > { %v1501_v33 = vpack.c.bf16 %v1486_v32, %v1485_v17  ;;  %v2208_v34 = vpack.c.bf16 %v2193_v37, %v2192_v62 }
 0x30b   : > { %v1737_v14 = vsel %vm658_vm1, %v4816_v27, %v3791_v60  ;;  %v1736_v44 = vsel %vm658_vm1, %v4814_v11, %v3790_v43 }
 0x30c   : > { %3510 = vmatmul.msk.bf16.vlgmr.msrb.gmra.mxu1 %vm1789_vm2, %v1501_v33  ;;  %v1752_v23 = vsel %vm1484_vm15, %v1736_v44, %v3800_v57  ;;  %v1753_v3 = vsel %vm1484_vm15, %v1737_v14, %v3801_v12  ;;  %v3844_v25 = vpop.permute.xlu2 %3843 }
 0x30d   : > { %v1768_v49 = vpack.c.bf16 %v1753_v3, %v1752_v23  ;;  %v3846_v17 = vunpack.i.h.bf16 %v3844_v25  ;;  %v3845_v32 = vunpack.i.l.bf16 %v3844_v25 }
 0x30e   : > { %3505 = vmatmul.msk.bf16.gmra.mxu2 %vm1789_vm2, %v1775_v13  ;;  %v3809_v19 = vpop.permute.xlu1 %3808 }
 0x30f   : > { %3498 = vmatmul.msk.bf16.vlgmr.msra.gmra.mxu0 %vm1789_vm2, %v1768_v49  ;;  %v3811_v45 = vunpack.i.h.bf16 %v3809_v19  ;;  %v3810_v33 = vunpack.i.l.bf16 %v3809_v19  ;;  %v1473_v13 = vsel %vm658_vm1, %v4755_v36, %v3846_v17  ;;  %v1472_v23 = vsel %vm658_vm1, %v4752_v42, %v3845_v32 }
 0x310   : > { %v3804_v29 = vpop.permute.xlu0 %3803 }
 0x311   : > { %v3806_v60 = vunpack.i.h.bf16 %v3804_v29  ;;  %v3805_v43 = vunpack.i.l.bf16 %v3804_v29 }
 0x313   : > { %v2179_v14 = vsel %vm658_vm1, %v4833_v54, %v3806_v60  ;;  %v2178_v44 = vsel %vm658_vm1, %v4831_v53, %v3805_v43 }
 0x314   : > { %v3859_v57 = vpop.permute.xlu2 %3858  ;;  %v2194_v19 = vsel %vm1484_vm15, %v2178_v44, %v3810_v33  ;;  %v2195_v25 = vsel %vm1484_vm15, %v2179_v14, %v3811_v45 }
 0x315   : > { %v3861_v28 = vunpack.i.h.bf16 %v3859_v57  ;;  %v3860_v52 = vunpack.i.l.bf16 %v3859_v57 }
 0x316   : > { %v3824_v59 = vpop.permute.xlu1 %3823 }
 0x317   : > { %v3826_v18 = vunpack.i.h.bf16 %v3824_v59  ;;  %v3825_v26 = vunpack.i.l.bf16 %v3824_v59 }
 0x318   : > { %v3819_v58 = vpop.permute.xlu0 %3818 }
 0x319   : > { %v3821_v24 = vunpack.i.h.bf16 %v3819_v58  ;;  %v3820_v39 = vunpack.i.l.bf16 %v3819_v58  ;;  %v1487_v40 = vsel %vm1484_vm15, %v1470_v50, %v3825_v26  ;;  %v1488_v41 = vsel %vm1484_vm15, %v1471_v47, %v3826_v18 }
 0x31a   : > { %v1502_v27 = vpack.c.bf16 %v1488_v41, %v1487_v40  ;;  %v2209_v50 = vpack.c.bf16 %v2195_v25, %v2194_v19 }
 0x31b   : > { %v1739_v11 = vsel %vm658_vm1, %v4755_v36, %v3821_v24  ;;  %v1738_v61 = vsel %vm658_vm1, %v4752_v42, %v3820_v39 }
 0x31c   : > { %3511 = vmatmul.msk.bf16.gmra.mxu1 %vm1789_vm2, %v1502_v27  ;;  %v1754_v0 = vsel %vm1484_vm15, %v1738_v61, %v3830_v15  ;;  %v1755_v35 = vsel %vm1484_vm15, %v1739_v11, %v3831_v38  ;;  %v3874_v29 = vpop.permute.xlu2 %3873 }
 0x31d   : > { %v1769_v12 = vpack.c.bf16 %v1755_v35, %v1754_v0  ;;  %v3876_v24 = vunpack.i.h.bf16 %v3874_v29  ;;  %v3875_v39 = vunpack.i.l.bf16 %v3874_v29 }
 0x31e   : > { %3525 = vmatmul.msk.bf16.vlgmr.msrb.gmra.mxu2 %vm1789_vm2, %v2208_v34  ;;  %v3839_v51 = vpop.permute.xlu1 %3838 }
 0x31f   : > { %3499 = vmatmul.msk.bf16.gmra.mxu0 %vm1789_vm2, %v1769_v12  ;;  %v3841_v40 = vunpack.i.h.bf16 %v3839_v51  ;;  %v3840_v41 = vunpack.i.l.bf16 %v3839_v51  ;;  %v1475_v61 = vsel %vm658_vm1, %v4833_v54, %v3876_v24  ;;  %v1474_v34 = vsel %vm658_vm1, %v4831_v53, %v3875_v39 }
 0x320   : > { %v3834_v1 = vpop.permute.xlu0 %3833 }
 0x321   : > { %v3836_v58 = vunpack.i.h.bf16 %v3834_v1  ;;  %v3835_v38 = vunpack.i.l.bf16 %v3834_v1 }
 0x323   : > { %v2181_v27 = vsel %vm658_vm1, %v4874_v31, %v3836_v58  ;;  %v2180_v11 = vsel %vm658_vm1, %v4872_v22, %v3835_v38 }
 0x324   : > { %v3889_v15 = vpop.permute.xlu2 %3888  ;;  %v2196_v51 = vsel %vm1484_vm15, %v2180_v11, %v3840_v41  ;;  %v2197_v43 = vsel %vm1484_vm15, %v2181_v27, %v3841_v40 }
 0x325   : > { %v3891_v1 = vunpack.i.h.bf16 %v3889_v15  ;;  %v3890_v60 = vunpack.i.l.bf16 %v3889_v15 }
 0x326   : > { %v3854_v3 = vpop.permute.xlu1 %3853 }
 0x327   : > { %v3856_v49 = vunpack.i.h.bf16 %v3854_v3  ;;  %v3855_v55 = vunpack.i.l.bf16 %v3854_v3 }
 0x328   : > { %v3849_v10 = vpop.permute.xlu0 %3848 }
 0x329   : > { %v3851_v16 = vunpack.i.h.bf16 %v3849_v10  ;;  %v3850_v21 = vunpack.i.l.bf16 %v3849_v10  ;;  %v1489_v20 = vsel %vm1484_vm15, %v1472_v23, %v3855_v55  ;;  %v1490_v36 = vsel %vm1484_vm15, %v1473_v13, %v3856_v49 }
 0x32a   : > { %v1503_v63 = vpack.c.bf16 %v1490_v36, %v1489_v20  ;;  %v2210_v13 = vpack.c.bf16 %v2197_v43, %v2196_v51 }
 0x32b   : > { %v1741_v42 = vsel %vm658_vm1, %v4833_v54, %v3851_v16  ;;  %v1740_v47 = vsel %vm658_vm1, %v4831_v53, %v3850_v21 }
 0x32c   : > { %3512 = vmatmul.msk.bf16.gmra.mxu1 %vm1789_vm2, %v1503_v63  ;;  %v1756_v59 = vsel %vm1484_vm15, %v1740_v47, %v3860_v52  ;;  %v1757_v18 = vsel %vm1484_vm15, %v1741_v42, %v3861_v28  ;;  %v3904_v44 = vpop.permute.xlu2 %3903 }
 0x32d   : > { %v1770_v26 = vpack.c.bf16 %v1757_v18, %v1756_v59  ;;  %v3906_v52 = vunpack.i.h.bf16 %v3904_v44  ;;  %v3905_v19 = vunpack.i.l.bf16 %v3904_v44 }
 0x32e   : > { %3526 = vmatmul.msk.bf16.gmra.mxu2 %vm1789_vm2, %v2209_v50  ;;  %v3869_v37 = vpop.permute.xlu1 %3868 }
 0x32f   : > { %3500 = vmatmul.msk.bf16.gmra.mxu0 %vm1789_vm2, %v1770_v26  ;;  %v3871_v25 = vunpack.i.h.bf16 %v3869_v37  ;;  %v3870_v16 = vunpack.i.l.bf16 %v3869_v37  ;;  %v1477_v63 = vsel %vm658_vm1, %v4874_v31, %v3906_v52  ;;  %v1476_v42 = vsel %vm658_vm1, %v4872_v22, %v3905_v19 }
 0x330   : > { %v3864_v62 = vpop.permute.xlu0 %3863 }
 0x331   : > { %v3866_v10 = vunpack.i.h.bf16 %v3864_v62  ;;  %v3865_v28 = vunpack.i.l.bf16 %v3864_v62 }
 0x333   : > { %v2183_v21 = vsel %vm658_vm1, %v4915_v48, %v3866_v10  ;;  %v2182_v20 = vsel %vm658_vm1, %v4913_v30, %v3865_v28 }
 0x334   : > { %v3919_v36 = vpop.permute.xlu2 %3918  ;;  %v2198_v37 = vsel %vm1484_vm15, %v2182_v20, %v3870_v16  ;;  %v2199_v58 = vsel %vm1484_vm15, %v2183_v21, %v3871_v25 }
 0x335   : > { %v3921_v26 = vunpack.i.h.bf16 %v3919_v36  ;;  %v3920_v62 = vunpack.i.l.bf16 %v3919_v36  ;;  %v2211_v41 = vpack.c.bf16 %v2199_v58, %v2198_v37 }
 0x336   : > { %v3884_v0 = vpop.permute.xlu1 %3883 }
 0x337   : > { %v3886_v35 = vunpack.i.h.bf16 %v3884_v0  ;;  %v3885_v12 = vunpack.i.l.bf16 %v3884_v0 }
 0x338   : > { %v3879_v57 = vpop.permute.xlu0 %3878 }
 0x339   : > { %v3881_v17 = vunpack.i.h.bf16 %v3879_v57  ;;  %v3880_v32 = vunpack.i.l.bf16 %v3879_v57  ;;  %v1491_v45 = vsel %vm1484_vm15, %v1474_v34, %v3885_v12  ;;  %v1492_v33 = vsel %vm1484_vm15, %v1475_v61, %v3886_v35 }
 0x33a   : > { %v1504_v54 = vpack.c.bf16 %v1492_v33, %v1491_v45  ;;  %v4113_v45 = vld [vmem:[#allocation2 + $0x90] sm:$0xff] }
 0x33b   : > { %v1743_v53 = vsel %vm658_vm1, %v4874_v31, %v3881_v17  ;;  %v1742_v14 = vsel %vm658_vm1, %v4872_v22, %v3880_v32  ;;  %v4112_v17 = vld [vmem:[#allocation2 + $0x98] sm:$0xff] }
 0x33c   : > { %3513 = vmatmul.msk.bf16.gmra.mxu1 %vm1789_vm2, %v1504_v54  ;;  %v1758_v23 = vsel %vm1484_vm15, %v1742_v14, %v3890_v60  ;;  %v1759_v3 = vsel %vm1484_vm15, %v1743_v53, %v3891_v1  ;;  %v3934_v35 = vpop.permute.xlu2 %3933 }
 0x33d   : > { %v1771_v49 = vpack.c.bf16 %v1759_v3, %v1758_v23  ;;  %v3936_v1 = vunpack.i.h.bf16 %v3934_v35  ;;  %v3935_v60 = vunpack.i.l.bf16 %v3934_v35 }
 0x33e   : > { %3527 = vmatmul.msk.bf16.gmra.mxu2 %vm1789_vm2, %v2210_v13  ;;  %v3899_v55 = vpop.permute.xlu1 %3898 }
 0x33f   : > { %3501 = vmatmul.msk.bf16.gmra.mxu0 %vm1789_vm2, %v1771_v49  ;;  %v3901_v51 = vunpack.i.h.bf16 %v3899_v55  ;;  %v3900_v43 = vunpack.i.l.bf16 %v3899_v55  ;;  %v1479_v53 = vsel %vm658_vm1, %v4915_v48, %v3936_v1  ;;  %v1478_v14 = vsel %vm658_vm1, %v4913_v30, %v3935_v60 }
 0x340   : > { %v3894_v29 = vpop.permute.xlu0 %3893 }
 0x341   : > { %v3896_v12 = vunpack.i.h.bf16 %v3894_v29  ;;  %v3895_v57 = vunpack.i.l.bf16 %v3894_v29 }
 0x343   : > { %v2185_v32 = vsel %vm658_vm1, %v4112_v17, %v3896_v12  ;;  %v2184_v33 = vsel %vm658_vm1, %v4113_v45, %v3895_v57 }
 0x344   : > { %v2200_v3 = vsel %vm1484_vm15, %v2184_v33, %v3900_v43  ;;  %v2201_v49 = vsel %vm1484_vm15, %v2185_v32, %v3901_v51  ;;  %v3949_v52 = vpop.permute.xlu2 %3948 }
 0x345   : > { %v2212_v28 = vpack.c.bf16 %v2201_v49, %v2200_v3  ;;  %v3951_v60 = vunpack.i.h.bf16 %v3949_v52  ;;  %v3950_v51 = vunpack.i.l.bf16 %v3949_v52 }
 0x346   : > { %v3914_v47 = vpop.permute.xlu1 %3913 }
 0x347   : > { %v3916_v50 = vunpack.i.h.bf16 %v3914_v47  ;;  %v3915_v59 = vunpack.i.l.bf16 %v3914_v47 }
 0x348   : > { %v3909_v18 = vpop.permute.xlu0 %3908 }
 0x349   : > { %v3911_v38 = vunpack.i.h.bf16 %v3909_v18  ;;  %v3910_v15 = vunpack.i.l.bf16 %v3909_v18  ;;  %v1493_v24 = vsel %vm1484_vm15, %v1476_v42, %v3915_v59  ;;  %v1494_v39 = vsel %vm1484_vm15, %v1477_v63, %v3916_v50  ;;  %v4114_v59 = vld [vmem:[#allocation2 + $0xb0] sm:$0xff] }
 0x34a   : > { %v1505_v31 = vpack.c.bf16 %v1494_v39, %v1493_v24 }
 0x34b   : > { %v1745_v22 = vsel %vm658_vm1, %v4915_v48, %v3911_v38  ;;  %v1744_v40 = vsel %vm658_vm1, %v4913_v30, %v3910_v15 }
 0x34c   : > { %3514 = vmatmul.msk.bf16.gmra.mxu1 %vm1789_vm2, %v1505_v31  ;;  %v1760_v27 = vsel %vm1484_vm15, %v1744_v40, %v3920_v62  ;;  %v1761_v11 = vsel %vm1484_vm15, %v1745_v22, %v3921_v26  ;;  %v4115_v26 = vld [vmem:[#allocation2 + $0xa8] sm:$0xff]  ;;  %v3964_v37 = vpop.permute.xlu2 %3963 }
 0x34d   : > { %v1772_v61 = vpack.c.bf16 %v1761_v11, %v1760_v27  ;;  %v2702_v11 = vld [vmem:[%s5654_s9] sm:$0xf] }
 0x34e   : > { %3528 = vmatmul.msk.bf16.gmra.mxu2 %vm1789_vm2, %v2211_v41  ;;  %v3929_v34 = vpop.permute.xlu1 %3928 }
 0x34f   : > { %3502 = vmatmul.msk.bf16.gmra.mxu0 %vm1789_vm2, %v1772_v61  ;;  %v3931_v47 = vunpack.i.h.bf16 %v3929_v34  ;;  %v3930_v50 = vunpack.i.l.bf16 %v3929_v34 }
 0x350   : > { %v3924_v0 = vpop.permute.xlu0 %3923 }
 0x351   : > { %v3926_v16 = vunpack.i.h.bf16 %v3924_v0  ;;  %v3925_v21 = vunpack.i.l.bf16 %v3924_v0  ;;  %v2768_v0 = vsel %vm683_vm0, %v2702_v11, 0 }
 0x352   : > { %3613 = vmatpush.bf16.msra.mxu3 %v2768_v0  ;;  %2777 = vmatpush.bf16.msrb.mxu0 %v2768_v0 }
 0x353   : > { %v2187_v18 = vsel %vm658_vm1, %v4114_v59, %v3926_v16  ;;  %v2186_v62 = vsel %vm658_vm1, %v4115_v26, %v3925_v21 }
 0x354   : > { %v2202_v15 = vsel %vm1484_vm15, %v2186_v62, %v3930_v50  ;;  %v2203_v24 = vsel %vm1484_vm15, %v2187_v18, %v3931_v47  ;;  %v3979_v27 = vpop.permute.xlu2 %3978  ;;  %v3605_v18 = vld [vmem:[%s4278_s26 + $0x38] sm:$0xff] }
 0x355   : > { %v2213_v31 = vpack.c.bf16 %v2203_v24, %v2202_v15  ;;  %v3981_v35 = vunpack.i.h.bf16 %v3979_v27  ;;  %v3980_v12 = vunpack.i.l.bf16 %v3979_v27 }
 0x356   : > { %v3944_v54 = vpop.permute.xlu1 %3943 }
 0x357   : > { %v3946_v61 = vunpack.i.h.bf16 %v3944_v54  ;;  %v3945_v34 = vunpack.i.l.bf16 %v3944_v54 }
 0x358   : > { %v3939_v44 = vpop.permute.xlu0 %3938 }
 0x359   : > { %v3941_v13 = vunpack.i.h.bf16 %v3939_v44  ;;  %v3940_v23 = vunpack.i.l.bf16 %v3939_v44 }
 0x35b   : > { %v1495_v55 = vsel %vm1484_vm15, %v1478_v14, %v3940_v23  ;;  %v1496_v29 = vsel %vm1484_vm15, %v1479_v53, %v3941_v13  ;;  %v3603_v14 = vld [vmem:[%s4278_s26 + $0x28] sm:$0xff] }
 0x35c   : > { %v1506_v10 = vpack.c.bf16 %v1496_v29, %v1495_v55  ;;  %3570 = vmatmul.msk.bf16.vlgmr.msra.gmra.mxu3 %vm658_vm1, %v3603_v14  ;;  %v3966_v29 = vunpack.i.h.bf16 %v3964_v37 }
 0x35e   : > { %3515 = vmatmul.msk.bf16.gmra.mxu1 %vm1789_vm2, %v1506_v10  ;;  %3529 = vmatmul.msk.bf16.gmra.mxu2 %vm1789_vm2, %v2212_v28  ;;  %v3959_v30 = vpop.permute.xlu1 %3958  ;;  %v3965_v10 = vunpack.i.l.bf16 %v3964_v37  ;;  %v5261_v37 = vld [vmem:[%s5652_s7] ss:$0 sm:$0xff] }
 0x35f   : > { %v3961_v20 = vunpack.i.h.bf16 %v3959_v30  ;;  %v3960_v36 = vunpack.i.l.bf16 %v3959_v30  ;;  %v2191_v30 = vsel %vm658_vm1, %v5061_v46, %v3966_v29 }
 0x360   : > { %v3954_v48 = vpop.permute.xlu0 %3953 }
 0x361   : > { %v3956_v19 = vunpack.i.h.bf16 %v3954_v48  ;;  %v3955_v25 = vunpack.i.l.bf16 %v3954_v48 }
 0x363   : > { %v1481_v63 = vsel %vm658_vm1, %v4112_v17, %v3956_v19  ;;  %v1480_v42 = vsel %vm658_vm1, %v4113_v45, %v3955_v25  ;;  %v4116_v17 = vld [vmem:[#allocation2 + $0xc8] sm:$0xff]  ;;  %v4117_v45 = vld [vmem:[#allocation2 + $0xc0] sm:$0xff]  ;;  %v2190_v19 = vsel %vm658_vm1, %v5059_v56, %v3965_v10  ;;  %v3604_v25 = vld [vmem:[%s4278_s26 + $0x30] sm:$0xff] }
 0x364   : > { %v1497_v58 = vsel %vm1484_vm15, %v1480_v42, %v3960_v36  ;;  %v1498_v38 = vsel %vm1484_vm15, %v1481_v63, %v3961_v20  ;;  %v2189_v32 = vsel %vm658_vm1, %v4116_v17, %v3946_v61  ;;  %v2188_v33 = vsel %vm658_vm1, %v4117_v45, %v3945_v34 }
 0x365   : > { %v1507_v39 = vpack.c.bf16 %v1498_v38, %v1497_v58  ;;  %v2204_v44 = vsel %vm1484_vm15, %v2188_v33, %v3950_v51  ;;  %v2205_v13 = vsel %vm1484_vm15, %v2189_v32, %v3951_v60 }
 0x366   : > { %v3974_v22 = vpop.permute.xlu1 %3973  ;;  %v2214_v3 = vpack.c.bf16 %v2205_v13, %v2204_v44 }
 0x367   : > { %v3976_v40 = vunpack.i.h.bf16 %v3974_v22  ;;  %v3975_v41 = vunpack.i.l.bf16 %v3974_v22  ;;  %v5225_v43 = vpop.f32.mrf.mxu1 }
 0x368   : > { %v3969_v28 = vpop.permute.xlu0 %3968 }
 0x369   : > { %v1483_v57 = vsel %vm658_vm1, %v4114_v59, %v3976_v40  ;;  %v1482_v1 = vsel %vm658_vm1, %v4115_v26, %v3975_v41  ;;  %v3971_v52 = vunpack.i.h.bf16 %v3969_v28  ;;  %v3970_v48 = vunpack.i.l.bf16 %v3969_v28  ;;  %v3598_v28 = vld [vmem:[%s4278_s26] sm:$0xff] }
 0x36a   : > { %v1499_v54 = vsel %vm1484_vm15, %v1482_v1, %v3980_v12  ;;  %v1500_v53 = vsel %vm1484_vm15, %v1483_v57, %v3981_v35  ;;  %3565 = vmatmul.msk.bf16.vlgmr.msrb.gmra.mxu0 %vm658_vm1, %v3598_v28 }
 0x36b   : > { %v1508_v23 = vpack.c.bf16 %v1500_v53, %v1499_v54  ;;  %v2206_v20 = vsel %vm1484_vm15, %v2190_v19, %v3970_v48  ;;  %v2207_v36 = vsel %vm1484_vm15, %v2191_v30, %v3971_v52 }
 0x36c   : > { %3571 = vmatmul.msk.bf16.gmra.mxu3 %vm658_vm1, %v3604_v25  ;;  %v2215_v63 = vpack.c.bf16 %v2207_v36, %v2206_v20 }
 0x36e   : > { %3516 = vmatmul.msk.bf16.gmra.mxu1 %vm1789_vm2, %v1507_v39  ;;  %3530 = vmatmul.msk.bf16.gmra.mxu2 %vm1789_vm2, %v2213_v31  ;;  %v2685_v39 = vld [vmem:[%s5653_s8] sm:$0xf] }
 0x36f   : > { %v5237_v49 = vpop.f32.mrf.mxu1  ;;  %v2844_v31 = vsel %vm683_vm0, %v2685_v39, 0 }
 0x370   : > { %2853 = vmatpush.bf16.msrb.mxu3 %v2844_v31 }
 0x37c   : > { %3572 = vmatmul.msk.bf16.gmra.mxu3 %vm658_vm1, %v3605_v18 }
 0x37e   : > { %3517 = vmatmul.msk.bf16.gmra.mxu1 %vm1789_vm2, %v1508_v23  ;;  %3531 = vmatmul.msk.bf16.gmra.mxu2 %vm1789_vm2, %v2214_v3 }
 0x381   : > { %v5239_v55 = vpop.f32.mrf.mxu2 }
 0x389   : > { %v5246_v16 = vpop.f32.mrf.mxu2  ;;  %v1911_v21 = vpop.f32.mrf.mxu1 }
 0x38c   : > { %v1826_v42 = vpop.f32.mrf.mxu0 }
 0x38d   : > { %v1912_v62 = vadd.f32 %v1911_v21, %v1826_v42 }
 0x38e   : > { %3532 = vmatmul.msk.bf16.gmra.mxu2 %vm1789_vm2, %v2215_v63 }
 0x391   : > { %v5252_v47 = vpop.f32.mrf.mxu2  ;;  %v1913_v46 = vpop.f32.mrf.mxu1 }
 0x394   : > { %v1828_v50 = vpop.f32.mrf.mxu0 }
 0x395   : > { %v1914_v40 = vadd.f32 %v1913_v46, %v1828_v50 }
 0x399   : > { %v5254_v59 = vpop.f32.mrf.mxu2  ;;  %v1916_v56 = vpop.f32.mrf.mxu1 }
 0x39c   : > { %v1831_v26 = vpop.f32.mrf.mxu0 }
 0x39d   : > { %v1917_v57 = vadd.f32 %v1916_v56, %v1831_v26 }
 0x3a1   : > { %v2265_v58 = vpop.f32.mrf.mxu2  ;;  %v1918_v38 = vpop.f32.mrf.mxu1 }
 0x3a2   : > { %v2305_v15 = vadd.f32 %v2265_v58, %v1912_v62 }
 0x3a4   : > { %v5264_v24 = vadd.f32 %v5261_v37, %v2305_v15  ;;  %v1833_v27 = vpop.f32.mrf.mxu0 }
 0x3a5   : > { %v1919_v14 = vadd.f32 %v1918_v38, %v1833_v27 }
 0x3a6   : > { %v2341_v22 = vsub.f32 0.0, %v5264_v24 }
 0x3a8   : > { %v2357_v41 = vmul.f32 1.442695, %v2341_v22 }
 0x3a9   : > { %v2267_v11 = vpop.f32.mrf.mxu2  ;;  %v1921_v34 = vpop.f32.mrf.mxu1 }
 0x3aa   : > { %3984 = vpow2.f32 %v2357_v41  ;;  %v2306_v61 = vadd.f32 %v2267_v11, %v1914_v40 }
 0x3ac   : > { %v5272_v0 = vadd.f32 %v5261_v37, %v2306_v61  ;;  %v1836_v32 = vpop.f32.mrf.mxu0 }
 0x3ad   : > { %v1922_v50 = vadd.f32 %v1921_v34, %v1836_v32  ;;  %v2646_v32 = vunpack.c.h.bf16 %v4281_v2 }
 0x3ae   : > { %v2342_v35 = vsub.f32 0.0, %v5272_v0 }
 0x3b0   : > { %v3985_v12 = vpop.eup %3984  ;;  %v2359_v1 = vmul.f32 1.442695, %v2342_v35 }
 0x3b1   : > { %v2389_v60 = vadd.f32 1.0, %v3985_v12  ;;  %v2270_v51 = vpop.f32.mrf.mxu2  ;;  %v5278_v33 = vpop.f32.mrf.mxu1 }
 0x3b2   : > { %3986 = vpow2.f32 %v2359_v1  ;;  %v2307_v17 = vadd.f32 %v2270_v51, %v1917_v57  ;;  %v2645_v57 = vunpack.c.l.bf16 %v4281_v2 }
 0x3b3   : > { %3988 = vrcp.f32 %v2389_v60  ;;  %v2416_v46 = vand.u32 2147483648, %v2389_v60  ;;  %vm2410_vm3 = vweird.f32 %v2389_v60  ;;  %v2414_v26 = vand.u32 2147483647, %v2389_v60 }
 0x3b4   : > { %v5276_v45 = vadd.f32 %v5261_v37, %v2307_v17  ;;  %v1838_v30 = vpop.f32.mrf.mxu0 }
 0x3b5   : > { %v2417_v39 = vor.u32 1.1754944e-38, %v2416_v46  ;;  %vm2415_vm6 = vcmp.eq.f32.partialorder %v2414_v26, 8.507059e+37 }
 0x3b6   : > { %v2343_v54 = vsub.f32 0.0, %v5276_v45 }
 0x3b8   : > { %v3987_v53 = vpop.eup %3986  ;;  %v2361_v44 = vmul.f32 1.442695, %v2343_v54 }
 0x3b9   : > { %v3989_v13 = vpop.eup %3988  ;;  %v2390_v23 = vadd.f32 1.0, %v3987_v53  ;;  %v2272_v3 = vpop.f32.mrf.mxu2 }
 0x3ba   : > { %v2406_v29 = vmul.f32 %v3989_v13, %v2389_v60  ;;  %3990 = vpow2.f32 %v2361_v44  ;;  %v2308_v10 = vadd.f32 %v2272_v3, %v1919_v14  ;;  %v1926_v21 = vpop.f32.mrf.mxu1  ;;  %vm2411_vm0 = vweird.f32 %v3989_v13 }
 0x3bb   : > { %3992 = vrcp.f32 %v2390_v23  ;;  %vm2412_vm4 = vmor %vm2410_vm3, %vm2411_vm0  ;;  %v2429_v31 = vand.u32 2147483647, %v2390_v23  ;;  %v2431_v22 = vand.u32 2147483648, %v2390_v23  ;;  %vm2425_vm8 = vweird.f32 %v2390_v23 }
 0x3bc   : > { %v2407_v52 = vsub.f32 1.0, %v2406_v29  ;;  %v5283_v48 = vadd.f32 %v5261_v37, %v2308_v10  ;;  %v1841_v11 = vpop.f32.mrf.mxu0  ;;  %v1924_v3 = vadd.f32 %v5278_v33, %v1838_v30 }
 0x3bd   : > { %vm2430_vm10 = vcmp.eq.f32.partialorder %v2429_v31, 8.507059e+37  ;;  %v2432_v60 = vor.u32 1.1754944e-38, %v2431_v22 }
 0x3be   : > { %v2408_v19 = vmul.f32 %v3989_v13, %v2407_v52  ;;  %v2344_v25 = vsub.f32 0.0, %v5283_v48 }
 0x3c0   : > { %v3991_v20 = vpop.eup %3990  ;;  %v2409_v36 = vadd.f32 %v3989_v13, %v2408_v19  ;;  %v2363_v63 = vmul.f32 1.442695, %v2344_v25 }
 0x3c1   : > { %v3993_v42 = vpop.eup %3992  ;;  %v5287_v56 = vadd.f32 1.0, %v3991_v20  ;;  %v2275_v18 = vpop.f32.mrf.mxu2 }
 0x3c2   : > { %v2421_v62 = vmul.f32 %v3993_v42, %v2390_v23  ;;  %3994 = vpow2.f32 %v2363_v63  ;;  %v2413_v58 = vsel %vm2412_vm4, %v3989_v13, %v2409_v36  ;;  %v2309_v15 = vadd.f32 %v2275_v18, %v1922_v50  ;;  %v1928_v12 = vpop.f32.mrf.mxu1  ;;  %v3599_v13 = vld [vmem:[%s4278_s26 + $0x8] sm:$0xff] }
 0x3c3   : > { %3996 = vrcp.f32 %v5287_v56  ;;  %vm2426_vm7 = vweird.f32 %v3993_v42  ;;  %v2418_v27 = vsel %vm2415_vm6, %v2417_v39, %v2413_v58  ;;  %3566 = vmatmul.msk.bf16.gmra.mxu0 %vm658_vm1, %v3599_v13  ;;  %v2444_v36 = vand.u32 2147483647, %v5287_v56 }
 0x3c4   : > { %v2422_v38 = vsub.f32 1.0, %v2421_v62  ;;  %v5291_v41 = vadd.f32 %v5261_v37, %v2309_v15  ;;  %vm2427_vm9 = vmor %vm2425_vm8, %vm2426_vm7  ;;  %v2419_v54 = vmul.f32 %v2418_v27, %v5264_v24  ;;  %v1927_v24 = vadd.f32 %v1926_v21, %v1841_v11  ;;  %v1843_v63 = vpop.f32.mrf.mxu0 }
 0x3c5   : > { %vm2440_vm5 = vweird.f32 %v5287_v56  ;;  %vm2445_vm13 = vcmp.eq.f32.partialorder %v2444_v36, 8.507059e+37 }
 0x3c6   : > { %v2423_v40 = vmul.f32 %v3993_v42, %v2422_v38  ;;  %v2345_v35 = vsub.f32 0.0, %v5291_v41  ;;  %v2661_v2 = vadd.f32 %v2645_v57, %v2419_v54 }
 0x3c8   : > { %v3995_v61 = vpop.eup %3994  ;;  %v2424_v34 = vadd.f32 %v3993_v42, %v2423_v40  ;;  %v2365_v44 = vmul.f32 1.442695, %v2345_v35  ;;  %v1929_v35 = vadd.f32 %v1928_v12, %v1843_v63 }
 0x3c9   : > { %v3997_v1 = vpop.eup %3996  ;;  %v2392_v51 = vadd.f32 1.0, %v3995_v61  ;;  %v2277_v17 = vpop.f32.mrf.mxu2 }
 0x3ca   : > { %v2428_v53 = vsel %vm2427_vm9, %v3993_v42, %v2424_v34  ;;  %v2436_v14 = vmul.f32 %v3997_v1, %v5287_v56  ;;  %v2310_v28 = vadd.f32 %v2277_v17, %v1924_v3  ;;  %vm2441_vm11 = vweird.f32 %v3997_v1  ;;  %v1931_v21 = vpop.f32.mrf.mxu1 }
 0x3cb   : > { %v2433_v23 = vsel %vm2430_vm10, %v2432_v60, %v2428_v53  ;;  %3998 = vrcp.f32 %v2392_v51  ;;  %vm5310_vm12 = vmor %vm2440_vm5, %vm2441_vm11  ;;  %v2459_v22 = vand.u32 2147483647, %v2392_v51  ;;  %v2461_v40 = vand.u32 2147483648, %v2392_v51 }
 0x3cc   : > { %v2434_v29 = vmul.f32 %v2433_v23, %v5272_v0  ;;  %v2437_v10 = vsub.f32 1.0, %v2436_v14  ;;  %4000 = vpow2.f32 %v2365_v44  ;;  %v5303_v25 = vadd.f32 %v5261_v37, %v2310_v28  ;;  %v1846_v23 = vpop.f32.mrf.mxu0 }
 0x3cd   : > { %v2446_v0 = vand.u32 2147483648, %v5287_v56  ;;  %vm2455_vm2 = vweird.f32 %v2392_v51  ;;  %vm2460_vm3 = vcmp.eq.f32.partialorder %v2459_v22, 8.507059e+37  ;;  %v2647_v17 = vunpack.c.l.bf16 %v4285_v4 }
 0x3ce   : > { %v2438_v52 = vmul.f32 %v3997_v1, %v2437_v10  ;;  %v2662_v19 = vadd.f32 %v2646_v32, %v2434_v29  ;;  %v2346_v42 = vsub.f32 0.0, %v5303_v25  ;;  %v2648_v32 = vunpack.c.h.bf16 %v4285_v4 }
 0x3cf   : > { %v2447_v56 = vor.u32 1.1754944e-38, %v2446_v0 }
 0x3d0   : > { %v2439_v20 = vadd.f32 %v3997_v1, %v2438_v52  ;;  %v2677_v33 = vpack.c.bf16 %v2662_v19, %v2661_v2  ;;  %v2367_v38 = vmul.f32 1.442695, %v2346_v42  ;;  %v3600_v52 = vld [vmem:[%s4278_s26 + $0x10] sm:$0xff] }
 0x3d1   : > { %v3999_v30 = vpop.eup %3998  ;;  %v2280_v46 = vpop.f32.mrf.mxu2 }
 0x3d2   : > { %v4001_v50 = vpop.eup %4000  ;;  %v2451_v18 = vmul.f32 %v3999_v30, %v2392_v51  ;;  %v2311_v26 = vadd.f32 %v2280_v46, %v1927_v24  ;;  %3573 = vmatmul.msk.bf16.vlgmr.msrb.gmra.mxu3 %vm658_vm1, %v2677_v33  ;;  %v2443_v15 = vsel %vm5310_vm12, %v3997_v1, %v2439_v20  ;;  %vm2456_vm14 = vweird.f32 %v3999_v30  ;;  %v1933_v29 = vpop.f32.mrf.mxu1 }
 0x3d3   : > { %v5314_v58 = vadd.f32 1.0, %v4001_v50  ;;  %v2448_v61 = vsel %vm2445_vm13, %v2447_v56, %v2443_v15  ;;  %vm2457_vm0 = vmor %vm2455_vm2, %vm2456_vm14  ;;  %v2462_v1 = vor.u32 1.1754944e-38, %v2461_v40  ;;  %3567 = vmatmul.msk.bf16.gmra.mxu0 %vm658_vm1, %v3600_v52  ;;  %v1932_v20 = vadd.f32 %v1931_v21, %v1846_v23 }
 0x3d4   : > { %v2452_v39 = vsub.f32 1.0, %v2451_v18  ;;  %v5319_v31 = vadd.f32 %v5261_v37, %v2311_v26  ;;  %v2449_v54 = vmul.f32 %v2448_v61, %v5276_v45  ;;  %v1848_v18 = vpop.f32.mrf.mxu0 }
 0x3d5   : > { %4002 = vrcp.f32 %v5314_v58  ;;  %vm2470_vm6 = vweird.f32 %v5314_v58  ;;  %v2474_v56 = vand.u32 2147483647, %v5314_v58  ;;  %v1934_v40 = vadd.f32 %v1933_v29, %v1848_v18 }
 0x3d6   : > { %v2453_v27 = vmul.f32 %v3999_v30, %v2452_v39  ;;  %4004 = vpow2.f32 %v2367_v38  ;;  %v2347_v11 = vsub.f32 0.0, %v5319_v31  ;;  %v2663_v2 = vadd.f32 %v2647_v17, %v2449_v54 }
 0x3d7   : > { %v2476_v38 = vand.u32 2147483648, %v5314_v58  ;;  %vm2475_vm9 = vcmp.eq.f32.partialorder %v2474_v56, 8.507059e+37 }
 0x3d8   : > { %v2454_v34 = vadd.f32 %v3999_v30, %v2453_v27  ;;  %v2369_v57 = vmul.f32 1.442695, %v2347_v11 }
 0x3d9   : > { %v2282_v60 = vpop.f32.mrf.mxu2 }
 0x3da   : > { %v2458_v53 = vsel %vm2457_vm0, %v3999_v30, %v2454_v34  ;;  %4006 = vpow2.f32 %v2369_v57  ;;  %v2312_v14 = vadd.f32 %v2282_v60, %v1929_v35 }
 0x3db   : > { %v4003_v44 = vpop.eup %4002  ;;  %v2463_v13 = vsel %vm2460_vm3, %v2462_v1, %v2458_v53  ;;  %v1936_v26 = vpop.f32.mrf.mxu1 }
 0x3dc   : > { %v4005_v51 = vpop.eup %4004  ;;  %v2464_v12 = vmul.f32 %v2463_v13, %v5283_v48  ;;  %v2466_v3 = vmul.f32 %v4003_v44, %v5314_v58  ;;  %v5329_v10 = vadd.f32 %v5261_v37, %v2312_v14  ;;  %vm2471_vm4 = vweird.f32 %v4003_v44  ;;  %v3601_v13 = vld [vmem:[%s4278_s26 + $0x18] sm:$0xff] }
 0x3dd   : > { %v2394_v28 = vadd.f32 1.0, %v4005_v51  ;;  %vm5344_vm7 = vmor %vm2470_vm6, %vm2471_vm4  ;;  %v2477_v58 = vor.u32 1.1754944e-38, %v2476_v38 }
 0x3de   : > { %v2467_v4 = vsub.f32 1.0, %v2466_v3  ;;  %v2348_v45 = vsub.f32 0.0, %v5329_v10  ;;  %v2664_v19 = vadd.f32 %v2648_v32, %v2464_v12 }
 0x3df   : > { %4008 = vrcp.f32 %v2394_v28  ;;  %v2489_v34 = vand.u32 2147483647, %v2394_v28  ;;  %v2491_v35 = vand.u32 2147483648, %v2394_v28  ;;  %vm2485_vm10 = vweird.f32 %v2394_v28 }
 0x3e0   : > { %v4007_v24 = vpop.eup %4006  ;;  %v2371_v36 = vmul.f32 1.442695, %v2348_v45  ;;  %v2678_v48 = vpack.c.bf16 %v2664_v19, %v2663_v2  ;;  %v2468_v33 = vmul.f32 %v4003_v44, %v2467_v4  ;;  %v2649_v4 = vunpack.c.l.bf16 %v4290_v5 }
 0x3e1   : > { %v5334_v30 = vadd.f32 1.0, %v4007_v24  ;;  %v2285_v0 = vpop.f32.mrf.mxu2  ;;  %v2492_v14 = vor.u32 1.1754944e-38, %v2491_v35  ;;  %vm2490_vm5 = vcmp.eq.f32.partialorder %v2489_v34, 8.507059e+37 }
 0x3e2   : > { %4010 = vpow2.f32 %v2371_v36  ;;  %v2313_v63 = vadd.f32 %v2285_v0, %v1932_v20  ;;  %3574 = vmatmul.msk.bf16.gmra.mxu3 %vm658_vm1, %v2678_v48  ;;  %v2469_v50 = vadd.f32 %v4003_v44, %v2468_v33  ;;  %v2650_v36 = vunpack.c.h.bf16 %v4290_v5 }
 0x3e3   : > { %4012 = vrcp.f32 %v5334_v30  ;;  %3568 = vmatmul.msk.bf16.gmra.mxu0 %vm658_vm1, %v3601_v13  ;;  %v1938_v52 = vpop.f32.mrf.mxu1  ;;  %v1937_v0 = vadd.f32 %v1936_v26, %v5225_v43  ;;  %vm2500_vm14 = vweird.f32 %v5334_v30  ;;  %v2504_v43 = vand.u32 2147483647, %v5334_v30  ;;  %v3602_v13 = vld [vmem:[%s4278_s26 + $0x20] sm:$0xff] }
 0x3e4   : > { %v5339_v42 = vadd.f32 %v5261_v37, %v2313_v63  ;;  %v2473_v61 = vsel %vm5344_vm7, %v4003_v44, %v2469_v50  ;;  %v1939_v56 = vadd.f32 %v1938_v52, %v5237_v49 }
 0x3e5   : > { %v4009_v46 = vpop.eup %4008  ;;  %v2478_v53 = vsel %vm2475_vm9, %v2477_v58, %v2473_v61  ;;  %vm2505_vm6 = vcmp.eq.f32.partialorder %v2504_v43, 8.507059e+37 }
 0x3e6   : > { %v2481_v21 = vmul.f32 %v4009_v46, %v2394_v28  ;;  %v2349_v62 = vsub.f32 0.0, %v5339_v42  ;;  %vm2486_vm8 = vweird.f32 %v4009_v46  ;;  %v2479_v29 = vmul.f32 %v2478_v53, %v5291_v41 }
 0x3e7   : > { %vm2487_vm11 = vmor %vm2485_vm10, %vm2486_vm8  ;;  %v2506_v41 = vand.u32 2147483648, %v5334_v30 }
 0x3e8   : > { %v4011_v15 = vpop.eup %4010  ;;  %v2482_v22 = vsub.f32 1.0, %v2481_v21  ;;  %v2373_v27 = vmul.f32 1.442695, %v2349_v62 }
 0x3e9   : > { %v5349_v11 = vpop.eup %4012  ;;  %v5353_v57 = vadd.f32 1.0, %v4011_v15  ;;  %v2287_v1 = vpop.f32.mrf.mxu2 }
 0x3ea   : > { %v2483_v60 = vmul.f32 %v4009_v46, %v2482_v22  ;;  %v2496_v17 = vmul.f32 %v5349_v11, %v5334_v30  ;;  %4014 = vpow2.f32 %v2373_v27  ;;  %v2314_v54 = vadd.f32 %v2287_v1, %v1934_v40 }
 0x3eb   : > { %4016 = vrcp.f32 %v5353_v57  ;;  %vm2501_vm12 = vweird.f32 %v5349_v11  ;;  %v2521_v50 = vand.u32 2147483648, %v5353_v57  ;;  %v2519_v62 = vand.u32 2147483647, %v5353_v57 }
 0x3ec   : > { %v2484_v32 = vadd.f32 %v4009_v46, %v2483_v60  ;;  %v2497_v44 = vsub.f32 1.0, %v2496_v17  ;;  %v5360_v51 = vadd.f32 %v5261_v37, %v2314_v54  ;;  %vm5386_vm2 = vmor %vm2500_vm14, %vm2501_vm12  ;;  %vm2515_vm0 = vweird.f32 %v5353_v57 }
 0x3ed   : > { %v2507_v40 = vor.u32 1.1754944e-38, %v2506_v41  ;;  %v2522_v27 = vor.u32 1.1754944e-38, %v2521_v50  ;;  %vm2520_vm4 = vcmp.eq.f32.partialorder %v2519_v62, 8.507059e+37 }
 0x3ee   : > { %v2488_v23 = vsel %vm2487_vm11, %v4009_v46, %v2484_v32  ;;  %v2350_v28 = vsub.f32 0.0, %v5360_v51  ;;  %v2498_v19 = vmul.f32 %v5349_v11, %v2497_v44  ;;  %v2652_v44 = vunpack.c.h.bf16 %v4293_v6 }
 0x3ef   : > { %v2493_v12 = vsel %vm2490_vm5, %v2492_v14, %v2488_v23 }
 0x3f0   : > { %v4015_v3 = vpop.eup %4014  ;;  %v2494_v2 = vmul.f32 %v2493_v12, %v5303_v25  ;;  %v2375_v33 = vmul.f32 1.442695, %v2350_v28  ;;  %v2665_v25 = vadd.f32 %v2649_v4, %v2479_v29  ;;  %v2499_v46 = vadd.f32 %v5349_v11, %v2498_v19 }
 0x3f1   : > { %v4017_v45 = vpop.eup %4016  ;;  %v5368_v24 = vadd.f32 1.0, %v4015_v3  ;;  %v2290_v20 = vpop.f32.mrf.mxu2  ;;  %v2651_v3 = vunpack.c.l.bf16 %v4293_v6 }
 0x3f2   : > { %v2511_v48 = vmul.f32 %v4017_v45, %v5353_v57  ;;  %v2315_v18 = vadd.f32 %v2290_v20, %v1937_v0  ;;  %v2666_v5 = vadd.f32 %v2650_v36, %v2494_v2  ;;  %vm2516_vm13 = vweird.f32 %v4017_v45  ;;  %v1941_v57 = vpop.f32.mrf.mxu1 }
 0x3f3   : > { %4018 = vrcp.f32 %v5368_v24  ;;  %v2503_v30 = vsel %vm5386_vm2, %v5349_v11, %v2499_v46  ;;  %vm2517_vm3 = vmor %vm2515_vm0, %vm2516_vm13  ;;  %3569 = vmatmul.msk.bf16.gmra.mxu0 %vm658_vm1, %v3602_v13  ;;  %v1942_v29 = vadd.f32 %v1941_v57, %v5239_v55  ;;  %v2536_v36 = vand.u32 2147483648, %v5368_v24 }
 0x3f4   : > { %v2512_v63 = vsub.f32 1.0, %v2511_v48  ;;  %4020 = vpow2.f32 %v2375_v33  ;;  %v5382_v26 = vadd.f32 %v5261_v37, %v2315_v18  ;;  %v2679_v38 = vpack.c.bf16 %v2666_v5, %v2665_v25 }
 0x3f5   : > { %v2508_v32 = vsel %vm2505_vm6, %v2507_v40, %v2503_v30  ;;  %vm2530_vm8 = vweird.f32 %v5368_v24  ;;  %v2534_v25 = vand.u32 2147483647, %v5368_v24  ;;  %v2537_v15 = vor.u32 1.1754944e-38, %v2536_v36 }
 0x3f6   : > { %v2513_v21 = vmul.f32 %v4017_v45, %v2512_v63  ;;  %v2351_v61 = vsub.f32 0.0, %v5382_v26  ;;  %3575 = vmatmul.msk.bf16.gmra.mxu3 %vm658_vm1, %v2679_v38  ;;  %v2509_v12 = vmul.f32 %v2508_v32, %v5319_v31 }
 0x3f7   : > { %vm2535_vm5 = vcmp.eq.f32.partialorder %v2534_v25, 8.507059e+37 }
 0x3f8   : > { %v2514_v39 = vadd.f32 %v4017_v45, %v2513_v21  ;;  %v2377_v58 = vmul.f32 1.442695, %v2351_v61  ;;  %v2667_v19 = vadd.f32 %v2651_v3, %v2509_v12 }
 0x3f9   : > { %v5392_v22 = vpop.eup %4018  ;;  %v2292_v34 = vpop.f32.mrf.mxu2 }
 0x3fa   : > { %v4021_v35 = vpop.eup %4020  ;;  %v2518_v1 = vsel %vm2517_vm3, %v4017_v45, %v2514_v39  ;;  %v2526_v49 = vmul.f32 %v5392_v22, %v5368_v24  ;;  %v2316_v60 = vadd.f32 %v2292_v34, %v1939_v56  ;;  %v1943_v31 = vpop.f32.mrf.mxu1  ;;  %vm2531_vm7 = vweird.f32 %v5392_v22 }
 0x3fb   : > { %v2523_v17 = vsel %vm2520_vm4, %v2522_v27, %v2518_v1  ;;  %v2398_v11 = vadd.f32 1.0, %v4021_v35  ;;  %v1944_v50 = vadd.f32 %v1943_v31, %v5246_v16  ;;  %vm5426_vm9 = vmor %vm2530_vm8, %vm2531_vm7  ;;  %v2654_v35 = vunpack.c.h.bf16 %v4296_v7 }
 0x3fc   : > { %v5402_v54 = vadd.f32 %v5261_v37, %v2316_v60  ;;  %v2524_v53 = vmul.f32 %v2523_v17, %v5329_v10  ;;  %v2527_v14 = vsub.f32 1.0, %v2526_v49 }
 0x3fd   : > { %4022 = vrcp.f32 %v2398_v11  ;;  %v2551_v46 = vand.u32 2147483648, %v2398_v11  ;;  %v2549_v62 = vand.u32 2147483647, %v2398_v11  ;;  %vm2545_vm11 = vweird.f32 %v2398_v11 }
 0x3fe   : > { %4024 = vpow2.f32 %v2377_v58  ;;  %v2352_v23 = vsub.f32 0.0, %v5402_v54  ;;  %v2528_v28 = vmul.f32 %v5392_v22, %v2527_v14  ;;  %v2668_v4 = vadd.f32 %v2652_v44, %v2524_v53 }
 0x3ff   : > { %v2552_v30 = vor.u32 1.1754944e-38, %v2551_v46  ;;  %vm2550_vm13 = vcmp.eq.f32.partialorder %v2549_v62, 8.507059e+37 }
 0x400   : > { %v2379_v52 = vmul.f32 1.442695, %v2352_v23  ;;  %v2529_v33 = vadd.f32 %v5392_v22, %v2528_v28  ;;  %v2680_v41 = vpack.c.bf16 %v2668_v4, %v2667_v19 }
 0x401   : > { %v2295_v10 = vpop.f32.mrf.mxu2 }
 0x402   : > { %4026 = vpow2.f32 %v2379_v52  ;;  %v2317_v45 = vadd.f32 %v2295_v10, %v1942_v29  ;;  %v2533_v38 = vsel %vm5426_vm9, %v5392_v22, %v2529_v33  ;;  %v1946_v57 = vpop.f32.mrf.mxu1 }
 0x403   : > { %v4023_v2 = vpop.eup %4022  ;;  %v2538_v40 = vsel %vm2535_vm5, %v2537_v15, %v2533_v38  ;;  %v1947_v3 = vadd.f32 %v1946_v57, %v5252_v47 }
 0x404   : > { %v4025_v20 = vpop.eup %4024  ;;  %v2541_v48 = vmul.f32 %v4023_v2, %v2398_v11  ;;  %v5415_v6 = vadd.f32 %v5261_v37, %v2317_v45  ;;  %vm2546_vm10 = vweird.f32 %v4023_v2  ;;  %v2539_v17 = vmul.f32 %v2538_v40, %v5339_v42 }
 0x405   : > { %v5419_v55 = vadd.f32 1.0, %v4025_v20  ;;  %vm2547_vm12 = vmor %vm2545_vm11, %vm2546_vm10  ;;  %v2653_v11 = vunpack.c.l.bf16 %v4296_v7  ;;  %v2655_v40 = vunpack.c.l.bf16 %v4300_v8 }
 0x406   : > { %v2542_v0 = vsub.f32 1.0, %v2541_v48  ;;  %v2353_v63 = vsub.f32 0.0, %v5415_v6  ;;  %3576 = vmatmul.msk.bf16.gmra.mxu3 %vm658_vm1, %v2680_v41 }
 0x407   : > { %4028 = vrcp.f32 %v5419_v55  ;;  %v2669_v29 = vadd.f32 %v2653_v11, %v2539_v17  ;;  %v2566_v42 = vand.u32 2147483648, %v5419_v55  ;;  %vm2560_vm0 = vweird.f32 %v5419_v55 }
 0x408   : > { %v4027_v18 = vpop.eup %4026  ;;  %v2543_v21 = vmul.f32 %v4023_v2, %v2542_v0  ;;  %v2381_v43 = vmul.f32 1.442695, %v2353_v63  ;;  %v2564_v47 = vand.u32 2147483647, %v5419_v55 }
 0x409   : > { %v5433_v24 = vadd.f32 1.0, %v4027_v18  ;;  %v2297_v39 = vpop.f32.mrf.mxu2  ;;  %v2567_v63 = vor.u32 1.1754944e-38, %v2566_v42 }
 0x40a   : > { %v2544_v16 = vadd.f32 %v4023_v2, %v2543_v21  ;;  %4030 = vpow2.f32 %v2381_v43  ;;  %v2318_v56 = vadd.f32 %v2297_v39, %v1944_v50  ;;  %v1948_v31 = vpop.f32.mrf.mxu1  ;;  %vm2565_vm8 = vcmp.eq.f32.partialorder %v2564_v47, 8.507059e+37  ;;  %v5473_v43 = vpop.f32.mrf.mxu3 }
 0x40b   : > { %4032 = vrcp.f32 %v5433_v24  ;;  %v2581_v10 = vand.u32 2147483648, %v5433_v24  ;;  %vm2575_vm4 = vweird.f32 %v5433_v24  ;;  %v1949_v62 = vadd.f32 %v1948_v31, %v5254_v59 }
 0x40c   : > { %v2548_v27 = vsel %vm2547_vm12, %v4023_v2, %v2544_v16  ;;  %v5438_v22 = vadd.f32 %v5261_v37, %v2318_v56  ;;  %v2579_v2 = vand.u32 2147483647, %v5433_v24  ;;  %v2656_v16 = vunpack.c.h.bf16 %v4300_v8 }
 0x40d   : > { %v4029_v61 = vpop.eup %4028  ;;  %v2553_v34 = vsel %vm2550_vm13, %v2552_v30, %v2548_v27  ;;  %v2582_v25 = vor.u32 1.1754944e-38, %v2581_v10  ;;  %v2658_v10 = vunpack.c.h.bf16 %v4303_v9  ;;  %v2657_v47 = vunpack.c.l.bf16 %v4303_v9 }
 0x40e   : > { %v2554_v1 = vmul.f32 %v2553_v34, %v5360_v51  ;;  %v2556_v49 = vmul.f32 %v4029_v61, %v5419_v55  ;;  %v2354_v60 = vsub.f32 0.0, %v5438_v22  ;;  %vm2561_vm14 = vweird.f32 %v4029_v61 }
 0x40f   : > { %vm5459_vm3 = vmor %vm2560_vm0, %vm2561_vm14  ;;  %vm2580_vm7 = vcmp.eq.f32.partialorder %v2579_v2, 8.507059e+37 }
 0x410   : > { %v4031_v58 = vpop.eup %4030  ;;  %v2557_v32 = vsub.f32 1.0, %v2556_v49  ;;  %v2383_v53 = vmul.f32 1.442695, %v2354_v60  ;;  %v2670_v23 = vadd.f32 %v2654_v35, %v2554_v1 }
 0x411   : > { %v4033_v14 = vpop.eup %4032  ;;  %v5446_v44 = vadd.f32 1.0, %v4031_v58  ;;  %v2300_v13 = vpop.f32.mrf.mxu2 }
 0x412   : > { %v2558_v12 = vmul.f32 %v4029_v61, %v2557_v32  ;;  %v2571_v51 = vmul.f32 %v4033_v14, %v5433_v24  ;;  %4034 = vpow2.f32 %v2383_v53  ;;  %v2319_v52 = vadd.f32 %v2300_v13, %v1947_v3  ;;  %v5487_v11 = vpop.f32.mrf.mxu3 }
 0x413   : > { %4036 = vrcp.f32 %v5446_v44  ;;  %v2681_v4 = vpack.c.bf16 %v2670_v23, %v2669_v29  ;;  %vm2576_vm2 = vweird.f32 %v4033_v14  ;;  %vm2590_vm11 = vweird.f32 %v5446_v44 }
 0x414   : > { %v2572_v7 = vsub.f32 1.0, %v2571_v51  ;;  %v2559_v28 = vadd.f32 %v4029_v61, %v2558_v12  ;;  %v5455_v19 = vadd.f32 %v5261_v37, %v2319_v52  ;;  %vm2577_vm6 = vmor %vm2575_vm4, %vm2576_vm2  ;;  %v2594_v53 = vand.u32 2147483647, %v5446_v44 }
 0x416   : > { %v2573_v45 = vmul.f32 %v4033_v14, %v2572_v7  ;;  %v2355_v33 = vsub.f32 0.0, %v5455_v19  ;;  %v2563_v0 = vsel %vm5459_vm3, %v4029_v61, %v2559_v28  ;;  %3577 = vmatmul.msk.bf16.gmra.mxu3 %vm658_vm1, %v2681_v4  ;;  %vm2595_vm2 = vcmp.eq.f32.partialorder %v2594_v53, 8.507059e+37 }
 0x417   : > { %v2568_v38 = vsel %vm2565_vm8, %v2567_v63, %v2563_v0 }
 0x418   : > { %v4035_v20 = vpop.eup %4034  ;;  %v2574_v48 = vadd.f32 %v4033_v14, %v2573_v45  ;;  %v2385_v18 = vmul.f32 1.442695, %v2355_v33  ;;  %v2569_v56 = vmul.f32 %v2568_v38, %v5382_v26  ;;  %v2596_v26 = vand.u32 2147483648, %v5446_v44 }
 0x419   : > { %v5465_v41 = vpop.eup %4036  ;;  %v2402_v55 = vadd.f32 1.0, %v4035_v20  ;;  %v2302_v5 = vpop.f32.mrf.mxu2 }
 0x41a   : > { %v2578_v46 = vsel %vm2577_vm6, %v4033_v14, %v2574_v48  ;;  %v2586_v50 = vmul.f32 %v5465_v41, %v5446_v44  ;;  %v2320_v39 = vadd.f32 %v2302_v5, %v1949_v62  ;;  %v2671_v57 = vadd.f32 %v2655_v40, %v2569_v56  ;;  %v5496_v2 = vpop.f32.mrf.mxu3 }
 0x41b   : > { %v2583_v21 = vsel %vm2580_vm7, %v2582_v25, %v2578_v46  ;;  %4038 = vrcp.f32 %v2402_v55  ;;  %vm2591_vm9 = vweird.f32 %v5465_v41  ;;  %v2611_v17 = vand.u32 2147483648, %v2402_v55 }
 0x41c   : > { %4040 = vpow2.f32 %v2385_v18  ;;  %v2584_v15 = vmul.f32 %v2583_v21, %v5402_v54  ;;  %v2587_v24 = vsub.f32 1.0, %v2586_v50  ;;  %v5479_v30 = vadd.f32 %v5261_v37, %v2320_v39  ;;  %vm2592_vm5 = vmor %vm2590_vm11, %vm2591_vm9 }
 0x41d   : > { %v2609_v32 = vand.u32 2147483647, %v2402_v55  ;;  %vm2605_vm12 = vweird.f32 %v2402_v55  ;;  %v2612_v23 = vor.u32 1.1754944e-38, %v2611_v17  ;;  %v2597_v12 = vor.u32 1.1754944e-38, %v2596_v26 }
 0x41e   : > { %v2588_v59 = vmul.f32 %v5465_v41, %v2587_v24  ;;  %v2356_v61 = vsub.f32 0.0, %v5479_v30  ;;  %v2672_v34 = vadd.f32 %v2656_v16, %v2584_v15  ;;  %v5694_v15 = vld [vmem:[#allocation6_spill] sm:$0xff] }
 0x41f   : > { %vm2610_vm14 = vcmp.eq.f32.partialorder %v2609_v32, 8.507059e+37  ;;  %v2660_v24 = vunpack.c.h.bf16 %v5694_v15  ;;  %v2659_v56 = vunpack.c.l.bf16 %v5694_v15 }
 0x420   : > { %v2387_v49 = vmul.f32 1.442695, %v2356_v61  ;;  %v2589_v37 = vadd.f32 %v5465_v41, %v2588_v59  ;;  %v2682_v8 = vpack.c.bf16 %v2672_v34, %v2671_v57 }
 0x421   : > { %v4039_v27 = vpop.eup %4038 }
 0x422   : > { %v4041_v35 = vpop.eup %4040  ;;  %v2601_v1 = vmul.f32 %v4039_v27, %v2402_v55  ;;  %vm2606_vm10 = vweird.f32 %v4039_v27  ;;  %v2593_v13 = vsel %vm2592_vm5, %v5465_v41, %v2589_v37  ;;  %v5500_v46 = vpop.f32.mrf.mxu3 }
 0x423   : > { %v2403_v54 = vadd.f32 1.0, %v4041_v35  ;;  %vm2607_vm13 = vmor %vm2605_vm12, %vm2606_vm10  ;;  %v2598_v7 = vsel %vm2595_vm2, %v2597_v12, %v2593_v13  ;;  %v2779_v35 = vpop.f32.mrf.mxu0 }
 0x424   : > { %v2602_v60 = vsub.f32 1.0, %v2601_v1  ;;  %v2599_v45 = vmul.f32 %v2598_v7, %v5415_v6 }
 0x425   : > { %4042 = vrcp.f32 %v2403_v54  ;;  %v2626_v0 = vand.u32 2147483648, %v2403_v54  ;;  %vm2620_vm3 = vweird.f32 %v2403_v54  ;;  %v2624_v63 = vand.u32 2147483647, %v2403_v54 }
 0x426   : > { %v2603_v58 = vmul.f32 %v4039_v27, %v2602_v60  ;;  %4044 = vpow2.f32 %v2387_v49  ;;  %3578 = vmatmul.msk.bf16.gmra.mxu3 %vm658_vm1, %v2682_v8  ;;  %v2673_v48 = vadd.f32 %v2657_v47, %v2599_v45 }
 0x427   : > { %v2627_v9 = vor.u32 1.1754944e-38, %v2626_v0  ;;  %vm2625_vm7 = vcmp.eq.f32.partialorder %v2624_v63, 8.507059e+37 }
 0x428   : > { %v2604_v14 = vadd.f32 %v4039_v27, %v2603_v58 }
 0x42a   : > { %v2608_v51 = vsel %vm2607_vm13, %v4039_v27, %v2604_v14  ;;  %v5506_v59 = vpop.f32.mrf.mxu3 }
 0x42b   : > { %v4043_v3 = vpop.eup %4042  ;;  %v2613_v29 = vsel %vm2610_vm14, %v2612_v23, %v2608_v51 }
 0x42c   : > { %v4045_v42 = vpop.eup %4044  ;;  %v2616_v52 = vmul.f32 %v4043_v3, %v2403_v54  ;;  %v2614_v44 = vmul.f32 %v2613_v29, %v5438_v22  ;;  %vm2621_vm0 = vweird.f32 %v4043_v3  ;;  %v2781_v54 = vpop.f32.mrf.mxu0 }
 0x42d   : > { %v2404_v28 = vadd.f32 1.0, %v4045_v42  ;;  %vm2622_vm4 = vmor %vm2620_vm3, %vm2621_vm0 }
 0x42e   : > { %v2617_v4 = vsub.f32 1.0, %v2616_v52  ;;  %v2674_v36 = vadd.f32 %v2658_v10, %v2614_v44 }
 0x42f   : > { %4046 = vrcp.f32 %v2404_v28  ;;  %v2641_v6 = vand.u32 2147483648, %v2404_v28  ;;  %v2639_v18 = vand.u32 2147483647, %v2404_v28  ;;  %vm2635_vm8 = vweird.f32 %v2404_v28 }
 0x430   : > { %v2618_v20 = vmul.f32 %v4043_v3, %v2617_v4  ;;  %v2683_v41 = vpack.c.bf16 %v2674_v36, %v2673_v48 }
 0x431   : > { %v2642_v62 = vor.u32 1.1754944e-38, %v2641_v6  ;;  %vm2640_vm10 = vcmp.eq.f32.partialorder %v2639_v18, 8.507059e+37 }
 0x432   : > { %v2619_v33 = vadd.f32 %v4043_v3, %v2618_v20  ;;  %v5509_v1 = vpop.f32.mrf.mxu3 }
 0x434   : > { %v2623_v55 = vsel %vm2622_vm4, %v4043_v3, %v2619_v33 }
 0x435   : > { %v4047_v31 = vpop.eup %4046  ;;  %v2628_v5 = vsel %vm2625_vm7, %v2627_v9, %v2623_v55 }
 0x436   : > { %v2631_v22 = vmul.f32 %v4047_v31, %v2404_v28  ;;  %3579 = vmatmul.msk.bf16.gmra.mxu3 %vm658_vm1, %v2683_v41  ;;  %vm2636_vm6 = vweird.f32 %v4047_v31  ;;  %v2629_v39 = vmul.f32 %v2628_v5, %v5455_v19  ;;  %v5514_v19 = vld [vmem:[%s5655_s10] ss:$0 sm:$0xff] }
 0x437   : > { %vm2637_vm9 = vmor %vm2635_vm8, %vm2636_vm6 }
 0x438   : > { %v2632_v25 = vsub.f32 1.0, %v2631_v22  ;;  %v2675_v61 = vadd.f32 %v2659_v56, %v2629_v39 }
 0x43a   : > { %v2633_v50 = vmul.f32 %v4047_v31, %v2632_v25 }
 0x43c   : > { %v2634_v21 = vadd.f32 %v4047_v31, %v2633_v50 }
 0x43e   : > { %v2638_v38 = vsel %vm2637_vm9, %v4047_v31, %v2634_v21 }
 0x43f   : > { %v2643_v16 = vsel %vm2640_vm10, %v2642_v62, %v2638_v38 }
 0x440   : > { %v2644_v40 = vmul.f32 %v2643_v16, %v5479_v30  ;;  %v2784_v37 = vpop.f32.mrf.mxu0 }
 0x442   : > { %v2676_v27 = vadd.f32 %v2660_v24, %v2644_v40 }
 0x444   : > { %v2684_v34 = vpack.c.bf16 %v2676_v27, %v2675_v61 }
 0x446   : > { %3580 = vmatmul.msk.bf16.gmra.mxu3 %vm658_vm1, %v2684_v34 }
 0x448   : > { %v2786_v51 = vpop.f32.mrf.mxu0 }
 0x450   : > { %v2789_v20 = vpop.f32.mrf.mxu0 }
 0x455   : > { %v2855_v49 = vpop.f32.mrf.mxu3 }
 0x456   : > { %v2856_v57 = vadd.f32 %v2855_v49, %v2779_v35 }
 0x458   : > { %v2899_v30 = vadd.f32 %v5514_v19, %v2856_v57  ;;  %v2791_v15 = vpop.f32.mrf.mxu0 }
 0x45a   : > { %v2915_v26 = vsub.f32 0.0, %v2899_v30 }
 0x45c   : > { %v2931_v60 = vmul.f32 1.442695, %v2915_v26 }
 0x45d   : > { %v2857_v17 = vpop.f32.mrf.mxu3 }
 0x45e   : > { %4048 = vpow2.f32 %v2931_v60  ;;  %v2858_v8 = vadd.f32 %v2857_v17, %v2781_v54 }
 0x460   : > { %v5518_v58 = vadd.f32 %v5514_v19, %v2858_v8 }
 0x462   : > { %v2916_v32 = vsub.f32 0.0, %v5518_v58 }
 0x464   : > { %v4049_v53 = vpop.eup %4048  ;;  %v2933_v14 = vmul.f32 1.442695, %v2916_v32 }
 0x465   : > { %v2963_v13 = vadd.f32 1.0, %v4049_v53  ;;  %v2860_v23 = vpop.f32.mrf.mxu3 }
 0x466   : > { %4050 = vpow2.f32 %v2933_v14  ;;  %v2861_v12 = vadd.f32 %v2860_v23, %v2784_v37  ;;  %v2794_v14 = vpop.f32.mrf.mxu0 }
 0x467   : > { %4052 = vrcp.f32 %v2963_v13  ;;  %v2990_v36 = vand.u32 2147483648, %v2963_v13  ;;  %v2988_v31 = vand.u32 2147483647, %v2963_v13  ;;  %vm2984_vm11 = vweird.f32 %v2963_v13 }
 0x468   : > { %v5522_v3 = vadd.f32 %v5514_v19, %v2861_v12 }
 0x469   : > { %v2991_v25 = vor.u32 1.1754944e-38, %v2990_v36  ;;  %vm2989_vm12 = vcmp.eq.f32.partialorder %v2988_v31, 8.507059e+37 }
 0x46a   : > { %v2917_v29 = vsub.f32 0.0, %v5522_v3 }
 0x46c   : > { %v4051_v42 = vpop.eup %4050  ;;  %v2935_v7 = vmul.f32 1.442695, %v2917_v29 }
 0x46d   : > { %v4053_v52 = vpop.eup %4052  ;;  %v2964_v44 = vadd.f32 1.0, %v4051_v42  ;;  %v2862_v28 = vpop.f32.mrf.mxu3 }
 0x46e   : > { %v2980_v10 = vmul.f32 %v4053_v52, %v2963_v13  ;;  %4054 = vpow2.f32 %v2935_v7  ;;  %v2863_v4 = vadd.f32 %v2862_v28, %v2786_v51  ;;  %vm2985_vm1 = vweird.f32 %v4053_v52 }
 0x46f   : > { %4056 = vrcp.f32 %v2964_v44  ;;  %vm2986_vm5 = vmor %vm2984_vm11, %vm2985_vm1  ;;  %v3005_v21 = vand.u32 2147483648, %v2964_v44  ;;  %v3003_v38 = vand.u32 2147483647, %v2964_v44  ;;  %vm2999_vm14 = vweird.f32 %v2964_v44 }
 0x470   : > { %v2981_v45 = vsub.f32 1.0, %v2980_v10  ;;  %v5526_v47 = vadd.f32 %v5514_v19, %v2863_v4 }
 0x471   : > { %v3006_v40 = vor.u32 1.1754944e-38, %v3005_v21  ;;  %vm3004_vm0 = vcmp.eq.f32.partialorder %v3003_v38, 8.507059e+37 }
 0x472   : > { %v2982_v48 = vmul.f32 %v4053_v52, %v2981_v45  ;;  %v2918_v33 = vsub.f32 0.0, %v5526_v47 }
 0x474   : > { %v4055_v41 = vpop.eup %4054  ;;  %v2983_v0 = vadd.f32 %v4053_v52, %v2982_v48  ;;  %v2937_v22 = vmul.f32 1.442695, %v2918_v33 }
 0x475   : > { %v4057_v63 = vpop.eup %4056  ;;  %v2965_v55 = vadd.f32 1.0, %v4055_v41 }
 0x476   : > { %v2987_v6 = vsel %vm2986_vm5, %v4053_v52, %v2983_v0  ;;  %v2995_v9 = vmul.f32 %v4057_v63, %v2964_v44  ;;  %4058 = vpow2.f32 %v2937_v22  ;;  %vm3000_vm13 = vweird.f32 %v4057_v63  ;;  %v2796_v0 = vpop.f32.mrf.mxu0 }
 0x477   : > { %v2992_v50 = vsel %vm2989_vm12, %v2991_v25, %v2987_v6  ;;  %4060 = vrcp.f32 %v2965_v55  ;;  %vm3001_vm2 = vmor %vm2999_vm14, %vm3000_vm13  ;;  %v3020_v26 = vand.u32 2147483648, %v2965_v55  ;;  %v3018_v37 = vand.u32 2147483647, %v2965_v55 }
 0x478   : > { %v2993_v18 = vmul.f32 %v2992_v50, %v2899_v30  ;;  %v2996_v5 = vsub.f32 1.0, %v2995_v9  ;;  %vm3014_vm4 = vweird.f32 %v2965_v55 }
 0x479   : > { %v2865_v16 = vpop.f32.mrf.mxu3  ;;  %vm3019_vm7 = vcmp.eq.f32.partialorder %v3018_v37, 8.507059e+37 }
 0x47a   : > { %3219 = vst.msk [vmem:[%s4334_s20] sm:$0xff] %vm1484_vm15, %v2993_v18  ;;  %v2997_v62 = vmul.f32 %v4057_v63, %v2996_v5  ;;  %v2866_v61 = vadd.f32 %v2865_v16, %v2789_v20 }
 0x47c   : > { %v4059_v24 = vpop.eup %4058  ;;  %v2998_v39 = vadd.f32 %v4057_v63, %v2997_v62  ;;  %v5533_v30 = vadd.f32 %v5514_v19, %v2866_v61 }
 0x47d   : > { %v4061_v56 = vpop.eup %4060  ;;  %v2966_v27 = vadd.f32 1.0, %v4059_v24 }
 0x47e   : > { %v3002_v34 = vsel %vm3001_vm2, %v4057_v63, %v2998_v39  ;;  %v3010_v35 = vmul.f32 %v4061_v56, %v2965_v55  ;;  %vm3015_vm3 = vweird.f32 %v4061_v56  ;;  %v2919_v17 = vsub.f32 0.0, %v5533_v30 }
 0x47f   : > { %v3007_v54 = vsel %vm3004_vm0, %v3006_v40, %v3002_v34  ;;  %4062 = vrcp.f32 %v2966_v27  ;;  %vm3016_vm6 = vmor %vm3014_vm4, %vm3015_vm3  ;;  %v3035_v44 = vand.u32 2147483648, %v2966_v27  ;;  %v3033_v4 = vand.u32 2147483647, %v2966_v27 }
 0x480   : > { %v3008_v49 = vmul.f32 %v3007_v54, %v5518_v58  ;;  %v3011_v57 = vsub.f32 1.0, %v3010_v35  ;;  %v2939_v32 = vmul.f32 1.442695, %v2919_v17  ;;  %v3021_v58 = vor.u32 1.1754944e-38, %v3020_v26 }
 0x481   : > { %v2867_v53 = vpop.f32.mrf.mxu3  ;;  %vm3029_vm9 = vweird.f32 %v2966_v27  ;;  %v3036_v31 = vor.u32 1.1754944e-38, %v3035_v44  ;;  %vm3034_vm1 = vcmp.eq.f32.partialorder %v3033_v4, 8.507059e+37 }
 0x482   : > { %3220 = vst.msk [vmem:[%s4334_s20 + $0x8] sm:$0xff] %vm1484_vm15, %v3008_v49  ;;  %v3012_v60 = vmul.f32 %v4061_v56, %v3011_v57  ;;  %v2868_v23 = vadd.f32 %v2867_v53, %v2791_v15  ;;  %4064 = vpow2.f32 %v2939_v32  ;;  %v2799_v15 = vpop.f32.mrf.mxu0 }
 0x484   : > { %v3013_v8 = vadd.f32 %v4061_v56, %v3012_v60  ;;  %v5539_v42 = vadd.f32 %v5514_v19, %v2868_v23 }
 0x485   : > { %v4063_v13 = vpop.eup %4062 }
 0x486   : > { %v3017_v12 = vsel %vm3016_vm6, %v4061_v56, %v3013_v8  ;;  %v3025_v51 = vmul.f32 %v4063_v13, %v2966_v27  ;;  %v2920_v28 = vsub.f32 0.0, %v5539_v42  ;;  %vm3030_vm8 = vweird.f32 %v4063_v13 }
 0x487   : > { %v3022_v29 = vsel %vm3019_vm7, %v3021_v58, %v3017_v12  ;;  %vm3031_vm10 = vmor %vm3029_vm9, %vm3030_vm8 }
 0x488   : > { %v3023_v7 = vmul.f32 %v3022_v29, %v5522_v3  ;;  %v3026_v52 = vsub.f32 1.0, %v3025_v51  ;;  %v2941_v45 = vmul.f32 1.442695, %v2920_v28  ;;  %v4065_v20 = vpop.eup %4064 }
 0x489   : > { %v2870_v48 = vpop.f32.mrf.mxu3  ;;  %v2967_v33 = vadd.f32 1.0, %v4065_v20 }
 0x48a   : > { %3221 = vst.msk [vmem:[%s4334_s20 + $0x10] sm:$0xff] %vm1484_vm15, %v3023_v7  ;;  %v3027_v10 = vmul.f32 %v4063_v13, %v3026_v52  ;;  %4066 = vpow2.f32 %v2941_v45  ;;  %v2871_v3 = vadd.f32 %v2870_v48, %v2794_v14  ;;  %v2801_v23 = vpop.f32.mrf.mxu0 }
 0x48b   : > { %4068 = vrcp.f32 %v2967_v33  ;;  %v3050_v24 = vand.u32 2147483648, %v2967_v33  ;;  %v3048_v56 = vand.u32 2147483647, %v2967_v33  ;;  %vm3044_vm5 = vweird.f32 %v2967_v33 }
 0x48c   : > { %v3028_v36 = vadd.f32 %v4063_v13, %v3027_v10  ;;  %v5547_v25 = vadd.f32 %v5514_v19, %v2871_v3 }
 0x48d   : > { %v3051_v54 = vor.u32 1.1754944e-38, %v3050_v24  ;;  %vm3049_vm13 = vcmp.eq.f32.partialorder %v3048_v56, 8.507059e+37 }
 0x48e   : > { %v3032_v41 = vsel %vm3031_vm10, %v4063_v13, %v3028_v36  ;;  %v2921_v55 = vsub.f32 0.0, %v5547_v25 }
 0x48f   : > { %v3037_v22 = vsel %vm3034_vm1, %v3036_v31, %v3032_v41 }
 0x490   : > { %v3038_v63 = vmul.f32 %v3037_v22, %v5526_v47  ;;  %v4067_v6 = vpop.eup %4066  ;;  %v2943_v50 = vmul.f32 1.442695, %v2921_v55 }
 0x491   : > { %v2968_v9 = vadd.f32 1.0, %v4067_v6  ;;  %v2872_v18 = vpop.f32.mrf.mxu3  ;;  %v4069_v5 = vpop.eup %4068 }
 0x492   : > { %3222 = vst.msk [vmem:[%s4334_s20 + $0x18] sm:$0xff] %vm1484_vm15, %v3038_v63  ;;  %v2873_v21 = vadd.f32 %v2872_v18, %v2796_v0  ;;  %v3040_v62 = vmul.f32 %v4069_v5, %v2967_v33  ;;  %vm3045_vm11 = vweird.f32 %v4069_v5 }
 0x493   : > { %4070 = vrcp.f32 %v2968_v9  ;;  %vm3046_vm12 = vmor %vm3044_vm5, %vm3045_vm11  ;;  %v3065_v53 = vand.u32 2147483648, %v2968_v9  ;;  %v3063_v13 = vand.u32 2147483647, %v2968_v9  ;;  %vm3059_vm2 = vweird.f32 %v2968_v9 }
 0x494   : > { %4072 = vpow2.f32 %v2943_v50  ;;  %v5553_v38 = vadd.f32 %v5514_v19, %v2873_v21  ;;  %v3041_v47 = vsub.f32 1.0, %v3040_v62 }
 0x495   : > { %v3066_v7 = vor.u32 1.1754944e-38, %v3065_v53  ;;  %vm3064_vm3 = vcmp.eq.f32.partialorder %v3063_v13, 8.507059e+37 }
 0x496   : > { %v2922_v39 = vsub.f32 0.0, %v5553_v38  ;;  %v3042_v16 = vmul.f32 %v4069_v5, %v3041_v47 }
 0x498   : > { %v2945_v40 = vmul.f32 1.442695, %v2922_v39  ;;  %v3043_v61 = vadd.f32 %v4069_v5, %v3042_v16 }
 0x499   : > { %v4071_v27 = vpop.eup %4070  ;;  %v2875_v34 = vpop.f32.mrf.mxu3 }
 0x49a   : > { %v4073_v35 = vpop.eup %4072  ;;  %v3055_v49 = vmul.f32 %v4071_v27, %v2968_v9  ;;  %4074 = vpow2.f32 %v2945_v40  ;;  %v2876_v57 = vadd.f32 %v2875_v34, %v2799_v15  ;;  %v3047_v26 = vsel %vm3046_vm12, %v4069_v5, %v3043_v61 }
 0x49b   : > { %v2969_v60 = vadd.f32 1.0, %v4073_v35  ;;  %v3052_v37 = vsel %vm3049_vm13, %v3051_v54, %v3047_v26  ;;  %vm3060_vm14 = vweird.f32 %v4071_v27 }
 0x49c   : > { %v3056_v17 = vsub.f32 1.0, %v3055_v49  ;;  %v5557_v8 = vadd.f32 %v5514_v19, %v2876_v57  ;;  %v3053_v32 = vmul.f32 %v3052_v37, %v5533_v30  ;;  %vm3061_vm0 = vmor %vm3059_vm2, %vm3060_vm14 }
 0x49d   : > { %4076 = vrcp.f32 %v2969_v60  ;;  %v3078_v31 = vand.u32 2147483647, %v2969_v60  ;;  %v3080_v33 = vand.u32 2147483648, %v2969_v60  ;;  %vm3074_vm6 = vweird.f32 %v2969_v60 }
 0x49e   : > { %v3057_v14 = vmul.f32 %v4071_v27, %v3056_v17  ;;  %v2923_v58 = vsub.f32 0.0, %v5557_v8  ;;  %3223 = vst.msk [vmem:[%s4334_s20 + $0x20] sm:$0xff] %vm1484_vm15, %v3053_v32 }
 0x49f   : > { %vm3079_vm8 = vcmp.eq.f32.partialorder %v3078_v31, 8.507059e+37  ;;  %v3081_v18 = vor.u32 1.1754944e-38, %v3080_v33 }
 0x4a0   : > { %v4075_v12 = vpop.eup %4074  ;;  %v3058_v51 = vadd.f32 %v4071_v27, %v3057_v14  ;;  %v2947_v29 = vmul.f32 1.442695, %v2923_v58 }
 0x4a1   : > { %v2970_v52 = vadd.f32 1.0, %v4075_v12  ;;  %v2877_v44 = vpop.f32.mrf.mxu3 }
 0x4a2   : > { %v3062_v30 = vsel %vm3061_vm0, %v4071_v27, %v3058_v51  ;;  %4078 = vpow2.f32 %v2947_v29  ;;  %v2878_v28 = vadd.f32 %v2877_v44, %v2801_v23 }
 0x4a3   : > { %v4077_v10 = vpop.eup %4076  ;;  %v3067_v4 = vsel %vm3064_vm3, %v3066_v7, %v3062_v30  ;;  %4080 = vrcp.f32 %v2970_v52  ;;  %v3093_v15 = vand.u32 2147483647, %v2970_v52  ;;  %v3095_v24 = vand.u32 2147483648, %v2970_v52 }
 0x4a4   : > { %v3068_v45 = vmul.f32 %v3067_v4, %v5539_v42  ;;  %v3070_v20 = vmul.f32 %v4077_v10, %v2969_v60  ;;  %v5565_v36 = vadd.f32 %v5514_v19, %v2878_v28  ;;  %vm3075_vm4 = vweird.f32 %v4077_v10 }
 0x4a5   : > { %vm3076_vm7 = vmor %vm3074_vm6, %vm3075_vm4  ;;  %vm3089_vm10 = vweird.f32 %v2970_v52  ;;  %v3096_v61 = vor.u32 1.1754944e-38, %v3095_v24  ;;  %vm3094_vm11 = vcmp.eq.f32.partialorder %v3093_v15, 8.507059e+37 }
 0x4a6   : > { %3224 = vst.msk [vmem:[%s4334_s20 + $0x28] sm:$0xff] %vm1484_vm15, %v3068_v45  ;;  %v3071_v48 = vsub.f32 1.0, %v3070_v20  ;;  %v2924_v3 = vsub.f32 0.0, %v5565_v36 }
 0x4a8   : > { %v4079_v41 = vpop.eup %4078  ;;  %v3072_v0 = vmul.f32 %v4077_v10, %v3071_v48  ;;  %v2949_v55 = vmul.f32 1.442695, %v2924_v3 }
 0x4a9   : > { %v4081_v22 = vpop.eup %4080  ;;  %v2971_v63 = vadd.f32 1.0, %v4079_v41  ;;  %v2880_v6 = vpop.f32.mrf.mxu3 }
 0x4aa   : > { %v3073_v9 = vadd.f32 %v4077_v10, %v3072_v0  ;;  %v3085_v42 = vmul.f32 %v4081_v22, %v2970_v52  ;;  %v2881_v50 = vadd.f32 %v2880_v6, %v5473_v43  ;;  %vm3090_vm9 = vweird.f32 %v4081_v22 }
 0x4ab   : > { %4082 = vrcp.f32 %v2971_v63  ;;  %vm3091_vm1 = vmor %vm3089_vm10, %vm3090_vm9  ;;  %v3110_v17 = vand.u32 2147483648, %v2971_v63  ;;  %v3108_v53 = vand.u32 2147483647, %v2971_v63  ;;  %vm3104_vm12 = vweird.f32 %v2971_v63 }
 0x4ac   : > { %v3077_v5 = vsel %vm3076_vm7, %v4077_v10, %v3073_v9  ;;  %v3086_v21 = vsub.f32 1.0, %v3085_v42  ;;  %4084 = vpow2.f32 %v2949_v55  ;;  %v5572_v62 = vadd.f32 %v5514_v19, %v2881_v50 }
 0x4ad   : > { %v3082_v47 = vsel %vm3079_vm8, %v3081_v18, %v3077_v5  ;;  %vm3109_vm14 = vcmp.eq.f32.partialorder %v3108_v53, 8.507059e+37 }
 0x4ae   : > { %v3083_v39 = vmul.f32 %v3082_v47, %v5547_v25  ;;  %v3087_v16 = vmul.f32 %v4081_v22, %v3086_v21  ;;  %v2925_v43 = vsub.f32 0.0, %v5572_v62 }
 0x4b0   : > { %3225 = vst.msk [vmem:[%s4334_s20 + $0x30] sm:$0xff] %vm1484_vm15, %v3083_v39  ;;  %v3088_v56 = vadd.f32 %v4081_v22, %v3087_v16  ;;  %v2951_v40 = vmul.f32 1.442695, %v2925_v43 }
 0x4b1   : > { %v4083_v27 = vpop.eup %4082  ;;  %v2882_v34 = vpop.f32.mrf.mxu3 }
 0x4b2   : > { %v4085_v35 = vpop.eup %4084  ;;  %v3092_v54 = vsel %vm3091_vm1, %v4081_v22, %v3088_v56  ;;  %v3100_v49 = vmul.f32 %v4083_v27, %v2971_v63  ;;  %4086 = vpow2.f32 %v2951_v40  ;;  %v2883_v26 = vadd.f32 %v2882_v34, %v5487_v11 }
 0x4b3   : > { %v3097_v25 = vsel %vm3094_vm11, %v3096_v61, %v3092_v54  ;;  %v2972_v57 = vadd.f32 1.0, %v4085_v35  ;;  %vm3105_vm5 = vweird.f32 %v4083_v27  ;;  %v3111_v11 = vor.u32 1.1754944e-38, %v3110_v17 }
 0x4b4   : > { %v3098_v60 = vmul.f32 %v3097_v25, %v5553_v38  ;;  %v3101_v37 = vsub.f32 1.0, %v3100_v49  ;;  %v5583_v14 = vadd.f32 %v5514_v19, %v2883_v26  ;;  %vm3106_vm13 = vmor %vm3104_vm12, %vm3105_vm5 }
 0x4b5   : > { %4088 = vrcp.f32 %v2972_v57  ;;  %v3123_v45 = vand.u32 2147483647, %v2972_v57  ;;  %v3125_v20 = vand.u32 2147483648, %v2972_v57  ;;  %vm3119_vm0 = vweird.f32 %v2972_v57 }
 0x4b6   : > { %3226 = vst.msk [vmem:[%s4334_s20 + $0x38] sm:$0xff] %vm1484_vm15, %v3098_v60  ;;  %v3102_v32 = vmul.f32 %v4083_v27, %v3101_v37  ;;  %v2926_v23 = vsub.f32 0.0, %v5583_v14 }
 0x4b7   : > { %vm3124_vm4 = vcmp.eq.f32.partialorder %v3123_v45, 8.507059e+37  ;;  %v3126_v63 = vor.u32 1.1754944e-38, %v3125_v20 }
 0x4b8   : > { %v4087_v13 = vpop.eup %4086  ;;  %v3103_v58 = vadd.f32 %v4083_v27, %v3102_v32  ;;  %v2953_v29 = vmul.f32 1.442695, %v2926_v23 }
 0x4b9   : > { %v2973_v38 = vadd.f32 1.0, %v4087_v13  ;;  %v2885_v12 = vpop.f32.mrf.mxu3 }
 0x4ba   : > { %v3107_v51 = vsel %vm3106_vm13, %v4083_v27, %v3103_v58  ;;  %v2886_v7 = vadd.f32 %v2885_v12, %v5496_v2 }
 0x4bb   : > { %v4089_v52 = vpop.eup %4088  ;;  %v3112_v44 = vsel %vm3109_vm14, %v3111_v11, %v3107_v51  ;;  %4090 = vrcp.f32 %v2973_v38  ;;  %v3138_v18 = vand.u32 2147483647, %v2973_v38  ;;  %v3140_v5 = vand.u32 2147483648, %v2973_v38 }
 0x4bc   : > { %v3113_v30 = vmul.f32 %v3112_v44, %v5557_v8  ;;  %v3115_v28 = vmul.f32 %v4089_v52, %v2972_v57  ;;  %4092 = vpow2.f32 %v2953_v29  ;;  %v5589_v10 = vadd.f32 %v5514_v19, %v2886_v7 }
 0x4bd   : > { %vm3120_vm2 = vweird.f32 %v4089_v52  ;;  %vm3134_vm7 = vweird.f32 %v2973_v38  ;;  %v3141_v39 = vor.u32 1.1754944e-38, %v3140_v5  ;;  %vm3139_vm9 = vcmp.eq.f32.partialorder %v3138_v18, 8.507059e+37 }
 0x4be   : > { %3227 = vst.msk [vmem:[%s4334_s20 + $0x40] sm:$0xff] %vm1484_vm15, %v3113_v30  ;;  %v3116_v4 = vsub.f32 1.0, %v3115_v28  ;;  %v2927_v48 = vsub.f32 0.0, %v5589_v10  ;;  %vm3121_vm3 = vmor %vm3119_vm0, %vm3120_vm2 }
 0x4c0   : > { %v3117_v31 = vmul.f32 %v4089_v52, %v3116_v4  ;;  %v2955_v33 = vmul.f32 1.442695, %v2927_v48 }
 0x4c1   : > { %v4091_v2 = vpop.eup %4090  ;;  %v2887_v3 = vpop.f32.mrf.mxu3 }
 0x4c2   : > { %v3118_v41 = vadd.f32 %v4089_v52, %v3117_v31  ;;  %v3130_v8 = vmul.f32 %v4091_v2, %v2973_v38  ;;  %v2888_v0 = vadd.f32 %v2887_v3, %v5500_v46  ;;  %v4093_v22 = vpop.eup %4092  ;;  %4094 = vpow2.f32 %v2955_v33 }
 0x4c3   : > { %v2974_v9 = vadd.f32 1.0, %v4093_v22  ;;  %vm3135_vm6 = vweird.f32 %v4091_v2 }
 0x4c4   : > { %v3122_v55 = vsel %vm3121_vm3, %v4089_v52, %v3118_v41  ;;  %v3131_v6 = vsub.f32 1.0, %v3130_v8  ;;  %v5596_v42 = vadd.f32 %v5514_v19, %v2888_v0  ;;  %vm3136_vm8 = vmor %vm3134_vm7, %vm3135_vm6 }
 0x4c5   : > { %v3127_v50 = vsel %vm3124_vm4, %v3126_v63, %v3122_v55  ;;  %4096 = vrcp.f32 %v2974_v9  ;;  %v3155_v57 = vand.u32 2147483648, %v2974_v9  ;;  %vm3149_vm1 = vweird.f32 %v2974_v9 }
 0x4c6   : > { %v3128_v21 = vmul.f32 %v3127_v50, %v5565_v36  ;;  %v3132_v47 = vmul.f32 %v4091_v2, %v3131_v6  ;;  %v2928_v46 = vsub.f32 0.0, %v5596_v42 }
 0x4c7   : > { %v3156_v23 = vor.u32 1.1754944e-38, %v3155_v57 }
 0x4c8   : > { %3228 = vst.msk [vmem:[%s4334_s20 + $0x48] sm:$0xff] %vm1484_vm15, %v3128_v21  ;;  %v3133_v15 = vadd.f32 %v4091_v2, %v3132_v47  ;;  %v4095_v24 = vpop.eup %4094  ;;  %v2957_v16 = vmul.f32 1.442695, %v2928_v46 }
 0x4c9   : > { %v2890_v43 = vpop.f32.mrf.mxu3  ;;  %v2975_v40 = vadd.f32 1.0, %v4095_v24 }
 0x4ca   : > { %v3137_v56 = vsel %vm3136_vm8, %v4091_v2, %v3133_v15  ;;  %v2891_v36 = vadd.f32 %v2890_v43, %v5506_v59  ;;  %4098 = vpow2.f32 %v2957_v16  ;;  %v3153_v59 = vand.u32 2147483647, %v2974_v9 }
 0x4cb   : > { %v3142_v27 = vsel %vm3139_vm9, %v3141_v39, %v3137_v56  ;;  %v4097_v61 = vpop.eup %4096  ;;  %4100 = vrcp.f32 %v2975_v40  ;;  %v3168_v29 = vand.u32 2147483647, %v2975_v40  ;;  %v3170_v7 = vand.u32 2147483648, %v2975_v40 }
 0x4cc   : > { %v3143_v34 = vmul.f32 %v3142_v27, %v5572_v62  ;;  %v3145_v35 = vmul.f32 %v4097_v61, %v2974_v9  ;;  %v5605_v54 = vadd.f32 %v5514_v19, %v2891_v36  ;;  %vm3150_vm10 = vweird.f32 %v4097_v61 }
 0x4cd   : > { %vm3151_vm11 = vmor %vm3149_vm1, %vm3150_vm10  ;;  %vm3154_vm5 = vcmp.eq.f32.partialorder %v3153_v59, 8.507059e+37  ;;  %vm3164_vm13 = vweird.f32 %v2975_v40  ;;  %vm3169_vm2 = vcmp.eq.f32.partialorder %v3168_v29, 8.507059e+37 }
 0x4ce   : > { %3229 = vst.msk [vmem:[%s4334_s20 + $0x50] sm:$0xff] %vm1484_vm15, %v3143_v34  ;;  %v3146_v49 = vsub.f32 1.0, %v3145_v35  ;;  %v2929_v25 = vsub.f32 0.0, %v5605_v54 }
 0x4d0   : > { %v4099_v26 = vpop.eup %4098  ;;  %v3147_v60 = vmul.f32 %v4097_v61, %v3146_v49  ;;  %v2959_v37 = vmul.f32 1.442695, %v2929_v25 }
 0x4d1   : > { %v2892_v17 = vpop.f32.mrf.mxu3  ;;  %v4101_v32 = vpop.eup %4100  ;;  %v2976_v53 = vadd.f32 1.0, %v4099_v26 }
 0x4d2   : > { %v2893_v62 = vadd.f32 %v2892_v17, %v5509_v1  ;;  %v3148_v13 = vadd.f32 %v4097_v61, %v3147_v60  ;;  %v3160_v58 = vmul.f32 %v4101_v32, %v2975_v40  ;;  %4102 = vpow2.f32 %v2959_v37 }
 0x4d3   : > { %4104 = vrcp.f32 %v2976_v53  ;;  %vm3165_vm12 = vweird.f32 %v4101_v32  ;;  %v3185_v3 = vand.u32 2147483648, %v2976_v53  ;;  %v3183_v8 = vand.u32 2147483647, %v2976_v53 }
 0x4d4   : > { %v3152_v11 = vsel %vm3151_vm11, %v4097_v61, %v3148_v13  ;;  %v3161_v38 = vsub.f32 1.0, %v3160_v58  ;;  %v5612_v12 = vadd.f32 %v5514_v19, %v2893_v62  ;;  %vm3166_vm14 = vmor %vm3164_vm13, %vm3165_vm12  ;;  %v3171_v19 = vor.u32 1.1754944e-38, %v3170_v7 }
 0x4d5   : > { %v3157_v51 = vsel %vm3154_vm5, %v3156_v23, %v3152_v11  ;;  %vm3179_vm3 = vweird.f32 %v2976_v53  ;;  %v3186_v55 = vor.u32 1.1754944e-38, %v3185_v3  ;;  %vm3184_vm6 = vcmp.eq.f32.partialorder %v3183_v8, 8.507059e+37 }
 0x4d6   : > { %v3158_v52 = vmul.f32 %v3157_v51, %v5583_v14  ;;  %v3162_v1 = vmul.f32 %v4101_v32, %v3161_v38  ;;  %v2930_v44 = vsub.f32 0.0, %v5612_v12 }
 0x4d8   : > { %v4103_v30 = vpop.eup %4102  ;;  %3230 = vst.msk [vmem:[%s4334_s20 + $0x58] sm:$0xff] %vm1484_vm15, %v3158_v52  ;;  %v3163_v28 = vadd.f32 %v4101_v32, %v3162_v1  ;;  %v2961_v4 = vmul.f32 1.442695, %v2930_v44 }
 0x4d9   : > { %v4105_v45 = vpop.eup %4104  ;;  %v2977_v20 = vadd.f32 1.0, %v4103_v30 }
 0x4da   : > { %v3167_v48 = vsel %vm3166_vm14, %v4101_v32, %v3163_v28  ;;  %v3175_v31 = vmul.f32 %v4105_v45, %v2976_v53  ;;  %4106 = vpow2.f32 %v2961_v4  ;;  %vm3180_vm0 = vweird.f32 %v4105_v45 }
 0x4db   : > { %v3172_v14 = vsel %vm3169_vm2, %v3171_v19, %v3167_v48  ;;  %4108 = vrcp.f32 %v2977_v20  ;;  %vm3181_vm4 = vmor %vm3179_vm3, %vm3180_vm0  ;;  %v3200_v21 = vand.u32 2147483648, %v2977_v20  ;;  %v3198_v46 = vand.u32 2147483647, %v2977_v20 }
 0x4dc   : > { %v3173_v2 = vmul.f32 %v3172_v14, %v5589_v10  ;;  %v3176_v33 = vsub.f32 1.0, %v3175_v31  ;;  %vm3194_vm8 = vweird.f32 %v2977_v20 }
 0x4dd   : > { %v3201_v39 = vor.u32 1.1754944e-38, %v3200_v21  ;;  %vm3199_vm10 = vcmp.eq.f32.partialorder %v3198_v46, 8.507059e+37 }
 0x4de   : > { %3231 = vst.msk [vmem:[%s4334_s20 + $0x60] sm:$0xff] %vm1484_vm15, %v3173_v2  ;;  %v3177_v41 = vmul.f32 %v4105_v45, %v3176_v33 }
 0x4e0   : > { %v4107_v0 = vpop.eup %4106  ;;  %v3178_v22 = vadd.f32 %v4105_v45, %v3177_v41 }
 0x4e1   : > { %v4109_v63 = vpop.eup %4108  ;;  %v2978_v6 = vadd.f32 1.0, %v4107_v0 }
 0x4e2   : > { %v3182_v9 = vsel %vm3181_vm4, %v4105_v45, %v3178_v22  ;;  %v3190_v50 = vmul.f32 %v4109_v63, %v2977_v20  ;;  %vm3195_vm7 = vweird.f32 %v4109_v63 }
 0x4e3   : > { %v3187_v18 = vsel %vm3184_vm6, %v3186_v55, %v3182_v9  ;;  %4110 = vrcp.f32 %v2978_v6  ;;  %vm3196_vm9 = vmor %vm3194_vm8, %vm3195_vm7  ;;  %v3215_v36 = vand.u32 2147483648, %v2978_v6  ;;  %v3213_v61 = vand.u32 2147483647, %v2978_v6 }
 0x4e4   : > { %v3188_v10 = vmul.f32 %v3187_v18, %v5596_v42  ;;  %v3191_v5 = vsub.f32 1.0, %v3190_v50  ;;  %vm3209_vm11 = vweird.f32 %v2978_v6 }
 0x4e5   : > { %v3216_v35 = vor.u32 1.1754944e-38, %v3215_v36  ;;  %vm3214_vm12 = vcmp.eq.f32.partialorder %v3213_v61, 8.507059e+37 }
 0x4e6   : > { %3232 = vst.msk [vmem:[%s4334_s20 + $0x68] sm:$0xff] %vm1484_vm15, %v3188_v10  ;;  %v3192_v47 = vmul.f32 %v4109_v63, %v3191_v5 }
 0x4e8   : > { %v3193_v15 = vadd.f32 %v4109_v63, %v3192_v47 }
 0x4e9   : > { %v4111_v24 = vpop.eup %4110 }
 0x4ea   : > { %v3197_v16 = vsel %vm3196_vm9, %v4109_v63, %v3193_v15  ;;  %v3205_v43 = vmul.f32 %v4111_v24, %v2978_v6  ;;  %vm3210_vm1 = vweird.f32 %v4111_v24 }
 0x4eb   : > { %v3202_v56 = vsel %vm3199_vm10, %v3201_v39, %v3197_v16  ;;  %vm3211_vm5 = vmor %vm3209_vm11, %vm3210_vm1 }
 0x4ec   : > { %v3203_v42 = vmul.f32 %v3202_v56, %v5605_v54  ;;  %v3206_v40 = vsub.f32 1.0, %v3205_v43 }
 0x4ee   : > { %3233 = vst.msk [vmem:[%s4334_s20 + $0x70] sm:$0xff] %vm1484_vm15, %v3203_v42  ;;  %v3207_v27 = vmul.f32 %v4111_v24, %v3206_v40 }
 0x4f0   : > { %v3208_v34 = vadd.f32 %v4111_v24, %v3207_v27 }
 0x4f2   : > { %v3212_v49 = vsel %vm3211_vm5, %v4111_v24, %v3208_v34 }
 0x4f3   : > { %v3217_v25 = vsel %vm3214_vm12, %v3216_v35, %v3212_v49 }
 0x4f4   : > { %v3218_v57 = vmul.f32 %v3217_v25, %v5612_v12 }
 0x4f6   : > { %3234 = vst.msk [vmem:[%s4334_s20 + $0x78] sm:$0xff] %vm1484_vm15, %v3218_v57 }
 0x4f7 PF: > { %s21_s21 = sadd.s32 1, %s4156_s21   ;;  %s5695_s18 = sld [smem:[#allocation3_spill]] }
 0x4f8   : > { %p18_p0 = scmp.ge.s32.totalorder %s21_s21, 6   ;;  %s5696_s23 = sld [smem:[#allocation4_spill]] }
 0x4f9   : > { %s5697_s20 = sld [smem:[#allocation5_spill]]  ;;  %s5698_s17 = smov %s4148_s19 }
 0x4fa   :  { %20 = sbr.rel (!%p18_p0) target bundleno = 4 (0x4), region = 125 }
 0x4fe   : > { %s5699_s19 = smov %s5696_s23 }

</bundles_post_ra>
